<compile_context>
chip_gen: v5e
topology: v5e:2x2
jax: 0.10.0
libtpu: 0.0.40
codegen_flags: <defaults>
</compile_context>

<pallas_src>
import functools

import jax
import jax.numpy as jnp
from jax import lax
from jax.experimental import pallas as pl
from jax.experimental.pallas import tpu as pltpu

EPS = 1e-5
LANE = 128


def _round_up(x, m):
    return (x + m - 1) // m * m


def _vmem_limit_bytes():
    """Per-generation scoped-VMEM limit (~3/4 of physical), with a safe fallback."""
    try:
        cap = int(pltpu.get_tpu_info().vmem_capacity_bytes)
        return max(32 * 1024 * 1024, min(cap * 3 // 4, 100 * 1024 * 1024))
    except Exception:
        return 48 * 1024 * 1024


def _compiler_params(semantics, vmem_limit):
    return pltpu.CompilerParams(dimension_semantics=semantics,
                                vmem_limit_bytes=vmem_limit)


# ------------------------------ kernel helpers ------------------------------ #

def _conv3x3(pad_ref, wpair_ref, wlast_ref, hh, ww):
    """3x3 conv of the zero-padded (H+2, W+2, C) bf16 VMEM tile.

    Builds 3 dx-shifted flattened ((H+2)*W, C) views (<= 3 relayouts per conv);
    the dy taps of each view are contiguous row slices (aligned when W % 8 == 0).
    The dy=0/dy=1 taps are fused into one K=2C matmul, dy=2 is a K=C matmul.
    Accumulation is f32.
    """
    c = pad_ref.shape[-1]
    m = hh * ww
    acc = jnp.zeros((m, c), jnp.float32)
    for dx in range(3):
        view = pad_ref[:, dx:dx + ww, :].reshape((hh + 2) * ww, c)      # bf16
        pair = jnp.concatenate([view[0:m], view[ww:ww + m]], axis=-1)   # (M, 2C)
        acc = acc + jnp.dot(pair, wpair_ref[dx],
                            preferred_element_type=jnp.float32)
        acc = acc + jnp.dot(view[2 * ww:2 * ww + m], wlast_ref[dx],
                            preferred_element_type=jnp.float32)
    return acc


def _channel_stats(y):
    """(2, C) per-channel [sum; sum_of_squares] of an (M, C) f32 block."""
    s = jnp.sum(y, axis=0, keepdims=True)
    sq = jnp.sum(y * y, axis=0, keepdims=True)
    return jnp.concatenate([s, sq], axis=0)


# --------------------------------- kernels ---------------------------------- #

def conv1_stats_kernel(x_ref, wp_ref, wl_ref, y_ref, stats_ref, pad_ref,
                       *, bt, hh, ww):
    """Pass 1: conv3x3(x) -> y1 (bf16, pre-BN) + per-step bn1 partial stats."""
    # Zero the halo every step: no reliance on scratch persistence / step-0 init,
    # so a "parallel" (megacore) grid split stays correct.
    pad_ref[...] = jnp.zeros_like(pad_ref)
    stats = jnp.zeros((2, pad_ref.shape[-1]), jnp.float32)
    for bi in range(bt):
        pad_ref[1:hh + 1, 1:ww + 1, :] = x_ref[bi]
        y = _conv3x3(pad_ref, wp_ref, wl_ref, hh, ww)     # f32
        y_ref[bi] = y.astype(y_ref.dtype)                 # bf16 to HBM
        stats = stats + _channel_stats(y)                 # stats from f32 values
    stats_ref[0] = stats


def bn_relu_conv2_stats_kernel(y1_ref, s1_ref, b1_ref, wp_ref, wl_ref,
                               y2_ref, stats_ref, pad_ref, *, bt, hh, ww):
    """Pass 2: relu(bn1(y1)) kept in VMEM -> conv3x3 -> y2 (bf16) + bn2 stats."""
    pad_ref[...] = jnp.zeros_like(pad_ref)
    scale = s1_ref[...]                                   # (1, C) f32, pre-folded
    bias = b1_ref[...]
    stats = jnp.zeros((2, pad_ref.shape[-1]), jnp.float32)
    for bi in range(bt):
        h1 = jnp.maximum(y1_ref[bi].astype(jnp.float32) * scale + bias, 0.0)
        pad_ref[1:hh + 1, 1:ww + 1, :] = h1.reshape(hh, ww, -1).astype(pad_ref.dtype)
        y2 = _conv3x3(pad_ref, wp_ref, wl_ref, hh, ww)
        y2_ref[bi] = y2.astype(y2_ref.dtype)
        stats = stats + _channel_stats(y2)
    stats_ref[0] = stats


def bn_add_relu_kernel(y2_ref, s2_ref, b2_ref, res_ref, o_ref):
    """Pass 3: bn2(y2) + residual -> ReLU, tiled over M (memory-bound FMA)."""
    y = y2_ref[...].astype(jnp.float32) * s2_ref[...] + b2_ref[...]
    o_ref[...] = jnp.maximum(y + res_ref[...].astype(jnp.float32), 0.0)


# ------------------------------ module wrapper ------------------------------ #

def init_params(key, inplanes, planes):
    """Deterministic synthetic parameters (PyTorch OIHW conv layout)."""
    ks = jax.random.split(key, 6)
    w1 = jax.random.normal(ks[0], (planes, inplanes, 3, 3), jnp.float32) / jnp.sqrt(9.0 * inplanes)
    w2 = jax.random.normal(ks[1], (planes, planes, 3, 3), jnp.float32) / jnp.sqrt(9.0 * planes)
    g1 = 1.0 + 0.1 * jax.random.normal(ks[2], (planes,), jnp.float32)
    b1 = 0.1 * jax.random.normal(ks[3], (planes,), jnp.float32)
    g2 = 1.0 + 0.1 * jax.random.normal(ks[4], (planes,), jnp.float32)
    b2 = 0.1 * jax.random.normal(ks[5], (planes,), jnp.float32)
    return dict(w1=w1, w2=w2, g1=g1, b1=b1, g2=g2, b2=b2)


def _prep_conv_weights(w_oihw, cpad):
    """OIHW -> (w_pair, w_last) bf16 tap matrices.

    w_pair[dx] = [tap(dy=0,dx); tap(dy=1,dx)] stacked along K  -> (2*Cpad, Cpad)
    w_last[dx] =  tap(dy=2,dx)                                 -> (Cpad, Cpad)
    """
    o, i, _, _ = w_oihw.shape
    taps = jnp.transpose(w_oihw, (2, 3, 1, 0))                       # (dy, dx, Cin, Cout)
    taps = jnp.pad(taps, ((0, 0), (0, 0), (0, cpad - i), (0, cpad - o)))
    w_pair = jnp.concatenate([taps[0], taps[1]], axis=1)             # (3, 2*Cpad, Cpad)
    w_last = taps[2]                                                 # (3, Cpad, Cpad)
    return w_pair.astype(jnp.bfloat16), w_last.astype(jnp.bfloat16)


def _prep_vec(v, cpad):
    # Padded gamma/beta lanes must stay 0 so padded channels normalize to
    # exactly 0 (they also carry zero data and a zero residual).
    return jnp.pad(v, (0, cpad - v.shape[0])).reshape(1, cpad).astype(jnp.float32)


def _fold_bn(stats, gamma, beta, inv_count):
    """(G, 2, C) partial [sum; sumsq] -> per-channel scale/bias (1, C) f32.

    Variance is E[x^2]-E[x]^2 accumulated in f32; fine at these sizes (a
    centered/Welford pass would be safer for very large N*H*W).
    """
    s = jnp.sum(stats, axis=0)
    mean = s[0:1] * inv_count
    var = s[1:2] * inv_count - mean * mean                # biased var (training BN)
    scale = gamma * lax.rsqrt(var + EPS)
    bias = beta - mean * scale
    return scale, bias


def _pick_batch_tile(n, h, w, cpad, vmem_limit):
    """Images per grid step: amortize per-step overhead, keep >=2 steps (megacore)."""
    per_image = 10 * h * w * cpad          # rough bf16 in/out working set incl. 2x buffering
    budget = vmem_limit // 4
    bt = 1
    for cand in range(2, n + 1):
        if n % cand == 0 and n // cand >= 2 and cand * per_image <= budget:
            bt = cand
    return bt


def _pick_tile_m(m):
    """Row tile for the mem-bound epilogue: prefer >=512 rows, multiple of 8."""
    for t in (2048, 1024, 512, 256, 128, 64, 32, 16, 8):
        if m % t == 0:
            return t
    return m   # TODO(synk): masked tail block for awkward M


def basic_block_forward(x_nchw, p):
    """Pallas implementation of BasicBlock.forward (stride=1, no downsample)."""
    n, cin, h, w = x_nchw.shape
    planes = p["w1"].shape[0]
    assert cin == planes, "identity residual requires inplanes == planes"

    cpad = _round_up(planes, LANE)          # lane-dense channel dimension
    m = n * h * w
    inv_count = 1.0 / float(m)
    vmem_limit = _vmem_limit_bytes()
    bt = _pick_batch_tile(n, h, w, cpad, vmem_limit)
    grid_b = n // bt

    # NCHW -> NHWC (zero-padded channels), bf16 once. The same buffer is reused
    # (free reshape) as the pass-3 residual -- no second f32 copy of x.
    x_img = jnp.pad(jnp.transpose(x_nchw, (0, 2, 3, 1)),
                    ((0, 0), (0, 0), (0, 0), (0, cpad - cin))).astype(jnp.bfloat16)

    w1p, w1l = _prep_conv_weights(p["w1"], cpad)
    w2p, w2l = _prep_conv_weights(p["w2"], cpad)
    g1, b1 = _prep_vec(p["g1"], cpad), _prep_vec(p["b1"], cpad)
    g2, b2 = _prep_vec(p["g2"], cpad), _prep_vec(p["b2"], cpad)

    def full(shape):  # whole-array resident block (weights, scale/bias)
        return pl.BlockSpec(shape, lambda b: (0,) * len(shape))

    # ---- pass 1: conv1 + per-step bn1 partial statistics ("parallel" batch) ---
    y1, s1 = pl.pallas_call(
        functools.partial(conv1_stats_kernel, bt=bt, hh=h, ww=w),
        grid=(grid_b,),
        in_specs=[pl.BlockSpec((bt, h, w, cpad), lambda b: (b, 0, 0, 0)),
                  full((3, 2 * cpad, cpad)), full((3, cpad, cpad))],
        out_specs=(pl.BlockSpec((bt, h * w, cpad), lambda b: (b, 0, 0)),
                   pl.BlockSpec((1, 2, cpad), lambda b: (b, 0, 0))),
        out_shape=(jax.ShapeDtypeStruct((n, h * w, cpad), jnp.bfloat16),
                   jax.ShapeDtypeStruct((grid_b, 2, cpad), jnp.float32)),
        scratch_shapes=[pltpu.VMEM((h + 2, w + 2, cpad), jnp.bfloat16)],
        compiler_params=_compiler_params(("parallel",), vmem_limit),
    )(x_img, w1p, w1l)

    scale1, bias1 = _fold_bn(s1, g1, b1, inv_count)   # tiny (1,C) op in the wrapper

    # ---- pass 2: bn1 + relu (VMEM only) -> conv2 + bn2 partial statistics ----
    y2, s2 = pl.pallas_call(
        functools.partial(bn_relu_conv2_stats_kernel, bt=bt, hh=h, ww=w),
        grid=(grid_b,),
        in_specs=[pl.BlockSpec((bt, h * w, cpad), lambda b: (b, 0, 0)),
                  full((1, cpad)), full((1, cpad)),
                  full((3, 2 * cpad, cpad)), full((3, cpad, cpad))],
        out_specs=(pl.BlockSpec((bt, h * w, cpad), lambda b: (b, 0, 0)),
                   pl.BlockSpec((1, 2, cpad), lambda b: (b, 0, 0))),
        out_shape=(jax.ShapeDtypeStruct((n, h * w, cpad), jnp.bfloat16),
                   jax.ShapeDtypeStruct((grid_b, 2, cpad), jnp.float32)),
        scratch_shapes=[pltpu.VMEM((h + 2, w + 2, cpad), jnp.bfloat16)],
        compiler_params=_compiler_params(("parallel",), vmem_limit),
    )(y1, scale1, bias1, w2p, w2l)

    scale2, bias2 = _fold_bn(s2, g2, b2, inv_count)

    # ---- pass 3: bn2 + residual add + relu, tiled over M ("parallel") --------
    tile_m = _pick_tile_m(m)
    out2d = pl.pallas_call(
        bn_add_relu_kernel,
        grid=(m // tile_m,),
        in_specs=[pl.BlockSpec((tile_m, cpad), lambda i: (i, 0)),
                  full((1, cpad)), full((1, cpad)),
                  pl.BlockSpec((tile_m, cpad), lambda i: (i, 0))],
        out_specs=pl.BlockSpec((tile_m, cpad), lambda i: (i, 0)),
        out_shape=jax.ShapeDtypeStruct((m, cpad), jnp.float32),
        compiler_params=_compiler_params(("parallel",), vmem_limit),
    )(y2.reshape(m, cpad), scale2, bias2, x_img.reshape(m, cpad))

    # Back to the module's NCHW contract (drop channel padding).
    out = out2d.reshape(n, h, w, cpad)[..., :planes]
    return jnp.transpose(out, (0, 3, 1, 2))


# ------------------------------ pure-JAX reference --------------------------- #

def reference_forward(x, p):
    def conv(x, w):
        return lax.conv_general_dilated(
            x, w, window_strides=(1, 1), padding=[(1, 1), (1, 1)],
            dimension_numbers=("NCHW", "OIHW", "NCHW"))

    def bn(x, g, b):
        mean = jnp.mean(x, axis=(0, 2, 3), keepdims=True)
        var = jnp.mean((x - mean) ** 2, axis=(0, 2, 3), keepdims=True)
        xhat = (x - mean) * lax.rsqrt(var + EPS)
        return g.reshape(1, -1, 1, 1) * xhat + b.reshape(1, -1, 1, 1)

    out = jax.nn.relu(bn(conv(x, p["w1"]), p["g1"], p["b1"]))
    out = bn(conv(out, p["w2"]), p["g2"], p["b2"])
    return jax.nn.relu(out + x)


# ------------------------------------ main ----------------------------------- #

if __name__ == "__main__":
    inplanes = planes = 4
    n, hgt, wid = 2, 16, 16

    key = jax.random.PRNGKey(0)
    kx, kp = jax.random.split(key)
    x = jax.random.normal(kx, (n, inplanes, hgt, wid), jnp.float32)
    params = init_params(kp, inplanes, planes)

    out = jax.block_until_ready(basic_block_forward(x, params))
    ref = jax.block_until_ready(reference_forward(x, params))

    assert out.shape == (n, planes, hgt, wid), out.shape
    # Matmul operands and stored intermediates are bf16 (f32 accumulation /
    # statistics); compare against the f32 reference with bf16-level tolerance.
    err = float(jnp.max(jnp.abs(out - ref)))
    assert jnp.allclose(out, ref, rtol=5e-2, atol=5e-2), err
    print("KERNEL_OK")
</pallas_src>

<mosaic_0001>
module attributes {stable_mosaic.version = 11 : i64} {
  func.func @conv1_stats_kernel(%arg0: i32, %arg1: memref<1x16x16x128xbf16, #tpu.memory_space<vmem>>, %arg2: memref<3x256x128xbf16, #tpu.memory_space<vmem>>, %arg3: memref<3x128x128xbf16, #tpu.memory_space<vmem>>, %arg4: memref<1x256x128xbf16, #tpu.memory_space<vmem>>, %arg5: memref<1x2x128xf32, #tpu.memory_space<vmem>>, %arg6: memref<18x18x128xbf16, #tpu.memory_space<vmem>>) attributes {dimension_semantics = [#tpu.dimension_semantics<parallel>], iteration_bounds = array<i64: 2>, scalar_prefetch = 0 : i64, scratch_operands = 1 : i64, tpu.core_type = #tpu.core_type<tc>, window_params = [{transform_indices = @transform_0, window_bounds = array<i64: 1, 16, 16, 128>}, {pipeline_mode = #tpu.pipeline_mode<synchronous>, transform_indices = @transform_1, window_bounds = array<i64: 3, 256, 128>}, {pipeline_mode = #tpu.pipeline_mode<synchronous>, transform_indices = @transform_2, window_bounds = array<i64: 3, 128, 128>}, {transform_indices = @transform_3, window_bounds = array<i64: 1, 256, 128>}, {transform_indices = @transform_4, window_bounds = array<i64: 1, 2, 128>}]} {
    %cst = arith.constant 0.000000e+00 : bf16
    %0 = vector.broadcast %cst : bf16 to vector<18x18x128xbf16>
    %c0 = arith.constant 0 : index
    %c0_0 = arith.constant 0 : index
    %c0_1 = arith.constant 0 : index
    %1 = vector.load %arg6[%c0, %c0_0, %c0_1] : memref<18x18x128xbf16, #tpu.memory_space<vmem>>, vector<18x18x128xbf16>
    tpu.vector_store %arg6[%c0, %c0_0, %c0_1], %0 {strides = array<i32>} : memref<18x18x128xbf16, #tpu.memory_space<vmem>>, vector<18x18x128xbf16>,
    %cst_2 = arith.constant 0.000000e+00 : f32
    %2 = vector.broadcast %cst_2 : f32 to vector<2x128xf32>
    %c0_3 = arith.constant 0 : index
    %c0_4 = arith.constant 0 : index
    %c0_5 = arith.constant 0 : index
    %c0_6 = arith.constant 0 : index
    %3 = vector.load %arg1[%c0_3, %c0_4, %c0_5, %c0_6] : memref<1x16x16x128xbf16, #tpu.memory_space<vmem>>, vector<1x16x16x128xbf16>
    %4 = vector.shape_cast %3 : vector<1x16x16x128xbf16> to vector<16x16x128xbf16>
    %c1 = arith.constant 1 : index
    %c1_7 = arith.constant 1 : index
    %c0_8 = arith.constant 0 : index
    %5 = vector.load %arg6[%c1, %c1_7, %c0_8] : memref<18x18x128xbf16, #tpu.memory_space<vmem>>, vector<16x16x128xbf16>
    tpu.vector_store %arg6[%c1, %c1_7, %c0_8], %4 {strides = array<i32>} : memref<18x18x128xbf16, #tpu.memory_space<vmem>>, vector<16x16x128xbf16>,
    %cst_9 = arith.constant 0.000000e+00 : f32
    %6 = vector.broadcast %cst_9 : f32 to vector<256x128xf32>
    %c0_10 = arith.constant 0 : index
    %c0_11 = arith.constant 0 : index
    %c0_12 = arith.constant 0 : index
    %7 = vector.load %arg6[%c0_10, %c0_11, %c0_12] : memref<18x18x128xbf16, #tpu.memory_space<vmem>>, vector<18x16x128xbf16>
    %8 = vector.shape_cast %7 : vector<18x16x128xbf16> to vector<288x128xbf16>
    %9 = vector.extract_strided_slice %8 {offsets = [0, 0], sizes = [256, 128], strides = [1, 1]} : vector<288x128xbf16> to vector<256x128xbf16>
    %10 = vector.extract_strided_slice %8 {offsets = [16, 0], sizes = [256, 128], strides = [1, 1]} : vector<288x128xbf16> to vector<256x128xbf16>
    %11 = tpu.concatenate %9, %10 in 1 : vector<256x128xbf16>, vector<256x128xbf16> -> vector<256x256xbf16>
    %c0_13 = arith.constant 0 : index
    %c0_14 = arith.constant 0 : index
    %c0_15 = arith.constant 0 : index
    %12 = vector.load %arg2[%c0_13, %c0_14, %c0_15] : memref<3x256x128xbf16, #tpu.memory_space<vmem>>, vector<1x256x128xbf16>
    %13 = vector.shape_cast %12 : vector<1x256x128xbf16> to vector<256x128xbf16>
    %cst_16 = arith.constant dense<0.000000e+00> : vector<256x128xf32>
    %14 = tpu.matmul %11, %13, %cst_16 {dimension_numbers = #tpu.dot_dimension_numbers<[1], [0], [0], [1], [0, 0, 1, 1], [], []>} : vector<256x256xbf16>, vector<256x128xbf16>, vector<256x128xf32> -> vector<256x128xf32>
    %15 = arith.addf %6, %14 : vector<256x128xf32>
    %16 = vector.extract_strided_slice %8 {offsets = [32, 0], sizes = [256, 128], strides = [1, 1]} : vector<288x128xbf16> to vector<256x128xbf16>
    %c0_17 = arith.constant 0 : index
    %c0_18 = arith.constant 0 : index
    %c0_19 = arith.constant 0 : index
    %17 = vector.load %arg3[%c0_17, %c0_18, %c0_19] : memref<3x128x128xbf16, #tpu.memory_space<vmem>>, vector<1x128x128xbf16>
    %18 = vector.shape_cast %17 : vector<1x128x128xbf16> to vector<128x128xbf16>
    %cst_20 = arith.constant dense<0.000000e+00> : vector<256x128xf32>
    %19 = tpu.matmul %16, %18, %cst_20 {dimension_numbers = #tpu.dot_dimension_numbers<[1], [0], [0], [1], [0, 0, 1, 1], [], []>} : vector<256x128xbf16>, vector<128x128xbf16>, vector<256x128xf32> -> vector<256x128xf32>
    %20 = arith.addf %15, %19 : vector<256x128xf32>
    %c0_21 = arith.constant 0 : index
    %c1_22 = arith.constant 1 : index
    %c0_23 = arith.constant 0 : index
    %21 = vector.load %arg6[%c0_21, %c1_22, %c0_23] : memref<18x18x128xbf16, #tpu.memory_space<vmem>>, vector<18x16x128xbf16>
    %22 = vector.shape_cast %21 : vector<18x16x128xbf16> to vector<288x128xbf16>
    %23 = vector.extract_strided_slice %22 {offsets = [0, 0], sizes = [256, 128], strides = [1, 1]} : vector<288x128xbf16> to vector<256x128xbf16>
    %24 = vector.extract_strided_slice %22 {offsets = [16, 0], sizes = [256, 128], strides = [1, 1]} : vector<288x128xbf16> to vector<256x128xbf16>
    %25 = tpu.concatenate %23, %24 in 1 : vector<256x128xbf16>, vector<256x128xbf16> -> vector<256x256xbf16>
    %c1_24 = arith.constant 1 : index
    %c0_25 = arith.constant 0 : index
    %c0_26 = arith.constant 0 : index
    %26 = vector.load %arg2[%c1_24, %c0_25, %c0_26] : memref<3x256x128xbf16, #tpu.memory_space<vmem>>, vector<1x256x128xbf16>
    %27 = vector.shape_cast %26 : vector<1x256x128xbf16> to vector<256x128xbf16>
    %cst_27 = arith.constant dense<0.000000e+00> : vector<256x128xf32>
    %28 = tpu.matmul %25, %27, %cst_27 {dimension_numbers = #tpu.dot_dimension_numbers<[1], [0], [0], [1], [0, 0, 1, 1], [], []>} : vector<256x256xbf16>, vector<256x128xbf16>, vector<256x128xf32> -> vector<256x128xf32>
    %29 = arith.addf %20, %28 : vector<256x128xf32>
    %30 = vector.extract_strided_slice %22 {offsets = [32, 0], sizes = [256, 128], strides = [1, 1]} : vector<288x128xbf16> to vector<256x128xbf16>
    %c1_28 = arith.constant 1 : index
    %c0_29 = arith.constant 0 : index
    %c0_30 = arith.constant 0 : index
    %31 = vector.load %arg3[%c1_28, %c0_29, %c0_30] : memref<3x128x128xbf16, #tpu.memory_space<vmem>>, vector<1x128x128xbf16>
    %32 = vector.shape_cast %31 : vector<1x128x128xbf16> to vector<128x128xbf16>
    %cst_31 = arith.constant dense<0.000000e+00> : vector<256x128xf32>
    %33 = tpu.matmul %30, %32, %cst_31 {dimension_numbers = #tpu.dot_dimension_numbers<[1], [0], [0], [1], [0, 0, 1, 1], [], []>} : vector<256x128xbf16>, vector<128x128xbf16>, vector<256x128xf32> -> vector<256x128xf32>
    %34 = arith.addf %29, %33 : vector<256x128xf32>
    %c0_32 = arith.constant 0 : index
    %c2 = arith.constant 2 : index
    %c0_33 = arith.constant 0 : index
    %35 = vector.load %arg6[%c0_32, %c2, %c0_33] : memref<18x18x128xbf16, #tpu.memory_space<vmem>>, vector<18x16x128xbf16>
    %36 = vector.shape_cast %35 : vector<18x16x128xbf16> to vector<288x128xbf16>
    %37 = vector.extract_strided_slice %36 {offsets = [0, 0], sizes = [256, 128], strides = [1, 1]} : vector<288x128xbf16> to vector<256x128xbf16>
    %38 = vector.extract_strided_slice %36 {offsets = [16, 0], sizes = [256, 128], strides = [1, 1]} : vector<288x128xbf16> to vector<256x128xbf16>
    %39 = tpu.concatenate %37, %38 in 1 : vector<256x128xbf16>, vector<256x128xbf16> -> vector<256x256xbf16>
    %c2_34 = arith.constant 2 : index
    %c0_35 = arith.constant 0 : index
    %c0_36 = arith.constant 0 : index
    %40 = vector.load %arg2[%c2_34, %c0_35, %c0_36] : memref<3x256x128xbf16, #tpu.memory_space<vmem>>, vector<1x256x128xbf16>
    %41 = vector.shape_cast %40 : vector<1x256x128xbf16> to vector<256x128xbf16>
    %cst_37 = arith.constant dense<0.000000e+00> : vector<256x128xf32>
    %42 = tpu.matmul %39, %41, %cst_37 {dimension_numbers = #tpu.dot_dimension_numbers<[1], [0], [0], [1], [0, 0, 1, 1], [], []>} : vector<256x256xbf16>, vector<256x128xbf16>, vector<256x128xf32> -> vector<256x128xf32>
    %43 = arith.addf %34, %42 : vector<256x128xf32>
    %44 = vector.extract_strided_slice %36 {offsets = [32, 0], sizes = [256, 128], strides = [1, 1]} : vector<288x128xbf16> to vector<256x128xbf16>
    %c2_38 = arith.constant 2 : index
    %c0_39 = arith.constant 0 : index
    %c0_40 = arith.constant 0 : index
    %45 = vector.load %arg3[%c2_38, %c0_39, %c0_40] : memref<3x128x128xbf16, #tpu.memory_space<vmem>>, vector<1x128x128xbf16>
    %46 = vector.shape_cast %45 : vector<1x128x128xbf16> to vector<128x128xbf16>
    %cst_41 = arith.constant dense<0.000000e+00> : vector<256x128xf32>
    %47 = tpu.matmul %44, %46, %cst_41 {dimension_numbers = #tpu.dot_dimension_numbers<[1], [0], [0], [1], [0, 0, 1, 1], [], []>} : vector<256x128xbf16>, vector<128x128xbf16>, vector<256x128xf32> -> vector<256x128xf32>
    %48 = arith.addf %43, %47 : vector<256x128xf32>
    %49 = arith.truncf %48 : vector<256x128xf32> to vector<256x128xbf16>
    %c0_42 = arith.constant 0 : index
    %c0_43 = arith.constant 0 : index
    %c0_44 = arith.constant 0 : index
    %50 = vector.load %arg4[%c0_42, %c0_43, %c0_44] : memref<1x256x128xbf16, #tpu.memory_space<vmem>>, vector<1x256x128xbf16>
    %51 = vector.shape_cast %50 : vector<1x256x128xbf16> to vector<256x128xbf16>
    %52 = vector.shape_cast %49 : vector<256x128xbf16> to vector<1x256x128xbf16>
    tpu.vector_store %arg4[%c0_42, %c0_43, %c0_44], %52 {strides = array<i32>} : memref<1x256x128xbf16, #tpu.memory_space<vmem>>, vector<1x256x128xbf16>,
    %cst_45 = arith.constant dense<0.000000e+00> : vector<128xf32>
    %53 = vector.multi_reduction <add>, %48, %cst_45 [0] : vector<256x128xf32> to vector<128xf32>
    %54 = vector.shape_cast %53 : vector<128xf32> to vector<1x128xf32>
    %55 = arith.mulf %48, %48 : vector<256x128xf32>
    %cst_46 = arith.constant dense<0.000000e+00> : vector<128xf32>
    %56 = vector.multi_reduction <add>, %55, %cst_46 [0] : vector<256x128xf32> to vector<128xf32>
    %57 = vector.shape_cast %56 : vector<128xf32> to vector<1x128xf32>
    %58 = tpu.concatenate %54, %57 in 0 : vector<1x128xf32>, vector<1x128xf32> -> vector<2x128xf32>
    %59 = arith.addf %2, %58 : vector<2x128xf32>
    %c0_47 = arith.constant 0 : index
    %c0_48 = arith.constant 0 : index
    %c0_49 = arith.constant 0 : index
    %60 = vector.load %arg5[%c0_47, %c0_48, %c0_49] : memref<1x2x128xf32, #tpu.memory_space<vmem>>, vector<1x2x128xf32>
    %61 = vector.shape_cast %60 : vector<1x2x128xf32> to vector<2x128xf32>
    %62 = vector.shape_cast %59 : vector<2x128xf32> to vector<1x2x128xf32>
    tpu.vector_store %arg5[%c0_47, %c0_48, %c0_49], %62 {strides = array<i32>} : memref<1x2x128xf32, #tpu.memory_space<vmem>>, vector<1x2x128xf32>,
    return
  }
  func.func @transform_0(%arg0: i32) -> (i32, i32, i32, i32) {
    %c0_i32 = arith.constant 0 : i32
    %c0_i32_0 = arith.constant 0 : i32
    %c0_i32_1 = arith.constant 0 : i32
    %c0_i32_2 = arith.constant 0 : i32
    return %arg0, %c0_i32, %c0_i32_0, %c0_i32_1 : i32, i32, i32, i32
  }
  func.func @transform_1(%arg0: i32) -> (i32, i32, i32) {
    %c0_i32 = arith.constant 0 : i32
    %c0_i32_0 = arith.constant 0 : i32
    %c0_i32_1 = arith.constant 0 : i32
    %c0_i32_2 = arith.constant 0 : i32
    return %c0_i32, %c0_i32_0, %c0_i32_1 : i32, i32, i32
  }
  func.func @transform_2(%arg0: i32) -> (i32, i32, i32) {
    %c0_i32 = arith.constant 0 : i32
    %c0_i32_0 = arith.constant 0 : i32
    %c0_i32_1 = arith.constant 0 : i32
    %c0_i32_2 = arith.constant 0 : i32
    return %c0_i32, %c0_i32_0, %c0_i32_1 : i32, i32, i32
  }
  func.func @transform_3(%arg0: i32) -> (i32, i32, i32) {
    %c0_i32 = arith.constant 0 : i32
    %c0_i32_0 = arith.constant 0 : i32
    %c0_i32_1 = arith.constant 0 : i32
    return %arg0, %c0_i32, %c0_i32_0 : i32, i32, i32
  }
  func.func @transform_4(%arg0: i32) -> (i32, i32, i32) {
    %c0_i32 = arith.constant 0 : i32
    %c0_i32_0 = arith.constant 0 : i32
    %c0_i32_1 = arith.constant 0 : i32
    return %arg0, %c0_i32, %c0_i32_0 : i32, i32, i32
  }
}

</mosaic_0001>

<bundles_post_ra>
// kernel: tpu_custom_call.1
= control target key start
LH: loop header
LB: loop body
LE: loop exit
PB: predicated region body
PF: predicated region fallthrough
CT: control target
= control target key end

     0   :  { %10 = vsyncpa [#allocation4], 0  ;;  %s5675_s0 = inlined_call_operand.hbm [shape: bf16[2,16,16,128], index: 0, kind: input, shape index: {}]   ;;  %s5676_s1 = inlined_call_operand.hbm [shape: bf16[3,256,128], index: 1, kind: input, shape index: {}]   ;;  %s5677_s2 = inlined_call_operand.hbm [shape: bf16[3,128,128], index: 2, kind: input, shape index: {}]   ;;  %s5678_s3 = inlined_call_operand.hbm [shape: bf16[2,256,128], index: 3, kind: output, shape index: {0}]   ;;  %s5679_s4 = inlined_call_operand.hbm [shape: f32[2,2,128], index: 4, kind: output, shape index: {1}]  }
   0x1   :  { %12 = vsyncpa [#allocation4 + $0x1], 0 }
   0x2   :  { %13 = vsyncpa [#allocation7], 0 }
   0x3   :  { %14 = vsyncpa [#allocation5], 0 }
   0x4   :  { %16 = vsyncpa [#allocation5 + $0x1], 0 }
   0x5   :  { %17 = vsyncpa [#allocation11], 0 }
   0x6   :  { %19 = vsyncpa [#allocation11 + $0x1], 0  ;;  %s4566_s15 = smov 0   ;;  %s4568_s16 = smov 0  }
   0x7   :  { %s4570_s17 = smov 0   ;;  %s4572_s18 = smov 0  }
   0x8 LB: > { %s4587_s19 = sadd.s32 4294967295, %s4532_s18   ;;  %s3611_s20 = sadd.s32 4294967294, %s4532_s18   ;;  %s4532_s18 = sphi %s4572_s18, %s5738_s18   ;;  %s4528_s17 = sphi %s4570_s17, %s5737_s17   ;;  %s4524_s16 = sphi %s4568_s16, %s5736_s16   ;;  %s4520_s15 = sphi %s4566_s15, %s5735_s15  }
   0x9   : > { %p45_p0 = scmp.ne.s32.totalorder %s4524_s16, %s4520_s15  ;;  %p46_p1 = scmp.eq.s32.totalorder %s4587_s19, 0 }
   0xa   : > { %p111_p2 = scmp.eq.s32.totalorder %s4587_s19, 1  ;;  %p117_p3 = scmp.eq.s32.totalorder %s3611_s20, 1 }
   0xb   : > { %p4596_p4 = por %p46_p1, %p45_p0  ;;  %p3612_p5 = scmp.ge.s32.totalorder %s4532_s18, 1 }
   0xc   : > { %p4601_p6 = por %p117_p3, %p45_p0  ;;  %p150_p7 = scmp.lt.s32.totalorder %s4532_s18, 3 }
   0xd   : > { %s161_s25 = sshll.u32 %s5676_s1, 4  ;;  %s4534_s27 = smov [#allocation6]   ;;  %s162_s25 = int_to_ptr.hbm [resolvable:$true] %s161_s25 }
   0xe   : > { %p4609_p8 = pnand %p3612_p5, %p150_p7  ;;  %s163_s28 = sshll.u32 %s4534_s27, 4  ;;  %s164_s28 = int_to_ptr.vmem [resolvable:$true] %s163_s28 }
   0xf   : > { %s175_s5 = sshll.u32 %s5677_s2, 4  ;;  %s4535_s6 = smov 64   ;;  %s176_s5 = int_to_ptr.hbm [resolvable:$true] %s175_s5 }
  0x10   : > { %p4235_p9 = pneg %p4609_p8  ;;  %s4536_s7 = smov 4  }
  0x11   : > { %s4537_s8 = smov [#allocation8]   ;;  %s4628_s10 = sadd.s32 1, %s4532_s18  }
  0x12   : > { %p4236_p10 = pnand %p4235_p9, %p46_p1  ;;  %s177_s9 = sshll.u32 %s4537_s8, 4  ;;  %s178_s9 = int_to_ptr.vmem [resolvable:$true] %s177_s9 }
  0x13   : > { %s32_s11 = sadd.s32 1, %s4528_s17  ;;  %s29_s12 = ssub.s32 %s4532_s18, %s4628_s10 }
  0x14   : > { %4238 = dma.hbm_to_vmem [thread:$0]  (!%p4236_p10), %s162_s25, 6144, %s164_s28, [#allocation7], %s4535_s6, %s4535_s6, %s4536_s7  }
  0x15   : > { %4241 = dma.hbm_to_vmem [thread:$0]  (!%p4236_p10), %s176_s5, 3072, %s178_s9, [#allocation7], %s4535_s6, %s4535_s6, %s4536_s7  }
  0x16   : > { %p39_p12 = scmp.ne.s32.totalorder %s4528_s17, %s4524_s16  ;;  %p30_p13 = scmp.eq.s32.totalorder %s29_s12, 0 }
  0x17   : > { %p40_p0 = scmp.eq.s32.totalorder %s4532_s18, 0  ;;  %p4255_p5 = scmp.lt.s32.totalorder %s4532_s18, 2 }
  0x18   : > { %p4638_p3 = por %p111_p2, %p39_p12  ;;  %s191_s20 = sand.u32 1, %s4528_s17  }
  0x19   : > { %s4644_s14 = scalar_select %p30_p13, %s4528_s17, %s32_s11  }
  0x1a   : > { %p41_p7 = por %p40_p0, %p39_p12  ;;  %s3616_s23 = sshll.u32 %s191_s20, 7 }
  0x1b   : > { %s4010_s24 = sshll.u32 %s4532_s18, 7  ;;  %s195_s29 = scalar_lea.vmem [#allocation3], %s3616_s23 }
  0x1c   : > { %s200_s28 = scalar_lea.hbm %s5675_s0, %s4010_s24  ;;  %s203_s30 = sshll.u32 %s195_s29, 4  ;;  %s204_s30 = int_to_ptr.vmem [resolvable:$true] %s203_s30 }
  0x1d   : > { %s201_s5 = sshll.u32 %s200_s28, 4  ;;  %p4651_p2 = pnand %p4255_p5, %p41_p7  ;;  %s202_s5 = int_to_ptr.hbm [resolvable:$true] %s201_s5 }
  0x1e   : > { %s192_s9 = scalar_lea.sflag [#allocation4], %s191_s20  ;;  %s4400_s11 = sshra.s32 %s202_s5, 4  ;;  %s4401_s11 = int_to_ptr.hbm [resolvable:$true] %s4400_s11 }
  0x1f   : > { %s4402_s12 = scalar_lea.hbm %s4401_s11, 128  ;;  %p4404_p10 = pneg %p4651_p2 }
  0x20   : > { %p4403_p9 = scmp.ne.s32.totalorder %s4401_s11, %s4402_s12  ;;  %s4407_s25 = scalar_lea.hbm %s5675_s0, 256 }
  0x21   : > { %p4408_p0 = scmp.lt.s32.totalorder %s4401_s11, %s5675_s0  ;;  %p4409_p5 = scmp.lt.s32.totalorder %s4407_s25, %s4402_s12 }
  0x22   : > { %p4405_p12 = pnand %p4404_p10, %p4403_p9 }
  0x23   : > { %p4410_p7 = por %p4409_p5, %p4408_p0 }
  0x24   : > { %p4406_p13 = pneg %p4405_p12 }
  0x26   : > { %p4411_p11 = pnand %p4410_p7, %p4406_p13 }
  0x28   : > { %4414 = shalt.err (!%p4411_p11)
}
  0x29   : > { %4245 = dma.hbm_to_vmem [thread:$0]  (!%p4651_p2), %s202_s5, 2048, %s204_s30, %s192_s9, %s4535_s6, %s4535_s6, %s4536_s7  }
  0x2a   : > { %215 = sbr.rel (%p4609_p8) target bundleno = 848 (0x350), region = 32 }
  0x2f   : > { %s4671_s20 = sand.u32 1, %s4524_s16  }
  0x30   : > { %s3620_s29 = sshll.u32 %s4671_s20, 7  ;;  %s218_s11 = scalar_lea.sflag [#allocation4], %s4671_s20 }
  0x31   : > { %s4677_s12 = scalar_lea.vmem [#allocation3], %s3620_s29 }
  0x32   : > { %4503 = dma.done.wait (%p4596_p4), %s218_s11, 2048  }
  0x33   : > { %4505 = vsyncadd (%p4596_p4), %s218_s11, 4294965248 }
  0x34   : > { %4507 = dma.done.wait (%p46_p1), [#allocation7], 9216  }
  0x35   : > { %4509 = vsyncadd (%p46_p1), [#allocation7], 4294958080  ;;  %v4538_v0 = vmov 0   ;;  %v4052_v1 = vld [vmem:[#allocation8 + $0x38] sm:$0xff]  ;;  %vm349_vm0 = vsmask.f32 256 }
  0x36   : > { %281 = vst [vmem:[#allocation2 + $0x48] sm:$0xf] %v4538_v0  ;;  %4197 = vmatpush.bf16.msra.mxu1 %v4052_v1  ;;  %4198 = vmatpush.bf16.msra.mxu2 %v4052_v1  ;;  %v4051_v2 = vld [vmem:[#allocation8 + $0x30] sm:$0xff]  ;;  %v327_v3 = vld [vmem:[%s4677_s12 + $0x28] sm:$0xf]  ;;  %vm673_vm1 = vcmask 1043456  }
  0x37   : > { %282 = vst [vmem:[#allocation2 + $0x4c] sm:$0xf] %v4538_v0  ;;  %4199 = vmatpush.bf16.msra.mxu3 %v4052_v1  ;;  %1030 = vmatpush.bf16.msra.mxu0 %v4052_v1  ;;  %v328_v4 = vld [vmem:[%s4677_s12 + $0x2c] sm:$0xf]  ;;  %v438_v5 = vshrl.u32 %v327_v3, 16  ;;  %v441_v6 = vshll.u32 %v327_v3, 16 }
  0x38   : > { %263 = vst [vmem:[#allocation2] sm:$0xf] %v4538_v0  ;;  %vm674_vm2 = vsmask.f32 7938  ;;  %vm350_vm3 = vsmask.f32 4368 }
  0x39   : > { %264 = vst [vmem:[#allocation2 + $0x4] sm:$0xf] %v4538_v0  ;;  %v446_v7 = vshrl.u32 %v328_v4, 16  ;;  %v449_v8 = vshll.u32 %v328_v4, 16  ;;  %v440_v9 = vrot.slane %v438_v5, 7  ;;  %v4050_v10 = vld [vmem:[#allocation8 + $0x28] sm:$0xff]  ;;  %vm4703_vm4 = vmand %vm673_vm1, %vm674_vm2 }
  0x3a   : > { %265 = vst [vmem:[#allocation2 + $0x8] sm:$0x1] %v4538_v0  ;;  %4200 = vmatpush.bf16.msra.mxu1 %v4051_v2  ;;  %4201 = vmatpush.bf16.msra.mxu2 %v4051_v2  ;;  %vm4710_vm5 = vmor %vm349_vm0, %vm350_vm3  ;;  %v4049_v19 = vld [vmem:[#allocation8 + $0x20] sm:$0xff]  ;;  %v4048_v21 = vld [vmem:[#allocation8 + $0x18] sm:$0xff]  ;;  %vm680_vm6 = vcmask 1040384   ;;  %vm2551_vm11 = vcmask 1042432  }
  0x3b   : > { %266 = vst [vmem:[#allocation2 + $0xc] sm:$0xf] %v4538_v0  ;;  %v4700_v11 = vrot.slane %v446_v7, 7  ;;  %4202 = vmatpush.bf16.msra.mxu3 %v4051_v2  ;;  %1031 = vmatpush.bf16.msra.mxu0 %v4051_v2  ;;  %v443_v15 = vor.u32 %v441_v6, %v440_v9  ;;  %v444_v16 = vrot.slane %v440_v9, 4  ;;  %v4047_v22 = vld [vmem:[#allocation8 + $0x10] sm:$0xff]  ;;  %v4046_v23 = vld [vmem:[#allocation8 + $0x8] sm:$0xff]  ;;  %vm5012_vm7 = vmand %vm680_vm6, %vm349_vm0 }
  0x3c   : > { %267 = vst [vmem:[#allocation2 + $0x10] sm:$0xf] %v4538_v0  ;;  %v4736_v24 = vld [vmem:[%s4677_s12 + $0x48] sm:$0xf]  ;;  %v4045_v25 = vld [vmem:[#allocation8] sm:$0xff]  ;;  %v4044_v35 = vld [vmem:[#allocation6 + $0x78] sm:$0xff] }
  0x3d   : > { %268 = vst [vmem:[#allocation2 + $0x14] sm:$0x1] %v4538_v0  ;;  %v713_v13 = vld [vmem:[#allocation2 + $0x48] sm:$0xf]  ;;  %v451_v17 = vor.u32 %v449_v8, %v4700_v11  ;;  %v4741_v26 = vld [vmem:[%s4677_s12 + $0x4c] sm:$0xf] }
  0x3e   : > { %269 = vst [vmem:[#allocation2 + $0x18] sm:$0xf] %v4538_v0  ;;  %v714_v18 = vsel %vm4703_vm4, %v443_v15, %v713_v13  ;;  %4203 = vmatpush.bf16.msra.mxu1 %v4050_v10  ;;  %4204 = vmatpush.bf16.msra.mxu2 %v4050_v10  ;;  %v506_v27 = vshrl.u32 %v4736_v24, 16  ;;  %v4747_v28 = vld [vmem:[%s4677_s12 + $0x68] sm:$0xf]  ;;  %v514_v30 = vshrl.u32 %v4741_v26, 16 }
  0x3f   : > { %270 = vst [vmem:[#allocation2 + $0x1c] sm:$0xf] %v4538_v0  ;;  %v452_v20 = vsel %vm4710_vm5, %v444_v16, %v451_v17  ;;  %4205 = vmatpush.bf16.msra.mxu3 %v4050_v10  ;;  %1032 = vmatpush.bf16.msra.mxu0 %v4050_v10  ;;  %v4753_v31 = vld [vmem:[%s4677_s12 + $0x6c] sm:$0xf]  ;;  %v4756_v32 = vld [vmem:[%s4677_s12 + $0x8] sm:$0xf] }
  0x40   : > { %271 = vst [vmem:[#allocation2 + $0x20] sm:$0x1] %v4538_v0  ;;  %v4759_v33 = vrot.slane %v506_v27, 7  ;;  %v574_v34 = vshrl.u32 %v4747_v28, 16  ;;  %v4060_v36 = vld [vmem:[#allocation6 + $0xb8] sm:$0xff]  ;;  %v582_v39 = vshrl.u32 %v4753_v31, 16 }
  0x41   : > { %272 = vst [vmem:[#allocation2 + $0x24] sm:$0xf] %v4538_v0  ;;  %v4764_v37 = vld [vmem:[%s4677_s12 + $0xc] sm:$0xf]  ;;  %v4767_v38 = vld [vmem:[%s4677_s12 + $0x30] sm:$0xf] }
  0x42   : > { %273 = vst [vmem:[#allocation2 + $0x28] sm:$0xf] %v4538_v0  ;;  %4206 = vmatpush.bf16.msra.mxu1 %v4049_v19  ;;  %4207 = vmatpush.bf16.msra.mxu2 %v4049_v19  ;;  %v370_v40 = vshrl.u32 %v4756_v32, 16  ;;  %v4036_v41 = vld [vmem:[#allocation6 + $0x38] sm:$0xff]  ;;  %v4043_v42 = vld [vmem:[#allocation6 + $0x70] sm:$0xff]  ;;  %v509_v46 = vshll.u32 %v4736_v24, 16 }
  0x43   : > { %274 = vst [vmem:[#allocation2 + $0x2c] sm:$0x1] %v4538_v0  ;;  %4208 = vmatpush.bf16.msra.mxu3 %v4049_v19  ;;  %1033 = vmatpush.bf16.msra.mxu0 %v4049_v19  ;;  %v4059_v43 = vld [vmem:[#allocation6 + $0xb0] sm:$0xff]  ;;  %v4068_v44 = vld [vmem:[#allocation6 + $0xf8] sm:$0xff]  ;;  %v455_v48 = vshrl.u32 %v4767_v38, 16  ;;  %v4780_v49 = vrot.slane %v574_v34, 7 }
  0x44   : > { %275 = vst [vmem:[#allocation2 + $0x30] sm:$0xf] %v4538_v0  ;;  %v4774_v45 = vld [vmem:[%s4677_s12 + $0x50] sm:$0xf]  ;;  %v378_v50 = vshrl.u32 %v4764_v37, 16  ;;  %v4787_v52 = vrot.slane %v514_v30, 7  ;;  %v511_v7 = vor.u32 %v509_v46, %v4759_v33 }
  0x45   : > { %715 = vst [vmem:[#allocation2 + $0x48] sm:$0xf] %v714_v18  ;;  %v4035_v47 = vld [vmem:[#allocation6 + $0x30] sm:$0xff]  ;;  %v517_v53 = vshll.u32 %v4741_v26, 16  ;;  %v4790_v54 = vrot.slane %v370_v40, 7  ;;  %v523_v55 = vshrl.u32 %v4774_v45, 16 }
  0x46   : > { %716 = vst [vmem:[#allocation2 + $0x4c] sm:$0xf] %v452_v20  ;;  %4209 = vmatpush.bf16.msra.mxu1 %v4048_v21  ;;  %4210 = vmatpush.bf16.msra.mxu2 %v4048_v21  ;;  %v4784_v51 = vld [vmem:[%s4677_s12 + $0x34] sm:$0xf]  ;;  %v512_v56 = vrot.slane %v4759_v33, 4  ;;  %v577_v57 = vshll.u32 %v4747_v28, 16 }
  0x47   : > { %276 = vst [vmem:[#allocation2 + $0x34] sm:$0xf] %v4538_v0  ;;  %4211 = vmatpush.bf16.msra.mxu3 %v4048_v21  ;;  %1034 = vmatpush.bf16.msra.mxu0 %v4048_v21  ;;  %v4796_v58 = vrot.slane %v582_v39, 7  ;;  %v585_v59 = vshll.u32 %v4753_v31, 16  ;;  %v4800_v60 = vrot.slane %v455_v48, 7  ;;  %v463_v61 = vshrl.u32 %v4784_v51, 16 }
  0x48   : > { %277 = vst [vmem:[#allocation2 + $0x38] sm:$0x1] %v4538_v0  ;;  %v4804_v62 = vld [vmem:[%s4677_s12 + $0x54] sm:$0xf]  ;;  %v580_v63 = vrot.slane %v4780_v49, 4  ;;  %v373_v1 = vshll.u32 %v4756_v32, 16  ;;  %v519_v13 = vor.u32 %v517_v53, %v4787_v52  ;;  %v4829_v16 = vor.u32 %v577_v57, %v4780_v49 }
  0x49   : > { %278 = vst [vmem:[#allocation2 + $0x3c] sm:$0xf] %v4538_v0  ;;  %v4809_v2 = vrot.slane %v378_v50, 7  ;;  %v381_v3 = vshll.u32 %v4764_v37, 16  ;;  %v376_v4 = vrot.slane %v4790_v54, 4  ;;  %v4814_v5 = vrot.slane %v523_v55, 7 }
  0x4a   : > { %279 = vst [vmem:[#allocation2 + $0x40] sm:$0xf] %v4538_v0  ;;  %4212 = vmatpush.bf16.msra.mxu1 %v4047_v22  ;;  %4213 = vmatpush.bf16.msra.mxu2 %v4047_v22  ;;  %v4817_v6 = vld [vmem:[%s4677_s12 + $0x70] sm:$0xf]  ;;  %v458_v8 = vshll.u32 %v4767_v38, 16  ;;  %v531_v9 = vshrl.u32 %v4804_v62, 16  ;;  %v587_v24 = vor.u32 %v585_v59, %v4796_v58  ;;  %v520_v40 = vsel %vm4710_vm5, %v512_v56, %v519_v13 }
  0x4b   : > { %280 = vst [vmem:[#allocation2 + $0x44] sm:$0x1] %v4538_v0  ;;  %4214 = vmatpush.bf16.msra.mxu3 %v4047_v22  ;;  %1035 = vmatpush.bf16.msra.mxu0 %v4047_v22  ;;  %v4824_v10 = vld [vmem:[%s4677_s12 + $0x74] sm:$0xf]  ;;  %v461_v17 = vrot.slane %v4800_v60, 4  ;;  %v4832_v18 = vrot.slane %v463_v61, 7 }
  0x4c   : > { %283 = vst [vmem:[#allocation2 + $0x50] sm:$0x1] %v4538_v0  ;;  %v4835_v19 = vld [vmem:[%s4677_s12 + $0x10] sm:$0xf]  ;;  %v466_v20 = vshll.u32 %v4784_v51, 16  ;;  %v526_v21 = vshll.u32 %v4774_v45, 16  ;;  %v4865_v37 = vor.u32 %v458_v8, %v4800_v60  ;;  %v588_v45 = vsel %vm4710_vm5, %v580_v63, %v587_v24 }
  0x4d   : > { %284 = vst [vmem:[#allocation2 + $0x54] sm:$0xf] %v4538_v0  ;;  %v4017_v29 = vld [vmem:[#allocation2 + $0x48] sm:$0xff]  ;;  %v534_v22 = vshll.u32 %v4804_v62, 16  ;;  %v4847_v26 = vld [vmem:[#allocation2 + $0x18] sm:$0xf] }
  0x4e   : > { %285 = vst [vmem:[#allocation2 + $0x58] sm:$0xf] %v4538_v0  ;;  %4215 = vmatpush.bf16.msra.mxu1 %v4046_v23  ;;  %4216 = vmatpush.bf16.msra.mxu2 %v4046_v23  ;;  %v529_v27 = vrot.slane %v4814_v5, 4  ;;  %v599_v28 = vshrl.u32 %v4824_v10, 16  ;;  %v4857_v31 = vrot.slane %v531_v9, 7  ;;  %v594_v32 = vshll.u32 %v4817_v6, 16 }
  0x4f   : > { %286 = vst [vmem:[#allocation2 + $0x5c] sm:$0x1] %v4538_v0  ;;  %4217 = vmatpush.bf16.msra.mxu3 %v4046_v23  ;;  %1036 = vmatpush.bf16.msra.mxu0 %v4046_v23  ;;  %v591_v23 = vshrl.u32 %v4817_v6, 16  ;;  %v602_v33 = vshll.u32 %v4824_v10, 16  ;;  %v387_v34 = vshrl.u32 %v4835_v19, 16  ;;  %v4042_v38 = vld [vmem:[#allocation6 + $0x68] sm:$0xff]  ;;  %v468_v46 = vor.u32 %v466_v20, %v4832_v18 }
  0x50   : > { %287 = vst [vmem:[#allocation2 + $0x60] sm:$0xf] %v4538_v0  ;;  %v4058_v39 = vld [vmem:[#allocation6 + $0xa8] sm:$0xff]  ;;  %v390_v48 = vshll.u32 %v4835_v19, 16  ;;  %v4067_v49 = vld [vmem:[#allocation6 + $0xf0] sm:$0xff]  ;;  %v4041_v56 = vld [vmem:[#allocation6 + $0x60] sm:$0xff]  ;;  %v528_v62 = vor.u32 %v526_v21, %v4814_v5  ;;  %v536_v10 = vor.u32 %v534_v22, %v4857_v31 }
  0x51   : > { %288 = vst [vmem:[#allocation2 + $0x64] sm:$0xf] %v4538_v0  ;;  %v4034_v50 = vld [vmem:[#allocation6 + $0x28] sm:$0xff]  ;;  %v4893_v55 = vrot.slane %v387_v34, 7  ;;  %v4057_v57 = vld [vmem:[#allocation6 + $0xa0] sm:$0xff]  ;;  %v469_v9 = vsel %vm4710_vm5, %v461_v17, %v468_v46  ;;  %vm2552_vm12 = vcmask 1046532  }
  0x52   : > { %289 = vst [vmem:[#allocation2 + $0x68] sm:$0x1] %v4538_v0  ;;  %4218 = vmatpush.bf16.msra.mxu1 %v4045_v25  ;;  %4219 = vmatpush.bf16.msra.mxu2 %v4045_v25  ;;  %v332_v6 = vld [vmem:[%s4677_s12 + $0x3c] sm:$0xf]  ;;  %v692_v21 = vld [vmem:[#allocation2 + $0x24] sm:$0xf]  ;;  %vm5314_vm13 = vmor %vm2551_vm11, %vm2552_vm12 }
  0x53   : > { %290 = vst [vmem:[#allocation2 + $0x6c] sm:$0xf] %v4538_v0  ;;  %4220 = vmatpush.bf16.msra.mxu3 %v4045_v25  ;;  %1037 = vmatpush.bf16.msra.mxu0 %v4045_v25  ;;  %v4845_v25 = vor.u32 %v373_v1, %v4790_v54  ;;  %v4066_v1 = vld [vmem:[#allocation6 + $0xe8] sm:$0xff]  ;;  %v480_v8 = vshrl.u32 %v332_v6, 16  ;;  %v392_v20 = vor.u32 %v390_v48, %v4893_v55  ;;  %v340_v24 = vld [vmem:[%s4677_s12 + $0x5c] sm:$0xf] }
  0x54   : > { %291 = vst [vmem:[#allocation2 + $0x70] sm:$0xf] %v4538_v0  ;;  %v4855_v30 = vld [vmem:[#allocation2 + $0x54] sm:$0xf]  ;;  %v483_v22 = vshll.u32 %v332_v6, 16  ;;  %s5508_s21 = scalar_lea.vmem [#allocation9], %s3620_s29 }
  0x55   : > { %292 = vst [vmem:[#allocation2 + $0x74] sm:$0x1] %v4538_v0  ;;  %1058 = vmatmul.bf16.vlgmr.msra.gmra.mxu1 %v4017_v29  ;;  %v4852_v29 = vld [vmem:[%s4677_s12 + $0x14] sm:$0xf]  ;;  %v686_v53 = vsel %vm4703_vm4, %v4845_v25, %v4847_v26  ;;  %v721_v61 = vsel %vm4703_vm4, %v4865_v37, %v4855_v30  ;;  %v4921_v17 = vrot.slane %v480_v8, 7  ;;  %v548_v26 = vshrl.u32 %v340_v24, 16 }
  0x56   : > { %293 = vst [vmem:[#allocation2 + $0x78] sm:$0xf] %v4538_v0  ;;  %1304 = vmatpush.bf16.msrb.mxu2 %v4044_v35  ;;  %1215 = vmatpush.bf16.msrb.mxu1 %v4036_v41  ;;  %v4056_v8 = vld [vmem:[#allocation6 + $0x98] sm:$0xff]  ;;  %v689_v12 = vld [vmem:[#allocation2 + $0x20] sm:$0x1]  ;;  %s4101_s26 = sshll.u32 %s4587_s19, 7 }
  0x57   : > { %294 = vst [vmem:[#allocation2 + $0x7c] sm:$0xf] %v4538_v0  ;;  %2079 = vmatpush.bf16.msrb.mxu3 %v4060_v36  ;;  %2168 = vmatpush.bf16.msrb.mxu0 %v4068_v44  ;;  %v383_v36 = vor.u32 %v381_v3, %v4809_v2  ;;  %v4876_v44 = vld [vmem:[%s4677_s12 + $0x38] sm:$0xf]  ;;  %v4033_v3 = vld [vmem:[#allocation6 + $0x20] sm:$0xff]  ;;  %v4931_v37 = vrot.slane %v548_v26, 7  ;;  %v485_v46 = vor.u32 %v483_v22, %v4921_v17  ;;  %s3468_s30 = scalar_lea.hbm %s5678_s3, %s4101_s26 }
  0x58   : > { %295 = vst [vmem:[#allocation2 + $0x80] sm:$0x1] %v4538_v0  ;;  %v472_v59 = vshrl.u32 %v4876_v44, 16  ;;  %v475_v60 = vshll.u32 %v4876_v44, 16  ;;  %v699_v22 = vld [vmem:[#allocation2 + $0x30] sm:$0xf] }
  0x59   : > { %296 = vst [vmem:[#allocation2 + $0x84] sm:$0xf] %v4538_v0  ;;  %v4032_v26 = vld [vmem:[#allocation6 + $0x18] sm:$0xff]  ;;  %vm1447_vm8 = vsmask.f32 3328  ;;  %s3469_s5 = sshll.u32 %s5508_s21, 4  ;;  %s3470_s5 = int_to_ptr.vmem [resolvable:$true] %s3469_s5 }
  0x5a   : > { %297 = vst [vmem:[#allocation2 + $0x88] sm:$0xf] %v4538_v0  ;;  %1305 = vmatpush.bf16.msrb.mxu2 %v4043_v42  ;;  %1216 = vmatpush.bf16.msrb.mxu1 %v4035_v47  ;;  %v4872_v42 = vrot.slane %v591_v23, 7  ;;  %v4882_v47 = vrot.slane %v599_v28, 7  ;;  %v474_v23 = vrot.slane %v472_v59, 7  ;;  %s3471_s8 = sshll.u32 %s3468_s30, 4  ;;  %s3472_s8 = int_to_ptr.hbm [resolvable:$true] %s3471_s8 }
  0x5b   : > { %298 = vst [vmem:[#allocation2 + $0x8c] sm:$0x1] %v4538_v0  ;;  %2080 = vmatpush.bf16.msrb.mxu3 %v4059_v43  ;;  %v395_v43 = vshrl.u32 %v4852_v29, 16  ;;  %2169 = vmatpush.bf16.msrb.mxu0 %v4067_v49  ;;  %vm1448_vm9 = vsmask.f32 7440  ;;  %s3452_s9 = scalar_lea.sflag [#allocation5], %s4671_s20 }
  0x5c   : > { %299 = vst [vmem:[#allocation2 + $0x90] sm:$0xf] %v4538_v0  ;;  %v597_v54 = vrot.slane %v4872_v42, 4  ;;  %v596_v13 = vor.u32 %v594_v32, %v4872_v42  ;;  %v604_v19 = vor.u32 %v602_v33, %v4882_v47  ;;  %v551_v32 = vshll.u32 %v340_v24, 16  ;;  %vm5037_vm10 = vmor %vm1447_vm8, %vm1448_vm9  ;;  %s4444_s24 = sshra.s32 %s3472_s8, 4  ;;  %s4450_s28 = scalar_lea.hbm %s5678_s3, 256  ;;  %s4445_s24 = int_to_ptr.hbm [resolvable:$true] %s4444_s24 }
  0x5d   : > { %300 = vst [vmem:[#allocation2 + $0x94] sm:$0xf] %v4538_v0  ;;  %v741_v15 = vld [vmem:[#allocation2 + $0x78] sm:$0xf]  ;;  %v537_v33 = vsel %vm4710_vm5, %v529_v27, %v536_v10  ;;  %v693_v27 = vsel %vm4703_vm4, %v392_v20, %v692_v21  ;;  %s4446_s23 = scalar_lea.hbm %s4445_s24, 128  ;;  %p4451_p11 = scmp.lt.s32.totalorder %s4445_s24, %s5678_s3 }
  0x5e   : > { %301 = vst [vmem:[#allocation2 + $0x98] sm:$0x1] %v4538_v0  ;;  %v742_v41 = vsel %vm4703_vm4, %v511_v7, %v741_v15  ;;  %1306 = vmatpush.bf16.msrb.mxu2 %v4042_v38  ;;  %1217 = vmatpush.bf16.msrb.mxu1 %v4034_v50  ;;  %v4907_v7 = vrot.slane %v395_v43, 7  ;;  %v347_v38 = vld [vmem:[%s4677_s12 + $0x78] sm:$0xf]  ;;  %v605_v5 = vsel %vm4710_vm5, %v597_v54, %v604_v19  ;;  %p4447_p1 = scmp.ne.s32.totalorder %s4445_s24, %s4446_s23  ;;  %p4452_p2 = scmp.lt.s32.totalorder %s4450_s28, %s4446_s23 }
  0x5f   : > { %302 = vst [vmem:[#allocation2 + $0x9c] sm:$0xf] %v4538_v0  ;;  %2081 = vmatpush.bf16.msrb.mxu3 %v4058_v39  ;;  %2170 = vmatpush.bf16.msrb.mxu0 %v4066_v1  ;;  %v608_v42 = vshrl.u32 %v347_v38, 16  ;;  %v611_v43 = vshll.u32 %v347_v38, 16  ;;  %v553_v59 = vor.u32 %v551_v32, %v4931_v37 }
  0x60   : > { %303 = vst [vmem:[#allocation2 + $0xa0] sm:$0xf] %v4538_v0  ;;  %v748_v63 = vld [vmem:[#allocation2 + $0x84] sm:$0xf]  ;;  %p4448_p4 = pnand %p4447_p1, %p4638_p3  ;;  %p4453_p9 = por %p4452_p2, %p4451_p11 }
  0x61   : > { %304 = vst [vmem:[#allocation2 + $0xa4] sm:$0x1] %v4538_v0  ;;  %v749_v28 = vsel %vm4703_vm4, %v528_v62, %v748_v63  ;;  %v610_v50 = vrot.slane %v608_v42, 7 }
  0x62   : > { %305 = vst [vmem:[#allocation2 + $0xa8] sm:$0xf] %v4538_v0  ;;  %1307 = vmatpush.bf16.msrb.mxu2 %v4041_v56  ;;  %1218 = vmatpush.bf16.msrb.mxu1 %v4033_v3  ;;  %v323_v3 = vld [vmem:[%s4677_s12 + $0x18] sm:$0xf]  ;;  %p4449_p8 = pneg %p4448_p4 }
  0x63   : > { %306 = vst [vmem:[#allocation2 + $0xac] sm:$0xf] %v4538_v0  ;;  %2082 = vmatpush.bf16.msrb.mxu3 %v4057_v57  ;;  %v755_v48 = vld [vmem:[#allocation2 + $0x90] sm:$0xf]  ;;  %v613_v62 = vor.u32 %v611_v43, %v610_v50  ;;  %v614_v63 = vrot.slane %v610_v50, 4 }
  0x64   : > { %307 = vst [vmem:[#allocation2 + $0xb0] sm:$0x1] %v4538_v0  ;;  %v341_v50 = vld [vmem:[%s4677_s12 + $0x60] sm:$0xf]  ;;  %p4454_p10 = pnand %p4453_p9, %p4449_p8 }
  0x65   : > { %308 = vst [vmem:[#allocation2 + $0xb4] sm:$0xf] %v4538_v0 }
  0x66   : > { %309 = vst [vmem:[#allocation2 + $0xb8] sm:$0xf] %v4538_v0  ;;  %1219 = vmatpush.bf16.msrb.mxu1 %v4032_v26  ;;  %v4038_v26 = vld [vmem:[#allocation6 + $0x48] sm:$0xff] }
  0x67   : > { %310 = vst [vmem:[#allocation2 + $0xbc] sm:$0x1] %v4538_v0  ;;  %2083 = vmatpush.bf16.msrb.mxu3 %v4056_v8  ;;  %v326_v8 = vld [vmem:[%s4677_s12 + $0x24] sm:$0xf] }
  0x68   : > { %311 = vst [vmem:[#allocation2 + $0xc0] sm:$0xf] %v4538_v0 }
  0x69   : > { %312 = vst [vmem:[#allocation2 + $0xc4] sm:$0xf] %v4538_v0  ;;  %v769_v35 = vld [vmem:[#allocation2 + $0xa8] sm:$0xf] }
  0x6a   : > { %313 = vst [vmem:[#allocation2 + $0xc8] sm:$0x1] %v4538_v0  ;;  %v770_v51 = vsel %vm4703_vm4, %v4829_v16, %v769_v35  ;;  %v339_v16 = vld [vmem:[%s4677_s12 + $0x58] sm:$0xf]  ;;  %v727_v35 = vld [vmem:[#allocation2 + $0x60] sm:$0xf] }
  0x6b   : > { %314 = vst [vmem:[#allocation2 + $0xcc] sm:$0xf] %v4538_v0  ;;  %v540_v25 = vshrl.u32 %v339_v16, 16  ;;  %v543_v30 = vshll.u32 %v339_v16, 16  ;;  %v407_v16 = vshll.u32 %v323_v3, 16 }
  0x6c   : > { %315 = vst [vmem:[#allocation2 + $0xd0] sm:$0xf] %v4538_v0  ;;  %v776_v15 = vld [vmem:[#allocation2 + $0xb4] sm:$0xf] }
  0x6d   : > { %316 = vst [vmem:[#allocation2 + $0xd4] sm:$0x1] %v4538_v0  ;;  %v384_v0 = vsel %vm4710_vm5, %v376_v4, %v383_v36  ;;  %v398_v4 = vshll.u32 %v4852_v29, 16  ;;  %v393_v29 = vrot.slane %v4893_v55, 4  ;;  %v542_v36 = vrot.slane %v540_v25, 7  ;;  %v4065_v25 = vld [vmem:[#allocation6 + $0xe0] sm:$0xff] }
  0x6e   : > { %743 = vst [vmem:[#allocation2 + $0x78] sm:$0xf] %v742_v41  ;;  %v777_v39 = vsel %vm4703_vm4, %v596_v13, %v776_v15  ;;  %v348_v41 = vld [vmem:[%s4677_s12 + $0x7c] sm:$0xf]  ;;  %2171 = vmatpush.bf16.msrb.mxu0 %v4065_v25 }
  0x6f   : > { %744 = vst [vmem:[#allocation2 + $0x7c] sm:$0xf] %v520_v40  ;;  %v400_v34 = vor.u32 %v398_v4, %v4907_v7  ;;  %v477_v40 = vor.u32 %v475_v60, %v474_v23  ;;  %v545_v49 = vor.u32 %v543_v30, %v542_v36  ;;  %v546_v57 = vrot.slane %v542_v36, 4  ;;  %v4040_v4 = vld [vmem:[#allocation6 + $0x58] sm:$0xff]  ;;  %v4031_v36 = vld [vmem:[#allocation6 + $0x10] sm:$0xff] }
  0x70   : > { %771 = vst [vmem:[#allocation2 + $0xa8] sm:$0xf] %v770_v51  ;;  %v616_v51 = vshrl.u32 %v348_v41, 16  ;;  %v324_v15 = vld [vmem:[%s4677_s12 + $0x1c] sm:$0xf]  ;;  %1308 = vmatpush.bf16.msrb.mxu2 %v4040_v4  ;;  %1220 = vmatpush.bf16.msrb.mxu1 %v4031_v36 }
  0x71   : > { %772 = vst [vmem:[#allocation2 + $0xac] sm:$0xf] %v588_v45  ;;  %v478_v45 = vrot.slane %v474_v23, 4  ;;  %v401_v56 = vsel %vm4710_vm5, %v393_v29, %v400_v34  ;;  %v756_v10 = vsel %vm4703_vm4, %v545_v49, %v755_v48  ;;  %v554_v20 = vsel %vm4710_vm5, %v546_v57, %v553_v59  ;;  %v4055_v34 = vld [vmem:[#allocation6 + $0x90] sm:$0xff]  ;;  %v317_v36 = vld [vmem:[%s4677_s12] sm:$0xf] }
  0x72   : > { %687 = vst [vmem:[#allocation2 + $0x18] sm:$0xf] %v686_v53  ;;  %v619_v53 = vshll.u32 %v348_v41, 16  ;;  %v4947_v1 = vrot.slane %v616_v51, 7  ;;  %v412_v23 = vshrl.u32 %v324_v15, 16  ;;  %v415_v60 = vshll.u32 %v324_v15, 16  ;;  %2084 = vmatpush.bf16.msrb.mxu3 %v4055_v34 }
  0x73   : > { %688 = vst [vmem:[#allocation2 + $0x1c] sm:$0xf] %v384_v0  ;;  %v783_v0 = vld [vmem:[#allocation2 + $0xc0] sm:$0xf]  ;;  %v486_v54 = vsel %vm4710_vm5, %v478_v45, %v485_v46  ;;  %v334_v41 = vld [vmem:[%s4677_s12 + $0x44] sm:$0xf] }
  0x74   : > { %722 = vst [vmem:[#allocation2 + $0x54] sm:$0xf] %v721_v61  ;;  %v728_v61 = vsel %vm4703_vm4, %v477_v40, %v727_v35  ;;  %v621_v13 = vor.u32 %v619_v53, %v4947_v1  ;;  %v784_v24 = vsel %vm4703_vm4, %v613_v62, %v783_v0  ;;  %v4968_v32 = vrot.slane %v412_v23, 7  ;;  %v4064_v35 = vld [vmem:[#allocation6 + $0xd8] sm:$0xff]  ;;  %v333_v40 = vld [vmem:[%s4677_s12 + $0x40] sm:$0xf] }
  0x75   : > { %723 = vst [vmem:[#allocation2 + $0x58] sm:$0xf] %v469_v9  ;;  %v404_v9 = vshrl.u32 %v323_v3, 16  ;;  %v489_v42 = vshrl.u32 %v333_v40, 16  ;;  %v492_v43 = vshll.u32 %v333_v40, 16  ;;  %2172 = vmatpush.bf16.msrb.mxu0 %v4064_v35  ;;  %v560_v57 = vshll.u32 %v341_v50, 16 }
  0x76   : > { %v4021_v44 = vld [vmem:[#allocation2 + $0x78] sm:$0xff]  ;;  %750 = vst [vmem:[#allocation2 + $0x84] sm:$0xf] %v749_v28  ;;  %v622_v28 = vsel %vm4710_vm5, %v614_v63, %v621_v13  ;;  %v417_v38 = vor.u32 %v415_v60, %v4968_v32  ;;  %v734_v46 = vld [vmem:[#allocation2 + $0x6c] sm:$0xf] }
  0x77   : > { %751 = vst [vmem:[#allocation2 + $0x88] sm:$0xf] %v537_v33  ;;  %1078 = vmatmul.bf16.vlgmr.msra.gmra.mxu2 %v4021_v44  ;;  %v406_v21 = vrot.slane %v404_v9, 7  ;;  %v4039_v33 = vld [vmem:[#allocation6 + $0x50] sm:$0xff]  ;;  %v491_v45 = vrot.slane %v489_v42, 7  ;;  %v4037_v42 = vld [vmem:[#allocation6 + $0x40] sm:$0xff] }
  0x78   : > { %v4025_v55 = vld [vmem:[#allocation2 + $0xa8] sm:$0xff]  ;;  %778 = vst [vmem:[#allocation2 + $0xb4] sm:$0xf] %v777_v39  ;;  %1309 = vmatpush.bf16.msrb.mxu2 %v4039_v33  ;;  %v342_v51 = vld [vmem:[%s4677_s12 + $0x64] sm:$0xf] }
  0x79   : > { %779 = vst [vmem:[#allocation2 + $0xb8] sm:$0xf] %v605_v5  ;;  %1098 = vmatmul.bf16.vlgmr.msra.gmra.mxu3 %v4025_v55  ;;  %v409_v29 = vor.u32 %v407_v16, %v406_v21  ;;  %v410_v30 = vrot.slane %v406_v21, 4  ;;  %v497_v5 = vshrl.u32 %v334_v41, 16  ;;  %v494_v53 = vor.u32 %v492_v43, %v491_v45  ;;  %v325_v63 = vld [vmem:[%s4677_s12 + $0x20] sm:$0xf] }
  0x7a   : > { %v4950_v6 = vld [vmem:[#allocation2 + $0x18] sm:$0xff]  ;;  %694 = vst [vmem:[#allocation2 + $0x24] sm:$0xf] %v693_v27  ;;  %v500_v27 = vshll.u32 %v334_v41, 16  ;;  %v495_v55 = vrot.slane %v491_v45, 4  ;;  %v568_v62 = vshll.u32 %v342_v51, 16 }
  0x7b   : > { %695 = vst [vmem:[#allocation2 + $0x28] sm:$0xf] %v401_v56  ;;  %1038 = vmatmul.bf16.vlgmr.msra.gmra.mxu0 %v4950_v6  ;;  %v700_v39 = vsel %vm4703_vm4, %v409_v29, %v699_v22  ;;  %v418_v44 = vsel %vm4710_vm5, %v410_v30, %v417_v38  ;;  %v4977_v49 = vrot.slane %v497_v5, 7  ;;  %v557_v56 = vshrl.u32 %v341_v50, 16  ;;  %v762_v16 = vld [vmem:[#allocation2 + $0x9c] sm:$0xf] }
  0x7c   : > { %v4959_v19 = vld [vmem:[#allocation2 + $0x54] sm:$0xff]  ;;  %729 = vst [vmem:[#allocation2 + $0x60] sm:$0xf] %v728_v61  ;;  %v565_v61 = vshrl.u32 %v342_v51, 16  ;;  %v421_v9 = vshrl.u32 %v325_v63, 16  ;;  %1310 = vmatpush.bf16.msrb.mxu2 %v4038_v26  ;;  %v4063_v40 = vld [vmem:[#allocation6 + $0xd0] sm:$0xff] }
  0x7d   : > { %730 = vst [vmem:[#allocation2 + $0x64] sm:$0xf] %v486_v54  ;;  %1063 = vmatmul.bf16.gmra.mxu1 %v4959_v19  ;;  %v502_v0 = vor.u32 %v500_v27, %v4977_v49  ;;  %v735_v54 = vsel %vm4703_vm4, %v494_v53, %v734_v46  ;;  %v559_v4 = vrot.slane %v557_v56, 7  ;;  %v706_v35 = vld [vmem:[#allocation2 + $0x3c] sm:$0xf]  ;;  %v4030_v41 = vld [vmem:[#allocation6 + $0x8] sm:$0xff]  ;;  %2173 = vmatpush.bf16.msrb.mxu0 %v4063_v40 }
  0x7e   : > { %757 = vst [vmem:[#allocation2 + $0x90] sm:$0xf] %v756_v10  ;;  %v4022_v48 = vld [vmem:[#allocation2 + $0x84] sm:$0xff]  ;;  %v424_v10 = vshll.u32 %v325_v63, 16  ;;  %v4990_v15 = vrot.slane %v565_v61, 7  ;;  %v423_v60 = vrot.slane %v421_v9, 7  ;;  %1221 = vmatpush.bf16.msrb.mxu1 %v4030_v41 }
  0x7f   : > { %758 = vst [vmem:[#allocation2 + $0x94] sm:$0xf] %v554_v20  ;;  %v503_v13 = vsel %vm4710_vm5, %v495_v55, %v502_v0  ;;  %v429_v20 = vshrl.u32 %v326_v8, 16  ;;  %v562_v21 = vor.u32 %v560_v57, %v559_v4  ;;  %v563_v23 = vrot.slane %v559_v4, 4  ;;  %v4062_v45 = vld [vmem:[#allocation6 + $0xc8] sm:$0xff]  ;;  %v4029_v46 = vld [vmem:[#allocation6] sm:$0xff] }
  0x80   : > { %785 = vst [vmem:[#allocation2 + $0xc0] sm:$0xf] %v784_v24  ;;  %v4026_v59 = vld [vmem:[#allocation2 + $0xb4] sm:$0xff]  ;;  %v432_v24 = vshll.u32 %v326_v8, 16  ;;  %v570_v25 = vor.u32 %v568_v62, %v4990_v15  ;;  %v426_v33 = vor.u32 %v424_v10, %v423_v60  ;;  %v427_v34 = vrot.slane %v423_v60, 4  ;;  %1311 = vmatpush.bf16.msrb.mxu2 %v4037_v42 }
  0x81   : > { %786 = vst [vmem:[#allocation2 + $0xc4] sm:$0xf] %v622_v28  ;;  %v4054_v28 = vld [vmem:[#allocation6 + $0x88] sm:$0xff]  ;;  %v4995_v29 = vrot.slane %v429_v20, 7  ;;  %v763_v30 = vsel %vm4703_vm4, %v562_v21, %v762_v16  ;;  %v353_v5 = vshrl.u32 %v317_v36, 16  ;;  %v356_v51 = vshll.u32 %v317_v36, 16  ;;  %2174 = vmatpush.bf16.msrb.mxu0 %v4062_v45 }
  0x82   : > { %701 = vst [vmem:[#allocation2 + $0x30] sm:$0xf] %v700_v39  ;;  %v4983_v3 = vld [vmem:[#allocation2 + $0x24] sm:$0xff]  ;;  %v571_v38 = vsel %vm4710_vm5, %v563_v23, %v570_v25  ;;  %2085 = vmatpush.bf16.msrb.mxu3 %v4054_v28  ;;  %v707_v43 = vsel %vm4703_vm4, %v426_v33, %v706_v35  ;;  %v676_v56 = vld [vmem:[#allocation2 + $0xc] sm:$0xf]  ;;  %v4061_v61 = vld [vmem:[#allocation6 + $0xc0] sm:$0xff]  ;;  %1222 = vmatpush.bf16.msrb.mxu1 %v4029_v46 }
  0x83   : > { %702 = vst [vmem:[#allocation2 + $0x34] sm:$0xf] %v418_v44  ;;  %v434_v39 = vor.u32 %v432_v24, %v4995_v29  ;;  %v4053_v44 = vld [vmem:[#allocation6 + $0x80] sm:$0xff]  ;;  %v355_v50 = vrot.slane %v353_v5, 7  ;;  %v682_v8 = vld [vmem:[#allocation2 + $0x14] sm:$0x1] }
  0x84   : > { %736 = vst [vmem:[#allocation2 + $0x6c] sm:$0xf] %v735_v54  ;;  %v4992_v22 = vld [vmem:[#allocation2 + $0x60] sm:$0xff]  ;;  %v4084_v60 = vld [vmem:[#allocation6 + $0x138] sm:$0xff]  ;;  %v1395_v46 = vld [vmem:[#allocation2 + $0x8] sm:$0x1] }
  0x85   : > { %737 = vst [vmem:[#allocation2 + $0x70] sm:$0xf] %v503_v13  ;;  %v435_v27 = vsel %vm4710_vm5, %v427_v34, %v434_v39  ;;  %v358_v57 = vor.u32 %v356_v51, %v355_v50  ;;  %v385_v13 = vrot.slane %v4809_v2, 4  ;;  %2175 = vmatpush.bf16.msrb.mxu0 %v4061_v61  ;;  %v4092_v24 = vld [vmem:[#allocation6 + $0x178] sm:$0xff]  ;;  %v1393_v2 = vld [vmem:[#allocation2] sm:$0xf]  ;;  %2877 = vmatpush.bf16.msra.mxu2 %v4084_v60 }
  0x86   : > { %764 = vst [vmem:[#allocation2 + $0x9c] sm:$0xf] %v763_v30  ;;  %2086 = vmatpush.bf16.msrb.mxu3 %v4053_v44  ;;  %v4023_v9 = vld [vmem:[#allocation2 + $0x90] sm:$0xff]  ;;  %v1394_v25 = vld [vmem:[#allocation2 + $0x4] sm:$0xf]  ;;  %v1451_v34 = vshrl.u32 %v1393_v2, 16 }
  0x87   : > { %1083 = vmatmul.bf16.gmra.mxu2 %v4022_v48  ;;  %765 = vst [vmem:[#allocation2 + $0xa0] sm:$0xf] %v571_v38  ;;  %v318_v48 = vld [vmem:[%s4677_s12 + $0x4] sm:$0xf]  ;;  %v677_v4 = vsel %vm4703_vm4, %v358_v57, %v676_v56  ;;  %v690_v14 = vsel %vm5012_vm7, %v385_v13, %v689_v12  ;;  %v4076_v26 = vld [vmem:[#allocation8 + $0x78] sm:$0xff]  ;;  %v1454_v35 = vshll.u32 %v1393_v2, 16 }
  0x88   : > { %708 = vst [vmem:[#allocation2 + $0x3c] sm:$0xf] %v707_v43  ;;  %v361_v53 = vshrl.u32 %v318_v48, 16  ;;  %v364_v55 = vshll.u32 %v318_v48, 16  ;;  %v4027_v16 = vld [vmem:[#allocation2 + $0xc0] sm:$0xff]  ;;  %v4100_v28 = vld [vmem:[#allocation8 + $0xb8] sm:$0xff]  ;;  %2358 = vmatpush.bf16.msra.mxu1 %v4076_v26 }
  0x89   : > { %1103 = vmatmul.bf16.gmra.mxu3 %v4026_v59  ;;  %709 = vst [vmem:[#allocation2 + $0x40] sm:$0xf] %v435_v27  ;;  %v359_v59 = vrot.slane %v355_v50, 4  ;;  %3156 = vmatpush.bf16.msra.mxu0 %v4100_v28  ;;  %v1460_v36 = vshll.u32 %v1394_v25, 16  ;;  %v1464_v38 = vshrl.u32 %v1394_v25, 16  ;;  %v1453_v43 = vrot.slane %v1451_v34, 4 }
  0x8a   : > { %v363_v0 = vrot.slane %v361_v53, 7  ;;  %678 = vst [vmem:[#allocation2 + $0xc] sm:$0xf] %v677_v4  ;;  %v5023_v21 = vld [vmem:[#allocation2 + $0x30] sm:$0xff]  ;;  %2966 = vmatpush.bf16.msra.mxu3 %v4092_v24  ;;  %v1456_v44 = vrot.slane %v1454_v35, 5  ;;  %v1470_v61 = vshll.u32 %v1395_v46, 16 }
  0x8b   : > { %1043 = vmatmul.bf16.gmra.mxu0 %v4983_v3  ;;  %691 = vst [vmem:[#allocation2 + $0x20] sm:$0x1] %v690_v14  ;;  %v1462_v5 = vrot.slane %v1460_v36, 5  ;;  %v1466_v27 = vrot.slane %v1464_v38, 4  ;;  %v4028_v56 = vld [vmem:[#allocation2 + $0xcc] sm:$0xff]  ;;  %v419_v46 = vrot.slane %v4968_v32, 4 }
  0x8c   : > { %v366_v63 = vor.u32 %v364_v55, %v363_v0  ;;  %v368_v54 = vrot.slane %v363_v0, 4  ;;  %v5025_v23 = vld [vmem:[#allocation2 + $0x6c] sm:$0xff]  ;;  %v402_v55 = vrot.slane %v4907_v7, 4  ;;  %v1399_v2 = vld [vmem:[#allocation2 + $0x18] sm:$0xf] }
  0x8d   : > { %1068 = vmatmul.bf16.gmra.mxu1 %v4992_v22  ;;  %v1467_v0 = vor.u32 %v1466_v27, %v1462_v5  ;;  %v1400_v25 = vld [vmem:[#allocation2 + $0x1c] sm:$0xf]  ;;  %v4075_v32 = vld [vmem:[#allocation8 + $0x70] sm:$0xff] }
  0x8e   : > { %v367_v10 = vsel %vm4710_vm5, %v359_v59, %v366_v63  ;;  %v683_v20 = vsel %vm5012_vm7, %v368_v54, %v682_v8  ;;  %v4024_v45 = vld [vmem:[#allocation2 + $0x9c] sm:$0xff]  ;;  %v1457_v59 = vor.u32 %v1456_v44, %v1453_v43  ;;  %v1508_v36 = vshll.u32 %v1400_v25, 16  ;;  %2359 = vmatpush.bf16.msra.mxu1 %v4075_v32 }
  0x8f   : > { %679 = vst [vmem:[#allocation2 + $0x10] sm:$0xf] %v367_v10  ;;  %v4011_v10 = vld [vmem:[#allocation2] sm:$0xff]  ;;  %v1512_v38 = vshrl.u32 %v1400_v25, 16 }
  0x90   : > { %684 = vst [vmem:[#allocation2 + $0x14] sm:$0x1] %v683_v20  ;;  %v5032_v63 = vld [vmem:[#allocation2 + $0x3c] sm:$0xff]  ;;  %v1458_v7 = vrot.slane %v1457_v59, 4  ;;  %v1472_v20 = vrot.slane %v1470_v61, 5  ;;  %v1510_v27 = vrot.slane %v1508_v36, 5 }
  0x91   : > { %v1396_v30 = vld [vmem:[#allocation2 + $0xc] sm:$0xf] }
  0x92   : > { %v1475_v39 = vshrl.u32 %v1396_v30, 16  ;;  %v1478_v40 = vshll.u32 %v1396_v30, 16  ;;  %v1463_v26 = vsel %vm5037_vm10, %v1458_v7, %v1462_v5  ;;  %v1499_v30 = vshrl.u32 %v1399_v2, 16  ;;  %v4083_v59 = vld [vmem:[#allocation6 + $0x130] sm:$0xff] }
  0x93   : > { %2878 = vmatpush.bf16.msra.mxu2 %v4083_v59 }
  0x94   : > { %v1477_v48 = vrot.slane %v1475_v39, 4  ;;  %v1480_v50 = vrot.slane %v1478_v40, 5  ;;  %v1882_v39 = vunpack.c.l.b16 %v1463_v26  ;;  %v1501_v44 = vrot.slane %v1499_v30, 4 }
  0x96   : > { %v1397_v33 = vld [vmem:[#allocation2 + $0x10] sm:$0xf]  ;;  %v1481_v54 = vor.u32 %v1480_v50, %v1477_v48  ;;  %v1401_v50 = vld [vmem:[#allocation2 + $0x20] sm:$0x1] }
  0x97   : > { %1088 = vmatmul.bf16.gmra.mxu2 %v4023_v9  ;;  %v1484_v41 = vshll.u32 %v1397_v33, 16  ;;  %v1488_v42 = vshrl.u32 %v1397_v33, 16  ;;  %v1398_v57 = vld [vmem:[#allocation2 + $0x14] sm:$0x1]  ;;  %v696_v9 = vld [vmem:[#allocation2 + $0x2c] sm:$0x1] }
  0x98   : > { %v1494_v8 = vshll.u32 %v1398_v57, 16  ;;  %v697_v13 = vsel %vm5012_vm7, %v402_v55, %v696_v9  ;;  %v1482_v60 = vrot.slane %v1481_v54, 4  ;;  %v1502_v33 = vshll.u32 %v1399_v2, 16  ;;  %v703_v57 = vld [vmem:[#allocation2 + $0x38] sm:$0x1] }
  0x99   : > { %1108 = vmatmul.bf16.gmra.mxu3 %v4027_v16  ;;  %v1486_v51 = vrot.slane %v1484_v41, 5  ;;  %v1490_v53 = vrot.slane %v1488_v42, 4  ;;  %v1468_v16 = vrot.slane %v1467_v0, 4  ;;  %698 = vst [vmem:[#allocation2 + $0x2c] sm:$0x1] %v697_v13  ;;  %v4012_v41 = vld [vmem:[#allocation2 + $0xc] sm:$0xff]  ;;  %v704_v61 = vsel %vm5012_vm7, %v419_v46, %v703_v57 }
  0x9a   : > { %v1496_v14 = vrot.slane %v1494_v8, 5  ;;  %v1504_v5 = vrot.slane %v1502_v33, 5  ;;  %v4091_v0 = vld [vmem:[#allocation6 + $0x170] sm:$0xff]  ;;  %v1402_v54 = vld [vmem:[#allocation2 + $0x24] sm:$0xf] }
  0x9b   : > { %1048 = vmatmul.bf16.gmra.mxu0 %v5023_v21  ;;  %v1491_v4 = vor.u32 %v1490_v53, %v1486_v51  ;;  %v1473_v28 = vsel %vm5037_vm10, %v1468_v16, %v1472_v20  ;;  %v1487_v34 = vsel %vm5037_vm10, %v1482_v60, %v1486_v51  ;;  %705 = vst [vmem:[#allocation2 + $0x38] sm:$0x1] %v704_v61  ;;  %v4099_v8 = vld [vmem:[#allocation8 + $0xb0] sm:$0xff]  ;;  %v1523_v7 = vshrl.u32 %v1402_v54, 16 }
  0x9c   : > { %v1883_v40 = vunpack.c.l.b16 %v1473_v28  ;;  %v1884_v42 = vunpack.c.l.b16 %v1487_v34  ;;  %v1505_v53 = vor.u32 %v1504_v5, %v1501_v44  ;;  %2967 = vmatpush.bf16.msra.mxu3 %v4091_v0  ;;  %3157 = vmatpush.bf16.msra.mxu0 %v4099_v8  ;;  %v1526_v16 = vshll.u32 %v1402_v54, 16 }
  0x9d   : > { %1073 = vmatmul.bf16.gmra.mxu1 %v5025_v23  ;;  %v1492_v24 = vrot.slane %v1491_v4, 4  ;;  %v1403_v4 = vld [vmem:[#allocation2 + $0x28] sm:$0xf]  ;;  %v1525_v2 = vrot.slane %v1523_v7, 4  ;;  %v4090_v7 = vld [vmem:[#allocation6 + $0x168] sm:$0xff] }
  0x9e   : > { %v1914_v48 = vpack.c.b16 %v1883_v40, %v1882_v39  ;;  %v1506_v9 = vrot.slane %v1505_v53, 4  ;;  %v1532_v20 = vshll.u32 %v1403_v4, 16  ;;  %v1536_v60 = vshrl.u32 %v1403_v4, 16 }
  0x9f   : > { %v1497_v35 = vsel %vm5037_vm10, %v1492_v24, %v1496_v14  ;;  %v1528_v25 = vrot.slane %v1526_v16, 5  ;;  %v453_v4 = vrot.slane %v4700_v11, 4 }
  0xa0   : > { %v1885_v43 = vunpack.c.l.b16 %v1497_v35  ;;  %v1511_v24 = vsel %vm5037_vm10, %v1506_v9, %v1510_v27  ;;  %v1534_v26 = vrot.slane %v1532_v20, 5  ;;  %v1538_v28 = vrot.slane %v1536_v60, 4  ;;  %v1404_v34 = vld [vmem:[#allocation2 + $0x2c] sm:$0x1]  ;;  %2968 = vmatpush.bf16.msra.mxu3 %v4090_v7 }
  0xa1   : > { %v1886_v30 = vunpack.c.l.b16 %v1511_v24  ;;  %v436_v35 = vrot.slane %v4995_v29, 4  ;;  %v1529_v36 = vor.u32 %v1528_v25, %v1525_v2  ;;  %v1542_v39 = vshll.u32 %v1404_v34, 16  ;;  %v1406_v29 = vld [vmem:[#allocation2 + $0x34] sm:$0xf]  ;;  %v4074_v24 = vld [vmem:[#allocation8 + $0x68] sm:$0xff] }
  0xa2   : > { %v1915_v51 = vpack.c.b16 %v1885_v43, %v1884_v42  ;;  %v1560_v53 = vshrl.u32 %v1406_v29, 16  ;;  %v1407_v54 = vld [vmem:[#allocation2 + $0x38] sm:$0x1]  ;;  %v1409_v2 = vld [vmem:[#allocation2 + $0x40] sm:$0xf]  ;;  %2360 = vmatpush.bf16.msra.mxu1 %v4074_v24 }
  0xa3   : > { %v1530_v43 = vrot.slane %v1529_v36, 4  ;;  %v1544_v5 = vrot.slane %v1542_v39, 5  ;;  %v1566_v9 = vshll.u32 %v1407_v54, 16  ;;  %v1584_v34 = vshrl.u32 %v1409_v2, 16 }
  0xa4   : > { %v1562_v61 = vrot.slane %v1560_v53, 4 }
  0xa5   : > { %v1568_v60 = vrot.slane %v1566_v9, 5 }
  0xa7   : > { %1093 = vmatmul.bf16.gmra.mxu2 %v4024_v45  ;;  %v1514_v45 = vrot.slane %v1512_v38, 4  ;;  %v1539_v38 = vor.u32 %v1538_v28, %v1534_v26 }
  0xa9   : > { %1113 = vmatmul.bf16.gmra.mxu3 %v4028_v56  ;;  %v1515_v55 = vor.u32 %v1514_v45, %v1510_v27  ;;  %v1518_v56 = vshll.u32 %v1401_v50, 16  ;;  %v1540_v44 = vrot.slane %v1539_v38, 4  ;;  %v1405_v27 = vld [vmem:[#allocation2 + $0x30] sm:$0xf]  ;;  %v1535_v45 = vsel %vm5037_vm10, %v1530_v43, %v1534_v26 }
  0xaa   : > { %v1550_v50 = vshll.u32 %v1405_v27, 16  ;;  %v470_v43 = vrot.slane %v4832_v18, 4  ;;  %v1411_v18 = vld [vmem:[#allocation2 + $0x48] sm:$0xf] }
  0xab   : > { %1053 = vmatmul.bf16.gmra.mxu0 %v5032_v63  ;;  %v1520_v13 = vrot.slane %v1518_v56, 5  ;;  %v1545_v46 = vsel %vm5037_vm10, %v1540_v44, %v1544_v5 }
  0xac   : > { %v1889_v56 = vunpack.c.l.b16 %v1545_v46  ;;  %v1552_v59 = vrot.slane %v1550_v50, 5 }
  0xad   : > { %1223 = vmatmul.bf16.vlgmr.msrb.gmra.mxu1 %v4011_v10  ;;  %v1516_v10 = vrot.slane %v1515_v55, 4  ;;  %v1888_v55 = vunpack.c.l.b16 %v1535_v45 }
  0xaf   : > { %v1521_v14 = vsel %vm5037_vm10, %v1516_v10, %v1520_v13  ;;  %v717_v10 = vld [vmem:[#allocation2 + $0x50] sm:$0x1]  ;;  %v4082_v13 = vld [vmem:[#allocation6 + $0x128] sm:$0xff] }
  0xb0   : > { %v1887_v33 = vunpack.c.l.b16 %v1521_v14  ;;  %v718_v16 = vsel %vm5012_vm7, %v453_v4, %v717_v10  ;;  %2879 = vmatpush.bf16.msra.mxu2 %v4082_v13  ;;  %v1408_v14 = vld [vmem:[#allocation2 + $0x3c] sm:$0xf] }
  0xb1   : > { %719 = vst [vmem:[#allocation2 + $0x50] sm:$0x1] %v718_v16  ;;  %v1571_v28 = vshrl.u32 %v1408_v14, 16 }
  0xb2   : > { %v5058_v40 = vpack.c.b16 %v1887_v33, %v1886_v30  ;;  %v1574_v30 = vshll.u32 %v1408_v14, 16  ;;  %v1580_v33 = vshll.u32 %v1409_v2, 16 }
  0xb3   : > { %v1573_v39 = vrot.slane %v1571_v28, 4  ;;  %v4089_v28 = vld [vmem:[#allocation6 + $0x160] sm:$0xff] }
  0xb4   : > { %2969 = vmatpush.bf16.msra.mxu3 %v4089_v28  ;;  %v1418_v28 = vld [vmem:[#allocation2 + $0x64] sm:$0xf] }
  0xb7   : > { %1312 = vmatmul.bf16.vlgmr.msrb.gmra.mxu2 %v4012_v41 }
  0xb9   : > { %2087 = vmatmul.bf16.vlgmr.msrb.gmra.mxu3 %v1914_v48  ;;  %v1547_v48 = vshrl.u32 %v1405_v27, 16 }
  0xbb   : > { %2176 = vmatmul.bf16.vlgmr.msrb.gmra.mxu0 %v1915_v51  ;;  %v1549_v57 = vrot.slane %v1547_v48, 4  ;;  %v724_v48 = vld [vmem:[#allocation2 + $0x5c] sm:$0x1] }
  0xbc   : > { %v725_v50 = vsel %vm5012_vm7, %v470_v43, %v724_v48 }
  0xbd   : > { %1228 = vmatmul.bf16.gmra.mxu1 %v4012_v41  ;;  %v710_v41 = vld [vmem:[#allocation2 + $0x44] sm:$0x1]  ;;  %v1553_v32 = vor.u32 %v1552_v59, %v1549_v57  ;;  %726 = vst [vmem:[#allocation2 + $0x5c] sm:$0x1] %v725_v50  ;;  %v1595_v57 = vshrl.u32 %v1411_v18, 16  ;;  %v1598_v59 = vshll.u32 %v1411_v18, 16 }
  0xbe   : > { %v711_v42 = vsel %vm5012_vm7, %v436_v35, %v710_v41  ;;  %v4098_v35 = vld [vmem:[#allocation8 + $0xa8] sm:$0xff]  ;;  %v1576_v41 = vrot.slane %v1574_v30, 5  ;;  %v4097_v50 = vld [vmem:[#allocation8 + $0xa0] sm:$0xff] }
  0xbf   : > { %712 = vst [vmem:[#allocation2 + $0x44] sm:$0x1] %v711_v42  ;;  %v1554_v20 = vrot.slane %v1553_v32, 4  ;;  %3158 = vmatpush.bf16.msra.mxu0 %v4098_v35  ;;  %v1586_v42 = vrot.slane %v1584_v34, 4  ;;  %v1600_v9 = vrot.slane %v1598_v59, 5 }
  0xc3   : > { %3159 = vmatpush.bf16.msra.mxu0 %v4097_v50 }
  0xc6   : > { %v1410_v44 = vld [vmem:[#allocation2 + $0x44] sm:$0x1] }
  0xc7   : > { %1317 = vmatmul.bf16.gmra.mxu2 %v4950_v6  ;;  %v1590_v46 = vshll.u32 %v1410_v44, 16 }
  0xc9   : > { %2092 = vmatmul.bf16.gmra.mxu3 %v1915_v51  ;;  %v1556_v51 = vshll.u32 %v1406_v29, 16  ;;  %v1577_v29 = vor.u32 %v1576_v41, %v1573_v39  ;;  %v1414_v39 = vld [vmem:[#allocation2 + $0x54] sm:$0xf]  ;;  %v1415_v41 = vld [vmem:[#allocation2 + $0x58] sm:$0xf] }
  0xca   : > { %v1619_v44 = vshrl.u32 %v1414_v39, 16 }
  0xcb   : > { %2181 = vmatmul.bf16.gmra.mxu0 %v5058_v40  ;;  %v1558_v0 = vrot.slane %v1556_v51, 5  ;;  %v1412_v51 = vld [vmem:[#allocation2 + $0x4c] sm:$0xf]  ;;  %v1578_v53 = vrot.slane %v1577_v29, 4  ;;  %v1622_v29 = vshll.u32 %v1414_v39, 16 }
  0xcd   : > { %1233 = vmatmul.bf16.gmra.mxu1 %v4950_v6  ;;  %v5070_v6 = vpack.c.b16 %v1889_v56, %v1888_v55  ;;  %v1563_v8 = vor.u32 %v1562_v61, %v1558_v0  ;;  %v1559_v25 = vsel %vm5037_vm10, %v1554_v20, %v1558_v0  ;;  %v1592_v56 = vrot.slane %v1590_v46, 5  ;;  %v1413_v20 = vld [vmem:[#allocation2 + $0x50] sm:$0x1] }
  0xce   : > { %v1890_v36 = vunpack.c.l.b16 %v1559_v25  ;;  %v1604_v0 = vshll.u32 %v1412_v51, 16  ;;  %v1608_v61 = vshrl.u32 %v1412_v51, 16  ;;  %v1614_v24 = vshll.u32 %v1413_v20, 16  ;;  %v731_v25 = vld [vmem:[#allocation2 + $0x68] sm:$0x1] }
  0xcf   : > { %v1564_v11 = vrot.slane %v1563_v8, 4  ;;  %v1597_v8 = vrot.slane %v1595_v57, 4  ;;  %v1632_v46 = vshrl.u32 %v1415_v41, 16 }
  0xd0   : > { %v1606_v10 = vrot.slane %v1604_v0, 5  ;;  %v1610_v13 = vrot.slane %v1608_v61, 4  ;;  %v1416_v61 = vld [vmem:[#allocation2 + $0x5c] sm:$0x1] }
  0xd1   : > { %v1569_v26 = vsel %vm5037_vm10, %v1564_v11, %v1568_v60  ;;  %v1601_v11 = vor.u32 %v1600_v9, %v1597_v8  ;;  %v1634_v59 = vrot.slane %v1632_v46, 4 }
  0xd2   : > { %v1891_v38 = vunpack.c.l.b16 %v1569_v26  ;;  %v5082_v5 = vpop.f32.mrf.mxu1  ;;  %v1611_v60 = vor.u32 %v1610_v13, %v1606_v10  ;;  %v4081_v26 = vld [vmem:[#allocation6 + $0x120] sm:$0xff]  ;;  %v1638_v13 = vshll.u32 %v1416_v61, 16 }
  0xd3   : > { %v1602_v34 = vrot.slane %v1601_v11, 4  ;;  %2880 = vmatpush.bf16.msra.mxu2 %v4081_v26  ;;  %v1417_v26 = vld [vmem:[#allocation2 + $0x60] sm:$0xf] }
  0xd4   : > { %v5085_v27 = vpack.c.b16 %v1891_v38, %v1890_v36  ;;  %v1612_v35 = vrot.slane %v1611_v60, 4  ;;  %v1616_v36 = vrot.slane %v1614_v24, 5  ;;  %v1640_v24 = vrot.slane %v1638_v13, 5  ;;  %v4088_v13 = vld [vmem:[#allocation6 + $0x158] sm:$0xff] }
  0xd5   : > { %v1646_v39 = vshll.u32 %v1417_v26, 16  ;;  %2970 = vmatpush.bf16.msra.mxu3 %v4088_v13 }
  0xd6   : > { %v1617_v43 = vsel %vm5037_vm10, %v1612_v35, %v1616_v36  ;;  %v1643_v36 = vshrl.u32 %v1417_v26, 16 }
  0xd7   : > { %1322 = vmatmul.bf16.gmra.mxu2 %v4983_v3  ;;  %v1648_v50 = vrot.slane %v1646_v39, 5 }
  0xd8   : > { %v1645_v46 = vrot.slane %v1643_v36, 4 }
  0xd9   : > { %2097 = vmatmul.bf16.gmra.mxu3 %v5058_v40 }
  0xda   : > { %v5096_v32 = vpop.f32.mrf.mxu1  ;;  %v1649_v61 = vor.u32 %v1648_v50, %v1645_v46  ;;  %v4096_v50 = vld [vmem:[#allocation8 + $0x98] sm:$0xff] }
  0xdb   : > { %2186 = vmatmul.bf16.gmra.mxu0 %v5070_v6 }
  0xdc   : > { %3160 = vmatpush.bf16.msra.mxu0 %v4096_v50 }
  0xdd   : > { %1238 = vmatmul.bf16.gmra.mxu1 %v4983_v3  ;;  %v1582_v3 = vrot.slane %v1580_v33, 5 }
  0xdf   : > { %v1587_v45 = vor.u32 %v1586_v42, %v1582_v3  ;;  %v1583_v54 = vsel %vm5037_vm10, %v1578_v53, %v1582_v3  ;;  %v4073_v3 = vld [vmem:[#allocation8 + $0x60] sm:$0xff]  ;;  %v1607_v42 = vsel %vm5037_vm10, %v1602_v34, %v1606_v10  ;;  %v1895_v53 = vunpack.c.l.b16 %v1617_v43 }
  0xe0   : > { %v1892_v7 = vunpack.c.l.b16 %v1583_v54  ;;  %2361 = vmatpush.bf16.msra.mxu1 %v4073_v3  ;;  %v1894_v51 = vunpack.c.l.b16 %v1607_v42  ;;  %v504_v54 = vrot.slane %v4977_v49, 4  ;;  %v1656_v3 = vshrl.u32 %v1418_v28, 16 }
  0xe1   : > { %v1588_v55 = vrot.slane %v1587_v45, 4  ;;  %v1628_v45 = vshll.u32 %v1415_v41, 16  ;;  %v1652_v41 = vshll.u32 %v1418_v28, 16  ;;  %v1420_v28 = vld [vmem:[#allocation2 + $0x6c] sm:$0xf] }
  0xe2   : > { %v5128_v8 = vpack.c.b16 %v1895_v53, %v1894_v51  ;;  %v1658_v53 = vrot.slane %v1656_v3, 4  ;;  %v1667_v36 = vshrl.u32 %v1420_v28, 16  ;;  %v1670_v39 = vshll.u32 %v1420_v28, 16 }
  0xe3   : > { %v1593_v4 = vsel %vm5037_vm10, %v1588_v55, %v1592_v56  ;;  %v1624_v56 = vrot.slane %v1622_v29, 5  ;;  %v1630_v57 = vrot.slane %v1628_v45, 5  ;;  %v1654_v51 = vrot.slane %v1652_v41, 5 }
  0xe4   : > { %v1893_v16 = vunpack.c.l.b16 %v1593_v4  ;;  %v4298_v4 = vld [vmem:[#allocation2 + $0x48] sm:$0xff] }
  0xe5   : > { %v1635_v10 = vor.u32 %v1634_v59, %v1630_v57 }
  0xe6   : > { %v5100_v14 = vpack.c.b16 %v1893_v16, %v1892_v7  ;;  %v738_v16 = vld [vmem:[#allocation2 + $0x74] sm:$0x1] }
  0xe7   : > { %1327 = vmatmul.bf16.gmra.mxu2 %v5023_v21  ;;  %v739_v20 = vsel %vm5012_vm7, %v504_v54, %v738_v16  ;;  %v1636_v60 = vrot.slane %v1635_v10, 4  ;;  %v1659_v54 = vor.u32 %v1658_v53, %v1654_v51  ;;  %v4080_v10 = vld [vmem:[#allocation6 + $0x118] sm:$0xff] }
  0xe8   : > { %740 = vst [vmem:[#allocation2 + $0x74] sm:$0x1] %v739_v20  ;;  %2881 = vmatpush.bf16.msra.mxu2 %v4080_v10 }
  0xe9   : > { %2102 = vmatmul.bf16.gmra.mxu3 %v5070_v6  ;;  %v1641_v34 = vsel %vm5037_vm10, %v1636_v60, %v1640_v24  ;;  %v1650_v60 = vrot.slane %v1649_v61, 4  ;;  %v1660_v24 = vrot.slane %v1659_v54, 4  ;;  %v1669_v61 = vrot.slane %v1667_v36, 4 }
  0xea   : > { %v1897_v29 = vunpack.c.l.b16 %v1641_v34  ;;  %v4072_v34 = vld [vmem:[#allocation8 + $0x58] sm:$0xff]  ;;  %v1672_v54 = vrot.slane %v1670_v39, 5 }
  0xeb   : > { %2191 = vmatmul.bf16.gmra.mxu0 %v5085_v27  ;;  %2362 = vmatpush.bf16.msra.mxu1 %v4072_v34  ;;  %v1655_v3 = vsel %vm5037_vm10, %v1650_v60, %v1654_v51  ;;  %v538_v51 = vrot.slane %v4857_v31, 4 }
  0xec   : > { %v1673_v60 = vor.u32 %v1672_v54, %v1669_v61 }
  0xed   : > { %1243 = vmatmul.bf16.gmra.mxu1 %v5023_v21  ;;  %v487_v21 = vrot.slane %v4921_v17, 4 }
  0xef   : > { %v732_v30 = vsel %vm5012_vm7, %v487_v21, %v731_v25  ;;  %v1422_v13 = vld [vmem:[#allocation2 + $0x74] sm:$0x1] }
  0xf0   : > { %733 = vst [vmem:[#allocation2 + $0x68] sm:$0x1] %v732_v30  ;;  %v1686_v28 = vshll.u32 %v1422_v13, 16 }
  0xf2   : > { %v1688_v50 = vrot.slane %v1686_v28, 5 }
  0xf7   : > { %1332 = vmatmul.bf16.gmra.mxu2 %v5032_v63 }
  0xf8   : > { %v5102_v2 = vpop.f32.mrf.mxu0 }
  0xf9   : > { %2107 = vmatmul.bf16.gmra.mxu3 %v5085_v27 }
  0xfa   : > { %v5107_v33 = vpop.f32.mrf.mxu2  ;;  %v5109_v17 = vpop.f32.mrf.mxu1 }
  0xfb   : > { %2196 = vmatmul.bf16.gmra.mxu0 %v5100_v14 }
  0xfc   : > { %v5112_v38 = vpop.f32.mrf.mxu3 }
  0xfd   : > { %1248 = vmatmul.bf16.gmra.mxu1 %v5032_v63  ;;  %v1621_v63 = vrot.slane %v1619_v44, 4 }
  0xff   : > { %v1625_v9 = vor.u32 %v1624_v56, %v1621_v63  ;;  %v521_v63 = vrot.slane %v4787_v52, 4  ;;  %v1419_v56 = vld [vmem:[#allocation2 + $0x68] sm:$0x1] }
 0x100   : > { %v5119_v48 = vpop.f32.mrf.mxu0 }
 0x101   : > { %v1626_v49 = vrot.slane %v1625_v9, 4  ;;  %v745_v9 = vld [vmem:[#allocation2 + $0x80] sm:$0x1] }
 0x102   : > { %v5121_v18 = vpop.f32.mrf.mxu2  ;;  %v5123_v55 = vpop.f32.mrf.mxu1  ;;  %v746_v16 = vsel %vm5012_vm7, %v521_v63, %v745_v9 }
 0x103   : > { %v1631_v30 = vsel %vm5037_vm10, %v1626_v49, %v1630_v57  ;;  %747 = vst [vmem:[#allocation2 + $0x80] sm:$0x1] %v746_v16 }
 0x104   : > { %v5125_v0 = vpop.f32.mrf.mxu3  ;;  %v1896_v44 = vunpack.c.l.b16 %v1631_v30  ;;  %v1421_v30 = vld [vmem:[#allocation2 + $0x70] sm:$0xf] }
 0x105   : > { %v1680_v46 = vshrl.u32 %v1421_v30, 16 }
 0x106   : > { %v5156_v57 = vpack.c.b16 %v1897_v29, %v1896_v44  ;;  %v1676_v29 = vshll.u32 %v1421_v30, 16  ;;  %v752_v30 = vld [vmem:[#allocation2 + $0x8c] sm:$0x1] }
 0x107   : > { %1337 = vmatmul.bf16.gmra.mxu2 %v4298_v4  ;;  %v1682_v10 = vrot.slane %v1680_v46, 4  ;;  %v753_v34 = vsel %vm5012_vm7, %v538_v51, %v752_v30 }
 0x108   : > { %v5130_v7 = vpop.f32.mrf.mxu0  ;;  %v1678_v9 = vrot.slane %v1676_v29, 5  ;;  %754 = vst [vmem:[#allocation2 + $0x8c] sm:$0x1] %v753_v34 }
 0x109   : > { %2112 = vmatmul.bf16.gmra.mxu3 %v5100_v14 }
 0x10a   : > { %v5135_v21 = vpop.f32.mrf.mxu2  ;;  %v5137_v11 = vpop.f32.mrf.mxu1 }
 0x10b   : > { %2201 = vmatmul.bf16.gmra.mxu0 %v5128_v8 }
 0x10c   : > { %v5140_v25 = vpop.f32.mrf.mxu3 }
 0x10d   : > { %1253 = vmatmul.bf16.gmra.mxu1 %v4298_v4  ;;  %v1662_v4 = vshll.u32 %v1419_v56, 16 }
 0x10f   : > { %v1664_v26 = vrot.slane %v1662_v4, 5 }
 0x110   : > { %v5146_v35 = vpop.f32.mrf.mxu0 }
 0x111   : > { %v1665_v44 = vsel %vm5037_vm10, %v1660_v24, %v1664_v26  ;;  %v1683_v26 = vor.u32 %v1682_v10, %v1678_v9 }
 0x112   : > { %v5148_v42 = vpop.f32.mrf.mxu2  ;;  %v5150_v43 = vpop.f32.mrf.mxu1  ;;  %v1899_v56 = vunpack.c.l.b16 %v1665_v44  ;;  %v1423_v44 = vld [vmem:[#allocation2 + $0x78] sm:$0xf] }
 0x113   : > { %v1684_v46 = vrot.slane %v1683_v26, 4  ;;  %v1694_v61 = vshll.u32 %v1423_v44, 16 }
 0x114   : > { %v5152_v45 = vpop.f32.mrf.mxu3 }
 0x115   : > { %5696 = vst [vmem:[#allocation16_spill] sm:$0xff] %v5152_v45  ;;  %v1696_v34 = vrot.slane %v1694_v61, 5  ;;  %v4079_v61 = vld [vmem:[#allocation6 + $0x110] sm:$0xff] }
 0x116   : > { %2882 = vmatpush.bf16.msra.mxu2 %v4079_v61 }
 0x117   : > { %1342 = vmatmul.bf16.gmra.mxu2 %v4959_v19 }
 0x118   : > { %v5158_v59 = vpop.f32.mrf.mxu0 }
 0x119   : > { %2117 = vmatmul.bf16.gmra.mxu3 %v5128_v8 }
 0x11a   : > { %v5163_v20 = vpop.f32.mrf.mxu2  ;;  %v5165_v52 = vpop.f32.mrf.mxu1 }
 0x11b   : > { %2206 = vmatmul.bf16.gmra.mxu0 %v5156_v57 }
 0x11c   : > { %v5168_v49 = vpop.f32.mrf.mxu3 }
 0x11d   : > { %5697 = vst [vmem:[#allocation17_spill] sm:$0xff] %v5168_v49  ;;  %1258 = vmatmul.bf16.gmra.mxu1 %v4959_v19  ;;  %v1898_v19 = vunpack.c.l.b16 %v1655_v3  ;;  %v1674_v3 = vrot.slane %v1673_v60, 4 }
 0x11f   : > { %v5185_v16 = vpack.c.b16 %v1899_v56, %v1898_v19  ;;  %v1424_v19 = vld [vmem:[#allocation2 + $0x7c] sm:$0xf]  ;;  %v1691_v56 = vshrl.u32 %v1423_v44, 16  ;;  %v1679_v54 = vsel %vm5037_vm10, %v1674_v3, %v1678_v9  ;;  %v1425_v9 = vld [vmem:[#allocation2 + $0x80] sm:$0x1]  ;;  %v555_v3 = vrot.slane %v4931_v37, 4 }
 0x120   : > { %v5171_v41 = vpop.f32.mrf.mxu0  ;;  %v1700_v10 = vshll.u32 %v1424_v19, 16  ;;  %v1704_v51 = vshrl.u32 %v1424_v19, 16  ;;  %v1900_v30 = vunpack.c.l.b16 %v1679_v54  ;;  %v1710_v54 = vshll.u32 %v1425_v9, 16  ;;  %v1427_v9 = vld [vmem:[#allocation2 + $0x88] sm:$0xf] }
 0x121   : > { %5699 = vst [vmem:[#allocation19_spill] sm:$0xff] %v5185_v16  ;;  %v1693_v28 = vrot.slane %v1691_v56, 4  ;;  %v759_v56 = vld [vmem:[#allocation2 + $0x98] sm:$0x1] }
 0x122   : > { %v5177_v53 = vpop.f32.mrf.mxu2  ;;  %v5179_v63 = vpop.f32.mrf.mxu1  ;;  %v1702_v44 = vrot.slane %v1700_v10, 5  ;;  %v760_v10 = vsel %vm5012_vm7, %v555_v3, %v759_v56  ;;  %v4071_v3 = vld [vmem:[#allocation8 + $0x50] sm:$0xff] }
 0x123   : > { %v1697_v19 = vor.u32 %v1696_v34, %v1693_v28  ;;  %761 = vst [vmem:[#allocation2 + $0x98] sm:$0x1] %v760_v10  ;;  %v1712_v28 = vrot.slane %v1710_v54, 5  ;;  %v1426_v34 = vld [vmem:[#allocation2 + $0x84] sm:$0xf]  ;;  %2363 = vmatpush.bf16.msra.mxu1 %v4071_v3  ;;  %v4299_v3 = vld [vmem:[#allocation2 + $0x78] sm:$0xff] }
 0x124   : > { %v5181_v4 = vpop.f32.mrf.mxu3  ;;  %v1715_v56 = vshrl.u32 %v1426_v34, 16  ;;  %v1718_v10 = vshll.u32 %v1426_v34, 16 }
 0x125   : > { %5698 = vst [vmem:[#allocation18_spill] sm:$0xff] %v5181_v4 }
 0x126   : > { %v1720_v45 = vrot.slane %v1718_v10, 5 }
 0x127   : > { %1347 = vmatmul.bf16.gmra.mxu2 %v4992_v22 }
 0x128   : > { %v5187_v24 = vpop.f32.mrf.mxu0 }
 0x129   : > { %2122 = vmatmul.bf16.gmra.mxu3 %v5156_v57 }
 0x12a   : > { %v5192_v36 = vpop.f32.mrf.mxu2  ;;  %v1224_v39 = vpop.f32.mrf.mxu1 }
 0x12b   : > { %2211 = vmatmul.bf16.gmra.mxu0 %v5185_v16  ;;  %v1225_v31 = vadd.f32 %v1224_v39, %v5102_v2  ;;  %v1689_v2 = vsel %vm5037_vm10, %v1684_v46, %v1688_v50 }
 0x12c   : > { %v5196_v29 = vpop.f32.mrf.mxu3  ;;  %v1901_v39 = vunpack.c.l.b16 %v1689_v2 }
 0x12d   : > { %5700 = vst [vmem:[#allocation20_spill] sm:$0xff] %v5196_v29  ;;  %1263 = vmatmul.bf16.gmra.mxu1 %v4992_v22  ;;  %v1706_v29 = vrot.slane %v1704_v51, 4 }
 0x12e   : > { %v5212_v46 = vpack.c.b16 %v1901_v39, %v1900_v30 }
 0x12f   : > { %v1707_v50 = vor.u32 %v1706_v29, %v1702_v44 }
 0x130   : > { %v5201_v13 = vpop.f32.mrf.mxu0 }
 0x131   : > { %v1708_v29 = vrot.slane %v1707_v50, 4  ;;  %v1728_v50 = vshrl.u32 %v1427_v9, 16 }
 0x132   : > { %v5205_v60 = vpop.f32.mrf.mxu2  ;;  %v1226_v26 = vpop.f32.mrf.mxu1 }
 0x133   : > { %v1227_v22 = vadd.f32 %v1226_v26, %v5119_v48  ;;  %v4087_v48 = vld [vmem:[#allocation6 + $0x150] sm:$0xff]  ;;  %v1698_v26 = vrot.slane %v1697_v19, 4 }
 0x134   : > { %v5208_v4 = vpop.f32.mrf.mxu3  ;;  %2971 = vmatpush.bf16.msra.mxu3 %v4087_v48  ;;  %v4095_v48 = vld [vmem:[#allocation8 + $0x90] sm:$0xff] }
 0x135   : > { %5701 = vst [vmem:[#allocation21_spill] sm:$0xff] %v5208_v4  ;;  %v1703_v19 = vsel %vm5037_vm10, %v1698_v26, %v1702_v44  ;;  %3161 = vmatpush.bf16.msra.mxu0 %v4095_v48 }
 0x137   : > { %1352 = vmatmul.bf16.gmra.mxu2 %v5025_v23 }
 0x138   : > { %v2177_v49 = vpop.f32.mrf.mxu0 }
 0x139   : > { %2127 = vmatmul.bf16.gmra.mxu3 %v5185_v16  ;;  %v1730_v16 = vrot.slane %v1728_v50, 4 }
 0x13a   : > { %v1313_v51 = vpop.f32.mrf.mxu2  ;;  %v1229_v2 = vpop.f32.mrf.mxu1 }
 0x13b   : > { %2216 = vmatmul.bf16.gmra.mxu0 %v5212_v46  ;;  %v1314_v37 = vadd.f32 %v1313_v51, %v1225_v31  ;;  %v1230_v30 = vadd.f32 %v1229_v2, %v5130_v7  ;;  %v1713_v31 = vsel %vm5037_vm10, %v1708_v29, %v1712_v28  ;;  %v1724_v7 = vshll.u32 %v1427_v9, 16  ;;  %v1428_v28 = vld [vmem:[#allocation2 + $0x8c] sm:$0x1] }
 0x13c   : > { %v2088_v39 = vpop.f32.mrf.mxu3  ;;  %v1903_v2 = vunpack.c.l.b16 %v1713_v31  ;;  %v572_v9 = vrot.slane %v4990_v15, 4  ;;  %v1734_v31 = vshll.u32 %v1428_v28, 16 }
 0x13d   : > { %v2178_v4 = vadd.f32 %v2177_v49, %v2088_v39  ;;  %1268 = vmatmul.bf16.gmra.mxu1 %v5025_v23  ;;  %v1902_v49 = vunpack.c.l.b16 %v1703_v19  ;;  %v1717_v39 = vrot.slane %v1715_v56, 4  ;;  %v1726_v34 = vrot.slane %v1724_v7, 5 }
 0x13e   : > { %v1736_v48 = vrot.slane %v1734_v31, 5 }
 0x13f   : > { %v5224_v54 = vadd.f32 %v2178_v4, %v1314_v37  ;;  %v1721_v37 = vor.u32 %v1720_v45, %v1717_v39  ;;  %v1731_v19 = vor.u32 %v1730_v16, %v1726_v34 }
 0x140   : > { %v2179_v61 = vpop.f32.mrf.mxu0 }
 0x141   : > { %5702 = vst [vmem:[#allocation22_spill] sm:$0xff] %v5224_v54  ;;  %v5228_v54 = vpack.c.b16 %v1903_v2, %v1902_v49  ;;  %v1722_v15 = vrot.slane %v1721_v37, 4  ;;  %v1732_v16 = vrot.slane %v1731_v19, 4  ;;  %v1430_v2 = vld [vmem:[#allocation2 + $0x94] sm:$0xf] }
 0x142   : > { %v1315_v51 = vpop.f32.mrf.mxu2  ;;  %v1231_v23 = vpop.f32.mrf.mxu1 }
 0x143   : > { %v1316_v44 = vadd.f32 %v1315_v51, %v1227_v22  ;;  %v1232_v26 = vadd.f32 %v1231_v23, %v5146_v35  ;;  %v766_v22 = vld [vmem:[#allocation2 + $0xa4] sm:$0x1]  ;;  %v1429_v51 = vld [vmem:[#allocation2 + $0x90] sm:$0xf]  ;;  %v1727_v39 = vsel %vm5037_vm10, %v1722_v15, %v1726_v34  ;;  %v1737_v28 = vsel %vm5037_vm10, %v1732_v16, %v1736_v48 }
 0x144   : > { %v2090_v29 = vpop.f32.mrf.mxu3  ;;  %v767_v35 = vsel %vm5012_vm7, %v572_v9, %v766_v22  ;;  %v1748_v9 = vshll.u32 %v1430_v2, 16  ;;  %v1904_v19 = vunpack.c.l.b16 %v1727_v39  ;;  %v1905_v31 = vunpack.c.l.b16 %v1737_v28 }
 0x145   : > { %v2180_v4 = vadd.f32 %v2179_v61, %v2090_v29  ;;  %768 = vst [vmem:[#allocation2 + $0xa4] sm:$0x1] %v767_v35  ;;  %v1742_v29 = vshll.u32 %v1429_v51, 16  ;;  %v589_v16 = vrot.slane %v4796_v58, 4 }
 0x146   : > { %v1750_v34 = vrot.slane %v1748_v9, 5 }
 0x147   : > { %1357 = vmatmul.bf16.gmra.mxu2 %v4299_v3  ;;  %v5230_v56 = vadd.f32 %v2180_v4, %v1316_v44  ;;  %v1739_v44 = vshrl.u32 %v1429_v51, 16  ;;  %v1752_v4 = vshrl.u32 %v1430_v2, 16  ;;  %v1431_v51 = vld [vmem:[#allocation2 + $0x98] sm:$0x1]  ;;  %v5245_v2 = vpack.c.b16 %v1905_v31, %v1904_v19 }
 0x148   : > { %v2182_v10 = vpop.f32.mrf.mxu0  ;;  %v1758_v39 = vshll.u32 %v1431_v51, 16 }
 0x149   : > { %2132 = vmatmul.bf16.gmra.mxu3 %v5212_v46  ;;  %v1741_v35 = vrot.slane %v1739_v44, 4 }
 0x14a   : > { %v1318_v7 = vpop.f32.mrf.mxu2  ;;  %v1234_v50 = vpop.f32.mrf.mxu1 }
 0x14b   : > { %2221 = vmatmul.bf16.gmra.mxu0 %v5228_v54  ;;  %v1319_v45 = vadd.f32 %v1318_v7, %v1230_v30  ;;  %v1235_v61 = vadd.f32 %v1234_v50, %v5158_v59  ;;  %v1754_v50 = vrot.slane %v1752_v4, 4 }
 0x14c   : > { %v2093_v49 = vpop.f32.mrf.mxu3 }
 0x14d   : > { %v2183_v23 = vadd.f32 %v2182_v10, %v2093_v49  ;;  %1273 = vmatmul.bf16.gmra.mxu1 %v4299_v3  ;;  %v1744_v10 = vrot.slane %v1742_v29, 5  ;;  %v4086_v29 = vld [vmem:[#allocation6 + $0x148] sm:$0xff] }
 0x14e   : > { %2972 = vmatpush.bf16.msra.mxu3 %v4086_v29 }
 0x14f   : > { %v5241_v30 = vadd.f32 %v2183_v23, %v1319_v45  ;;  %v1745_v49 = vor.u32 %v1744_v10, %v1741_v35  ;;  %v4300_v45 = vld [vmem:[#allocation2 + $0x84] sm:$0xff]  ;;  %v1755_v23 = vor.u32 %v1754_v50, %v1750_v34  ;;  %v1432_v35 = vld [vmem:[#allocation2 + $0x9c] sm:$0xf] }
 0x150   : > { %v2184_v59 = vpop.f32.mrf.mxu0 }
 0x151   : > { %v1756_v31 = vrot.slane %v1755_v23, 4 }
 0x152   : > { %v1320_v37 = vpop.f32.mrf.mxu2  ;;  %v1236_v22 = vpop.f32.mrf.mxu1 }
 0x153   : > { %v1321_v3 = vadd.f32 %v1320_v37, %v1232_v26  ;;  %v1237_v7 = vadd.f32 %v1236_v22, %v5171_v41  ;;  %v773_v26 = vld [vmem:[#allocation2 + $0xb0] sm:$0x1]  ;;  %v4078_v41 = vld [vmem:[#allocation6 + $0x108] sm:$0xff]  ;;  %v1760_v22 = vrot.slane %v1758_v39, 5 }
 0x154   : > { %v2095_v15 = vpop.f32.mrf.mxu3  ;;  %v774_v9 = vsel %vm5012_vm7, %v589_v16, %v773_v26  ;;  %2883 = vmatpush.bf16.msra.mxu2 %v4078_v41  ;;  %v1763_v16 = vshrl.u32 %v1432_v35, 16  ;;  %v4094_v26 = vld [vmem:[#allocation8 + $0x88] sm:$0xff] }
 0x155   : > { %v2185_v48 = vadd.f32 %v2184_v59, %v2095_v15  ;;  %v1746_v59 = vrot.slane %v1745_v49, 4  ;;  %775 = vst [vmem:[#allocation2 + $0xb0] sm:$0x1] %v774_v9  ;;  %v4070_v15 = vld [vmem:[#allocation8 + $0x48] sm:$0xff]  ;;  %3162 = vmatpush.bf16.msra.mxu0 %v4094_v26 }
 0x156   : > { %2364 = vmatpush.bf16.msra.mxu1 %v4070_v15  ;;  %v1765_v9 = vrot.slane %v1763_v16, 4 }
 0x157   : > { %1362 = vmatmul.bf16.gmra.mxu2 %v4300_v45  ;;  %v5247_v28 = vadd.f32 %v2185_v48, %v1321_v3  ;;  %v1433_v3 = vld [vmem:[#allocation2 + $0xa0] sm:$0xf]  ;;  %v1751_v51 = vsel %vm5037_vm10, %v1746_v59, %v1750_v34  ;;  %v1766_v48 = vshll.u32 %v1432_v35, 16 }
 0x158   : > { %v2187_v44 = vpop.f32.mrf.mxu0  ;;  %v1772_v49 = vshll.u32 %v1433_v3, 16  ;;  %v1906_v29 = vunpack.c.l.b16 %v1751_v51 }
 0x159   : > { %5703 = vst [vmem:[#allocation23_spill] sm:$0xff] %v5247_v28  ;;  %2137 = vmatmul.bf16.gmra.mxu3 %v5228_v54 }
 0x15a   : > { %v1323_v58 = vpop.f32.mrf.mxu2  ;;  %v1239_v4 = vpop.f32.mrf.mxu1  ;;  %v1774_v59 = vrot.slane %v1772_v49, 5 }
 0x15b   : > { %2226 = vmatmul.bf16.gmra.mxu0 %v5245_v2  ;;  %v1324_v37 = vadd.f32 %v1323_v58, %v1235_v61  ;;  %v1240_v19 = vadd.f32 %v1239_v4, %v5187_v24  ;;  %v1761_v61 = vsel %vm5037_vm10, %v1756_v31, %v1760_v22  ;;  %v1776_v24 = vshrl.u32 %v1433_v3, 16  ;;  %v1434_v22 = vld [vmem:[#allocation2 + $0xa4] sm:$0x1] }
 0x15c   : > { %v2098_v10 = vpop.f32.mrf.mxu3  ;;  %v1768_v58 = vrot.slane %v1766_v48, 5 }
 0x15d   : > { %v2188_v50 = vadd.f32 %v2187_v44, %v2098_v10  ;;  %1278 = vmatmul.bf16.gmra.mxu1 %v4300_v45  ;;  %v1907_v44 = vunpack.c.l.b16 %v1761_v61  ;;  %v1778_v35 = vrot.slane %v1776_v24, 4  ;;  %v606_v10 = vrot.slane %v4882_v47, 4 }
 0x15e   : > { %v1769_v15 = vor.u32 %v1768_v58, %v1765_v9  ;;  %v1782_v61 = vshll.u32 %v1434_v22, 16  ;;  %v1436_v9 = vld [vmem:[#allocation2 + $0xac] sm:$0xf] }
 0x15f   : > { %v5258_v23 = vadd.f32 %v2188_v50, %v1324_v37  ;;  %v5262_v3 = vpack.c.b16 %v1907_v44, %v1906_v29  ;;  %v4301_v50 = vld [vmem:[#allocation2 + $0x90] sm:$0xff]  ;;  %v1779_v51 = vor.u32 %v1778_v35, %v1774_v59 }
 0x160   : > { %v2189_v39 = vpop.f32.mrf.mxu0 }
 0x161   : > { %5704 = vst [vmem:[#allocation24_spill] sm:$0xff] %v5258_v23  ;;  %v1780_v26 = vrot.slane %v1779_v51, 4 }
 0x162   : > { %v1325_v41 = vpop.f32.mrf.mxu2  ;;  %v1241_v45 = vpop.f32.mrf.mxu1  ;;  %5705 = vst [vmem:[#allocation25_spill] sm:$0xff] %v5262_v3 }
 0x163   : > { %v1326_v34 = vadd.f32 %v1325_v41, %v1237_v7  ;;  %v1242_v4 = vadd.f32 %v1241_v45, %v5201_v13  ;;  %v780_v7 = vld [vmem:[#allocation2 + $0xbc] sm:$0x1]  ;;  %v1784_v41 = vrot.slane %v1782_v61, 5  ;;  %v1435_v45 = vld [vmem:[#allocation2 + $0xa8] sm:$0xf] }
 0x164   : > { %v2100_v31 = vpop.f32.mrf.mxu3  ;;  %v781_v13 = vsel %vm5012_vm7, %v606_v10, %v780_v7  ;;  %v1787_v22 = vshrl.u32 %v1435_v45, 16  ;;  %v1790_v10 = vshll.u32 %v1435_v45, 16 }
 0x165   : > { %v2190_v37 = vadd.f32 %v2189_v39, %v2100_v31  ;;  %782 = vst [vmem:[#allocation2 + $0xbc] sm:$0x1] %v781_v13  ;;  %v1770_v39 = vrot.slane %v1769_v15, 4 }
 0x166   : > { %v1789_v13 = vrot.slane %v1787_v22, 4 }
 0x167   : > { %1367 = vmatmul.bf16.gmra.mxu2 %v4301_v50  ;;  %v5264_v16 = vadd.f32 %v2190_v37, %v1326_v34  ;;  %v1775_v58 = vsel %vm5037_vm10, %v1770_v39, %v1774_v59  ;;  %v1785_v34 = vsel %vm5037_vm10, %v1780_v26, %v1784_v41  ;;  %v1800_v37 = vshrl.u32 %v1436_v9, 16  ;;  %v4302_v41 = vld [vmem:[#allocation2 + $0x9c] sm:$0xff] }
 0x168   : > { %v2192_v48 = vpop.f32.mrf.mxu0  ;;  %v623_v39 = vrot.slane %v4947_v1, 4 }
 0x169   : > { %5706 = vst [vmem:[#allocation26_spill] sm:$0xff] %v5264_v16  ;;  %2142 = vmatmul.bf16.gmra.mxu3 %v5245_v2  ;;  %v1802_v59 = vrot.slane %v1800_v37, 4 }
 0x16a   : > { %v1328_v49 = vpop.f32.mrf.mxu2  ;;  %v1244_v24 = vpop.f32.mrf.mxu1 }
 0x16b   : > { %2231 = vmatmul.bf16.gmra.mxu0 %v5262_v3  ;;  %v1329_v47 = vadd.f32 %v1328_v49, %v1240_v19  ;;  %v1796_v19 = vshll.u32 %v1436_v9, 16  ;;  %v1792_v49 = vrot.slane %v1790_v10, 5  ;;  %v1245_v22 = vadd.f32 %v1244_v24, %v5082_v5  ;;  %v4077_v10 = vld [vmem:[#allocation6 + $0x100] sm:$0xff] }
 0x16c   : > { %v2103_v29 = vpop.f32.mrf.mxu3  ;;  %2884 = vmatpush.bf16.msra.mxu2 %v4077_v10 }
 0x16d   : > { %v2193_v44 = vadd.f32 %v2192_v48, %v2103_v29  ;;  %1283 = vmatmul.bf16.gmra.mxu1 %v4301_v50  ;;  %v1908_v48 = vunpack.c.l.b16 %v1775_v58  ;;  %v1909_v50 = vunpack.c.l.b16 %v1785_v34  ;;  %v1798_v29 = vrot.slane %v1796_v19, 5  ;;  %v787_v34 = vld [vmem:[#allocation2 + $0xc8] sm:$0x1]  ;;  %v4085_v19 = vld [vmem:[#allocation6 + $0x140] sm:$0xff] }
 0x16e   : > { %v788_v1 = vsel %vm5012_vm7, %v623_v39, %v787_v34  ;;  %2973 = vmatpush.bf16.msra.mxu3 %v4085_v19 }
 0x16f   : > { %v5274_v35 = vadd.f32 %v2193_v44, %v1329_v47  ;;  %v1437_v47 = vld [vmem:[#allocation2 + $0xb0] sm:$0x1]  ;;  %v5277_v44 = vpack.c.b16 %v1909_v50, %v1908_v48  ;;  %789 = vst [vmem:[#allocation2 + $0xc8] sm:$0x1] %v788_v1  ;;  %v1439_v48 = vld [vmem:[#allocation2 + $0xb8] sm:$0xf] }
 0x170   : > { %v2194_v31 = vpop.f32.mrf.mxu0  ;;  %v1806_v58 = vshll.u32 %v1437_v47, 16  ;;  %v1820_v39 = vshll.u32 %v1439_v48, 16 }
 0x171   : > { %5707 = vst [vmem:[#allocation27_spill] sm:$0xff] %v5274_v35  ;;  %v1793_v35 = vor.u32 %v1792_v49, %v1789_v13  ;;  %v4069_v49 = vld [vmem:[#allocation8 + $0x40] sm:$0xff] }
 0x172   : > { %v1330_v15 = vpop.f32.mrf.mxu2  ;;  %v1246_v51 = vpop.f32.mrf.mxu1  ;;  %5708 = vst [vmem:[#allocation28_spill] sm:$0xff] %v5277_v44  ;;  %v1808_v5 = vrot.slane %v1806_v58, 5  ;;  %2365 = vmatpush.bf16.msra.mxu1 %v4069_v49  ;;  %v1822_v1 = vrot.slane %v1820_v39, 5 }
 0x173   : > { %v1331_v61 = vadd.f32 %v1330_v15, %v1242_v4  ;;  %v1803_v4 = vor.u32 %v1802_v59, %v1798_v29  ;;  %v1247_v58 = vadd.f32 %v1246_v51, %v5096_v32 }
 0x174   : > { %v2105_v7 = vpop.f32.mrf.mxu3 }
 0x175   : > { %v2195_v26 = vadd.f32 %v2194_v31, %v2105_v7  ;;  %v1794_v7 = vrot.slane %v1793_v35, 4  ;;  %v1804_v13 = vrot.slane %v1803_v4, 4  ;;  %v4093_v4 = vld [vmem:[#allocation8 + $0x80] sm:$0xff] }
 0x176   : > { %3163 = vmatpush.bf16.msra.mxu0 %v4093_v4 }
 0x177   : > { %1372 = vmatmul.bf16.gmra.mxu2 %v4302_v41  ;;  %v5279_v45 = vadd.f32 %v2195_v26, %v1331_v61  ;;  %v1438_v61 = vld [vmem:[#allocation2 + $0xb4] sm:$0xf]  ;;  %v1824_v26 = vshrl.u32 %v1439_v48, 16  ;;  %v1809_v35 = vsel %vm5037_vm10, %v1804_v13, %v1808_v5  ;;  %v4303_v13 = vld [vmem:[#allocation2 + $0xa8] sm:$0xff] }
 0x178   : > { %v2197_v9 = vpop.f32.mrf.mxu0  ;;  %v1811_v59 = vshrl.u32 %v1438_v61, 16  ;;  %v1814_v62 = vshll.u32 %v1438_v61, 16  ;;  %v1911_v48 = vunpack.c.l.b16 %v1809_v35 }
 0x179   : > { %5709 = vst [vmem:[#allocation29_spill] sm:$0xff] %v5279_v45  ;;  %2147 = vmatmul.bf16.gmra.mxu3 %v5262_v3 }
 0x17a   : > { %v1333_v31 = vpop.f32.mrf.mxu2  ;;  %v1249_v37 = vpop.f32.mrf.mxu1  ;;  %v1813_v10 = vrot.slane %v1811_v59, 4  ;;  %v1816_v19 = vrot.slane %v1814_v62, 5  ;;  %v4304_v62 = vld [vmem:[#allocation2 + $0x4] sm:$0xf] }
 0x17b   : > { %2236 = vmatmul.bf16.gmra.mxu0 %v5277_v44  ;;  %v1334_v15 = vadd.f32 %v1333_v31, %v1245_v22  ;;  %v1799_v22 = vsel %vm5037_vm10, %v1794_v7, %v1798_v29  ;;  %v1826_v31 = vrot.slane %v1824_v26, 4  ;;  %v1250_v59 = vadd.f32 %v1249_v37, %v5109_v17  ;;  %v4308_v17 = vld [vmem:[#allocation2 + $0x14] sm:$0x1] }
 0x17c   : > { %v2108_v50 = vpop.f32.mrf.mxu3  ;;  %v1817_v29 = vor.u32 %v1816_v19, %v1813_v10  ;;  %v2556_v39 = vrot.slane %v4304_v62, 5  ;;  %v4305_v10 = vld [vmem:[#allocation2 + $0x10] sm:$0xf] }
 0x17d   : > { %v2198_v24 = vadd.f32 %v2197_v9, %v2108_v50  ;;  %1288 = vmatmul.bf16.gmra.mxu1 %v4302_v41  ;;  %v1440_v50 = vld [vmem:[#allocation2 + $0xbc] sm:$0x1]  ;;  %v1827_v7 = vor.u32 %v1826_v31, %v1822_v1  ;;  %v2563_v19 = vrot.slane %v4305_v10, 5 }
 0x17e   : > { %v5302_v31 = vld [vmem:[#allocation2 + $0x1c] sm:$0xf] }
 0x17f   : > { %v5286_v47 = vadd.f32 %v2198_v24, %v1334_v15  ;;  %v1910_v15 = vunpack.c.l.b16 %v1799_v22  ;;  %v1828_v35 = vrot.slane %v1827_v7, 4  ;;  %v2565_v10 = vrot.slane %v2563_v19, 4 }
 0x180   : > { %v2199_v34 = vpop.f32.mrf.mxu0 }
 0x181   : > { %5710 = vst [vmem:[#allocation30_spill] sm:$0xff] %v5286_v47  ;;  %v1830_v47 = vshll.u32 %v1440_v50, 16  ;;  %v5293_v5 = vpack.c.b16 %v1911_v48, %v1910_v15  ;;  %v2558_v50 = vrot.slane %v2556_v39, 4 }
 0x182   : > { %v1335_v9 = vpop.f32.mrf.mxu2  ;;  %v1251_v41 = vpop.f32.mrf.mxu1 }
 0x183   : > { %v1336_v61 = vadd.f32 %v1335_v9, %v1247_v58  ;;  %v1832_v4 = vrot.slane %v1830_v47, 5  ;;  %v1441_v58 = vld [vmem:[#allocation2 + $0xc0] sm:$0xf]  ;;  %v1252_v16 = vadd.f32 %v1251_v41, %v5123_v55  ;;  %v2481_v55 = vld [vmem:[#allocation2 + $0x18] sm:$0xe] }
 0x184   : > { %v2110_v24 = vpop.f32.mrf.mxu3  ;;  %v1835_v48 = vshrl.u32 %v1441_v58, 16  ;;  %v1838_v7 = vshll.u32 %v1441_v58, 16  ;;  %v3891_v3 = vrot.slane %v2481_v55, 9 }
 0x185   : > { %v2200_v49 = vadd.f32 %v2199_v34, %v2110_v24  ;;  %v1818_v34 = vrot.slane %v1817_v29, 4  ;;  %v4307_v24 = vld [vmem:[#allocation2 + $0x8] sm:$0x1]  ;;  %v1833_v29 = vsel %vm5037_vm10, %v1828_v35, %v1832_v4  ;;  %v2479_v35 = vld [vmem:[#allocation2] sm:$0xe] }
 0x186   : > { %v2480_v4 = vld [vmem:[#allocation2 + $0xc] sm:$0xe] }
 0x187   : > { %1377 = vmatmul.bf16.gmra.mxu2 %v4303_v13  ;;  %v5295_v32 = vadd.f32 %v2200_v49, %v1336_v61  ;;  %v1442_v61 = vld [vmem:[#allocation2 + $0xc4] sm:$0xf]  ;;  %v2559_v49 = vrot.slane %v4307_v24, 5  ;;  %v1823_v47 = vsel %vm5037_vm10, %v1818_v34, %v1822_v1  ;;  %v1913_v34 = vunpack.c.l.b16 %v1833_v29 }
 0x188   : > { %v2202_v51 = vpop.f32.mrf.mxu0  ;;  %v1848_v62 = vshrl.u32 %v1442_v61, 16  ;;  %v1912_v1 = vunpack.c.l.b16 %v1823_v47 }
 0x189   : > { %5711 = vst [vmem:[#allocation31_spill] sm:$0xff] %v5295_v32  ;;  %2152 = vmatmul.bf16.gmra.mxu3 %v5277_v44  ;;  %v2566_v32 = vrot.slane %v4308_v17, 5  ;;  %v1837_v44 = vrot.slane %v1835_v48, 4  ;;  %v2560_v47 = vsel %vm5314_vm13, %v2558_v50, %v2559_v49 }
 0x18a   : > { %v1338_v26 = vpop.f32.mrf.mxu2  ;;  %v5299_v22 = vpop.f32.mrf.mxu1 }
 0x18b   : > { %2241 = vmatmul.bf16.gmra.mxu0 %v5293_v5  ;;  %v1339_v9 = vadd.f32 %v1338_v26, %v1250_v59  ;;  %v1844_v59 = vshll.u32 %v1442_v61, 16 }
 0x18c   : > { %v2113_v37 = vpop.f32.mrf.mxu3 }
 0x18d   : > { %v2203_v15 = vadd.f32 %v2202_v51, %v2113_v37  ;;  %1293 = vmatmul.bf16.gmra.mxu1 %v4303_v13  ;;  %v5713_v13 = vrot.slane %v5302_v31, 5  ;;  %v4309_v37 = vld [vmem:[#allocation2 + $0x20] sm:$0x1]  ;;  %v1846_v23 = vrot.slane %v1844_v59, 5  ;;  %v1443_v59 = vld [vmem:[#allocation2 + $0xc8] sm:$0x1] }
 0x18e   : > { %v2573_v45 = vrot.slane %v4309_v37, 5 }
 0x18f   : > { %v5309_v26 = vadd.f32 %v2203_v15, %v1339_v9  ;;  %v2572_v51 = vrot.slane %v5713_v13, 4  ;;  %v3889_v9 = vrot.slane %v2479_v35, 9  ;;  %v3890_v15 = vrot.slane %v2480_v4, 9 }
 0x190   : > { %v2204_v24 = vpop.f32.mrf.mxu0  ;;  %v1850_v13 = vrot.slane %v1848_v62, 4  ;;  %v2681_v35 = vunpack.c.l.b16 %v2560_v47 }
 0x191   : > { %5712 = vst [vmem:[#allocation32_spill] sm:$0xff] %v5309_v26  ;;  %v1840_v26 = vrot.slane %v1838_v7, 5  ;;  %v2557_v48 = vsel %vm5314_vm13, %v3889_v9, %v2556_v39  ;;  %v2564_v29 = vsel %vm5314_vm13, %v3890_v15, %v2563_v19  ;;  %v2574_v39 = vsel %vm5314_vm13, %v2572_v51, %v2573_v45  ;;  %v4310_v9 = vld [vmem:[#allocation2 + $0xb4] sm:$0xff] }
 0x192   : > { %v1340_v58 = vpop.f32.mrf.mxu2  ;;  %v1256_v61 = vpop.f32.mrf.mxu1  ;;  %v2680_v62 = vunpack.c.l.b16 %v2557_v48  ;;  %v2682_v4 = vunpack.c.l.b16 %v2564_v29  ;;  %v2685_v19 = vunpack.c.l.b16 %v2574_v39  ;;  %v1255_v45 = vadd.f32 %v5299_v22, %v5137_v11 }
 0x193   : > { %v1341_v17 = vadd.f32 %v1340_v58, %v1252_v16  ;;  %v2567_v16 = vsel %vm5314_vm13, %v2565_v10, %v2566_v32  ;;  %v5326_v58 = vpack.c.b16 %v1913_v34, %v1912_v1  ;;  %v1841_v50 = vor.u32 %v1840_v26, %v1837_v44 }
 0x194   : > { %v2115_v41 = vpop.f32.mrf.mxu3  ;;  %v2683_v28 = vunpack.c.l.b16 %v2567_v16  ;;  %v2712_v49 = vpack.c.b16 %v2681_v35, %v2680_v62  ;;  %v1851_v10 = vor.u32 %v1850_v13, %v1846_v23  ;;  %v5716_v1 = vrot.slane %v5302_v31, 5 }
 0x195   : > { %v2205_v7 = vadd.f32 %v2204_v24, %v2115_v41  ;;  %v1854_v24 = vshll.u32 %v1443_v59, 16  ;;  %v1842_v55 = vrot.slane %v1841_v50, 4  ;;  %v1257_v16 = vadd.f32 %v1256_v61, %v5150_v43 }
 0x196   : > { %v5332_v41 = vpack.c.b16 %v2683_v28, %v2682_v4  ;;  %v2571_v34 = vsel %vm5314_vm13, %v3891_v3, %v5716_v1  ;;  %v1852_v48 = vrot.slane %v1851_v10, 4 }
 0x197   : > { %1382 = vmatmul.bf16.gmra.mxu2 %v4310_v9  ;;  %v5330_v15 = vadd.f32 %v2205_v7, %v1341_v17  ;;  %v2684_v44 = vunpack.c.l.b16 %v2571_v34  ;;  %v1856_v31 = vrot.slane %v1854_v24, 5  ;;  %v1847_v11 = vsel %vm5037_vm10, %v1842_v55, %v1846_v23 }
 0x198   : > { %v2207_v32 = vpop.f32.mrf.mxu0  ;;  %v1946_v35 = vunpack.c.l.b16 %v1847_v11 }
 0x199   : > { %2157 = vmatmul.bf16.gmra.mxu3 %v5293_v5  ;;  %v5342_v13 = vpack.c.b16 %v2685_v19, %v2684_v44  ;;  %v1857_v22 = vsel %vm5037_vm10, %v1852_v48, %v1856_v31  ;;  %v4311_v19 = vld [vmem:[#allocation2 + $0xc0] sm:$0xff] }
 0x19a   : > { %v1343_v26 = vpop.f32.mrf.mxu2  ;;  %v1259_v51 = vpop.f32.mrf.mxu1  ;;  %v1947_v4 = vunpack.c.l.b16 %v1857_v22 }
 0x19b   : > { %2246 = vmatmul.bf16.gmra.mxu0 %v5326_v58  ;;  %v1344_v17 = vadd.f32 %v1343_v26, %v1255_v45  ;;  %v1260_v23 = vadd.f32 %v1259_v51, %v5165_v52 }
 0x19c   : > { %v2118_v28 = vpop.f32.mrf.mxu3 }
 0x19d   : > { %v2208_v47 = vadd.f32 %v2207_v32, %v2118_v28  ;;  %1298 = vmatmul.bf16.gmra.mxu1 %v4310_v9  ;;  %v5351_v9 = vpack.c.b16 %v1947_v4, %v1946_v35  ;;  %v4313_v35 = vld [vmem:[#allocation2 + $0x2c] sm:$0x1] }
 0x19f   : > { %v5344_v3 = vadd.f32 %v2208_v47, %v1344_v17  ;;  %v4312_v47 = vld [vmem:[#allocation2 + $0x28] sm:$0xf] }
 0x1a0   : > { %v2209_v29 = vpop.f32.mrf.mxu0 }
 0x1a2   : > { %v1345_v7 = vpop.f32.mrf.mxu2  ;;  %v1261_v59 = vpop.f32.mrf.mxu1 }
 0x1a3   : > { %v1346_v62 = vadd.f32 %v1345_v7, %v1257_v16  ;;  %v1262_v26 = vadd.f32 %v1261_v59, %v5179_v63 }
 0x1a4   : > { %v2120_v39 = vpop.f32.mrf.mxu3 }
 0x1a5   : > { %v2210_v50 = vadd.f32 %v2209_v29, %v2120_v39  ;;  %v2577_v29 = vrot.slane %v4312_v47, 5 }
 0x1a7   : > { %1387 = vmatmul.bf16.gmra.mxu2 %v4311_v19  ;;  %v5353_v32 = vadd.f32 %v2210_v50, %v1346_v62  ;;  %v2579_v62 = vrot.slane %v2577_v29, 4 }
 0x1a8   : > { %v2212_v10 = vpop.f32.mrf.mxu0 }
 0x1a9   : > { %2162 = vmatmul.bf16.gmra.mxu3 %v5326_v58 }
 0x1aa   : > { %v1348_v24 = vpop.f32.mrf.mxu2  ;;  %v1264_v43 = vpop.f32.mrf.mxu1 }
 0x1ab   : > { %2251 = vmatmul.bf16.gmra.mxu0 %v5351_v9  ;;  %v1349_v61 = vadd.f32 %v1348_v24, %v1260_v23  ;;  %v1265_v11 = vadd.f32 %v1264_v43, %v5107_v33 }
 0x1ac   : > { %v2123_v1 = vpop.f32.mrf.mxu3 }
 0x1ad   : > { %v2213_v34 = vadd.f32 %v2212_v10, %v2123_v1  ;;  %2366 = vmatmul.bf16.vlgmr.msra.gmra.mxu1 %v5058_v40  ;;  %v2482_v40 = vld [vmem:[#allocation2 + $0x24] sm:$0xe] }
 0x1ae   : > { %v3892_v59 = vrot.slane %v2482_v40, 9  ;;  %v4315_v40 = vld [vmem:[#allocation2 + $0x38] sm:$0x1] }
 0x1af   : > { %v5359_v45 = vadd.f32 %v2213_v34, %v1349_v61 }
 0x1b0   : > { %v2214_v44 = vpop.f32.mrf.mxu0  ;;  %v2578_v33 = vsel %vm5314_vm13, %v3892_v59, %v2577_v29 }
 0x1b1   : > { %v2686_v61 = vunpack.c.l.b16 %v2578_v33 }
 0x1b2   : > { %v1350_v17 = vpop.f32.mrf.mxu2  ;;  %v1266_v28 = vpop.f32.mrf.mxu1 }
 0x1b3   : > { %v1351_v55 = vadd.f32 %v1350_v17, %v1262_v26  ;;  %v1267_v10 = vadd.f32 %v1266_v28, %v5121_v18  ;;  %v2483_v18 = vld [vmem:[#allocation2 + $0x30] sm:$0xe] }
 0x1b4   : > { %v2125_v52 = vpop.f32.mrf.mxu3 }
 0x1b5   : > { %v2215_v51 = vadd.f32 %v2214_v44, %v2125_v52 }
 0x1b7   : > { %2885 = vmatmul.bf16.vlgmr.msra.gmra.mxu2 %v2712_v49  ;;  %v5362_v48 = vadd.f32 %v2215_v51, %v1351_v55  ;;  %v2580_v49 = vrot.slane %v4313_v35, 5  ;;  %v4314_v55 = vld [vmem:[#allocation2 + $0x34] sm:$0xf] }
 0x1b8   : > { %v2217_v31 = vpop.f32.mrf.mxu0  ;;  %v2584_v52 = vrot.slane %v4314_v55, 5 }
 0x1b9   : > { %2974 = vmatmul.bf16.vlgmr.msra.gmra.mxu3 %v5332_v41  ;;  %v2581_v19 = vsel %vm5314_vm13, %v2579_v62, %v2580_v49 }
 0x1ba   : > { %v1353_v22 = vpop.f32.mrf.mxu2  ;;  %v1269_v16 = vpop.f32.mrf.mxu1  ;;  %v2687_v1 = vunpack.c.l.b16 %v2581_v19 }
 0x1bb   : > { %3164 = vmatmul.bf16.vlgmr.msra.gmra.mxu0 %v5342_v13  ;;  %v1354_v63 = vadd.f32 %v1353_v22, %v1265_v11  ;;  %v1270_v51 = vadd.f32 %v1269_v16, %v5135_v21  ;;  %v3893_v11 = vrot.slane %v2483_v18, 9  ;;  %v2587_v22 = vrot.slane %v4315_v40, 5 }
 0x1bc   : > { %v2128_v7 = vpop.f32.mrf.mxu3 }
 0x1bd   : > { %v2218_v4 = vadd.f32 %v2217_v31, %v2128_v7  ;;  %2371 = vmatmul.bf16.gmra.mxu1 %v5070_v6  ;;  %v5376_v6 = vpack.c.b16 %v2687_v1, %v2686_v61  ;;  %v2585_v21 = vsel %vm5314_vm13, %v3893_v11, %v2584_v52  ;;  %v4316_v61 = vld [vmem:[#allocation2 + $0x40] sm:$0xf] }
 0x1be   : > { %v2591_v1 = vrot.slane %v4316_v61, 5 }
 0x1bf   : > { %v5368_v39 = vadd.f32 %v2218_v4, %v1354_v63 }
 0x1c0   : > { %v2219_v50 = vpop.f32.mrf.mxu0 }
 0x1c2   : > { %v1355_v23 = vpop.f32.mrf.mxu2  ;;  %v1271_v24 = vpop.f32.mrf.mxu1 }
 0x1c3   : > { %v1356_v43 = vadd.f32 %v1355_v23, %v1267_v10  ;;  %v1272_v62 = vadd.f32 %v1271_v24, %v5148_v42  ;;  %v2484_v42 = vld [vmem:[#allocation2 + $0x3c] sm:$0xe] }
 0x1c4   : > { %v2130_v34 = vpop.f32.mrf.mxu3 }
 0x1c5   : > { %v2220_v44 = vadd.f32 %v2219_v50, %v2130_v34  ;;  %v2688_v50 = vunpack.c.l.b16 %v2585_v21 }
 0x1c7   : > { %2890 = vmatmul.bf16.gmra.mxu2 %v5332_v41  ;;  %v5378_v26 = vadd.f32 %v2220_v44, %v1356_v43  ;;  %v2586_v41 = vrot.slane %v2584_v52, 4  ;;  %v3894_v52 = vrot.slane %v2484_v42, 9 }
 0x1c8   : > { %v2222_v17 = vpop.f32.mrf.mxu0 }
 0x1c9   : > { %2979 = vmatmul.bf16.gmra.mxu3 %v5342_v13  ;;  %v2588_v16 = vsel %vm5314_vm13, %v2586_v41, %v2587_v22 }
 0x1ca   : > { %v1358_v28 = vpop.f32.mrf.mxu2  ;;  %v1274_v31 = vpop.f32.mrf.mxu1  ;;  %v2689_v33 = vunpack.c.l.b16 %v2588_v16 }
 0x1cb   : > { %3169 = vmatmul.bf16.gmra.mxu0 %v5376_v6  ;;  %v1359_v47 = vadd.f32 %v1358_v28, %v1270_v51  ;;  %v1275_v34 = vadd.f32 %v1274_v31, %v5163_v20  ;;  %v4317_v51 = vld [vmem:[#allocation2 + $0x44] sm:$0x1]  ;;  %v2592_v20 = vsel %vm5314_vm13, %v3894_v52, %v2591_v1 }
 0x1cc   : > { %v2133_v29 = vpop.f32.mrf.mxu3  ;;  %v2594_v18 = vrot.slane %v4317_v51, 5 }
 0x1cd   : > { %v2223_v63 = vadd.f32 %v2222_v17, %v2133_v29  ;;  %2376 = vmatmul.bf16.gmra.mxu1 %v5085_v27  ;;  %v5392_v27 = vpack.c.b16 %v2689_v33, %v2688_v50 }
 0x1cf   : > { %v5384_v7 = vadd.f32 %v2223_v63, %v1359_v47  ;;  %v2690_v63 = vunpack.c.l.b16 %v2592_v20 }
 0x1d0   : > { %v2224_v59 = vpop.f32.mrf.mxu0 }
 0x1d2   : > { %v1360_v35 = vpop.f32.mrf.mxu2  ;;  %v1276_v49 = vpop.f32.mrf.mxu1 }
 0x1d3   : > { %v1361_v4 = vadd.f32 %v1360_v35, %v1272_v62  ;;  %v1277_v11 = vadd.f32 %v1276_v49, %v5177_v53  ;;  %v2485_v53 = vld [vmem:[#allocation2 + $0x48] sm:$0xe] }
 0x1d4   : > { %v2135_v19 = vpop.f32.mrf.mxu3  ;;  %v3895_v61 = vrot.slane %v2485_v53, 9 }
 0x1d5   : > { %v2225_v10 = vadd.f32 %v2224_v59, %v2135_v19 }
 0x1d7   : > { %2895 = vmatmul.bf16.gmra.mxu2 %v5342_v13  ;;  %v5394_v23 = vadd.f32 %v2225_v10, %v1361_v4  ;;  %v2593_v13 = vrot.slane %v2591_v1, 4  ;;  %v4318_v4 = vld [vmem:[#allocation2 + $0x4c] sm:$0xf]  ;;  %v4319_v1 = vld [vmem:[#allocation2 + $0x50] sm:$0x1] }
 0x1d8   : > { %v2227_v43 = vpop.f32.mrf.mxu0  ;;  %v2598_v50 = vrot.slane %v4318_v4, 5  ;;  %v4321_v4 = vld [vmem:[#allocation2 + $0x5c] sm:$0x1] }
 0x1d9   : > { %2984 = vmatmul.bf16.gmra.mxu3 %v5376_v6  ;;  %v2595_v31 = vsel %vm5314_vm13, %v2593_v13, %v2594_v18 }
 0x1da   : > { %v1363_v24 = vpop.f32.mrf.mxu2  ;;  %v1279_v44 = vpop.f32.mrf.mxu1  ;;  %v2691_v59 = vunpack.c.l.b16 %v2595_v31 }
 0x1db   : > { %3174 = vmatmul.bf16.gmra.mxu0 %v5392_v27  ;;  %v1364_v17 = vadd.f32 %v1363_v24, %v1275_v34  ;;  %v1280_v33 = vadd.f32 %v1279_v44, %v5192_v36  ;;  %v2601_v34 = vrot.slane %v4319_v1, 5  ;;  %v2599_v36 = vsel %vm5314_vm13, %v3895_v61, %v2598_v50 }
 0x1dc   : > { %v2138_v55 = vpop.f32.mrf.mxu3  ;;  %v2692_v18 = vunpack.c.l.b16 %v2599_v36 }
 0x1dd   : > { %v2228_v28 = vadd.f32 %v2227_v43, %v2138_v55  ;;  %2381 = vmatmul.bf16.gmra.mxu1 %v5100_v14  ;;  %v5408_v14 = vpack.c.b16 %v2691_v59, %v2690_v63 }
 0x1df   : > { %v5400_v47 = vadd.f32 %v2228_v28, %v1364_v17 }
 0x1e0   : > { %v2229_v29 = vpop.f32.mrf.mxu0 }
 0x1e2   : > { %v1365_v41 = vpop.f32.mrf.mxu2  ;;  %v1281_v40 = vpop.f32.mrf.mxu1 }
 0x1e3   : > { %v1366_v22 = vadd.f32 %v1365_v41, %v1277_v11  ;;  %v1282_v55 = vadd.f32 %v1281_v40, %v5205_v60  ;;  %v4320_v41 = vld [vmem:[#allocation2 + $0x58] sm:$0xf]  ;;  %v2486_v60 = vld [vmem:[#allocation2 + $0x54] sm:$0xe] }
 0x1e4   : > { %v2140_v21 = vpop.f32.mrf.mxu3 }
 0x1e5   : > { %v2230_v16 = vadd.f32 %v2229_v29, %v2140_v21 }
 0x1e7   : > { %2900 = vmatmul.bf16.gmra.mxu2 %v5376_v6  ;;  %v5410_v62 = vadd.f32 %v2230_v16, %v1366_v22  ;;  %v2600_v6 = vrot.slane %v2598_v50, 4  ;;  %v2605_v22 = vrot.slane %v4320_v41, 5  ;;  %v2608_v50 = vrot.slane %v4321_v4, 5 }
 0x1e8   : > { %v2232_v35 = vpop.f32.mrf.mxu0 }
 0x1e9   : > { %2989 = vmatmul.bf16.gmra.mxu3 %v5392_v27  ;;  %v2602_v44 = vsel %vm5314_vm13, %v2600_v6, %v2601_v34 }
 0x1ea   : > { %v1368_v49 = vpop.f32.mrf.mxu2  ;;  %v1284_v19 = vpop.f32.mrf.mxu1  ;;  %v2693_v28 = vunpack.c.l.b16 %v2602_v44 }
 0x1eb   : > { %3179 = vmatmul.bf16.gmra.mxu0 %v5408_v14  ;;  %v1369_v10 = vadd.f32 %v1368_v49, %v1280_v33  ;;  %v1285_v63 = vadd.f32 %v1284_v19, %v5112_v38 }
 0x1ec   : > { %v2143_v43 = vpop.f32.mrf.mxu3 }
 0x1ed   : > { %v2233_v42 = vadd.f32 %v2232_v35, %v2143_v43  ;;  %2386 = vmatmul.bf16.gmra.mxu1 %v5128_v8  ;;  %v5424_v8 = vpack.c.b16 %v2693_v28, %v2692_v18  ;;  %v3896_v35 = vrot.slane %v2486_v60, 9 }
 0x1ef   : > { %v5416_v24 = vadd.f32 %v2233_v42, %v1369_v10  ;;  %v2606_v38 = vsel %vm5314_vm13, %v3896_v35, %v2605_v22 }
 0x1f0   : > { %v2234_v17 = vpop.f32.mrf.mxu0  ;;  %v2694_v1 = vunpack.c.l.b16 %v2606_v38 }
 0x1f2   : > { %v1370_v52 = vpop.f32.mrf.mxu2  ;;  %v1286_v13 = vpop.f32.mrf.mxu1 }
 0x1f3   : > { %v1371_v51 = vadd.f32 %v1370_v52, %v1282_v55  ;;  %v1287_v10 = vadd.f32 %v1286_v13, %v5125_v0  ;;  %v4322_v55 = vld [vmem:[#allocation2 + $0x64] sm:$0xf]  ;;  %v2487_v0 = vld [vmem:[#allocation2 + $0x60] sm:$0xe] }
 0x1f4   : > { %v2145_v29 = vpop.f32.mrf.mxu3  ;;  %v2612_v52 = vrot.slane %v4322_v55, 5 }
 0x1f5   : > { %v2235_v20 = vadd.f32 %v2234_v17, %v2145_v29 }
 0x1f7   : > { %2905 = vmatmul.bf16.gmra.mxu2 %v5392_v27  ;;  %v5426_v31 = vadd.f32 %v2235_v20, %v1371_v51  ;;  %v2607_v27 = vrot.slane %v2605_v22, 4  ;;  %v3897_v20 = vrot.slane %v2487_v0, 9  ;;  %v4325_v0 = vld [vmem:[#allocation2 + $0x74] sm:$0x1] }
 0x1f8   : > { %v2237_v11 = vpop.f32.mrf.mxu0 }
 0x1f9   : > { %2994 = vmatmul.bf16.gmra.mxu3 %v5408_v14  ;;  %v2609_v19 = vsel %vm5314_vm13, %v2607_v27, %v2608_v50 }
 0x1fa   : > { %v1373_v40 = vpop.f32.mrf.mxu2  ;;  %v1289_v59 = vpop.f32.mrf.mxu1  ;;  %v2695_v34 = vunpack.c.l.b16 %v2609_v19 }
 0x1fb   : > { %3184 = vmatmul.bf16.gmra.mxu0 %v5424_v8  ;;  %v1374_v21 = vadd.f32 %v1373_v40, %v1285_v63  ;;  %v1290_v51 = vadd.f32 %v1289_v59, %v5140_v25  ;;  %v5717_v63 = vld [vmem:[#allocation19_spill] sm:$0xff]  ;;  %v2613_v25 = vsel %vm5314_vm13, %v3897_v20, %v2612_v52 }
 0x1fc   : > { %v2148_v16 = vpop.f32.mrf.mxu3  ;;  %v2696_v50 = vunpack.c.l.b16 %v2613_v25 }
 0x1fd   : > { %v2238_v33 = vadd.f32 %v2237_v11, %v2148_v16  ;;  %2391 = vmatmul.bf16.gmra.mxu1 %v5156_v57  ;;  %v5440_v57 = vpack.c.b16 %v2695_v34, %v2694_v1  ;;  %v4323_v11 = vld [vmem:[#allocation2 + $0x68] sm:$0x1] }
 0x1fe   : > { %v2615_v41 = vrot.slane %v4323_v11, 5  ;;  %v5719_v34 = vld [vmem:[#allocation17_spill] sm:$0xff]  ;;  %v5720_v11 = vld [vmem:[#allocation18_spill] sm:$0xff] }
 0x1ff   : > { %v5432_v53 = vadd.f32 %v2238_v33, %v1374_v21  ;;  %v5718_v21 = vld [vmem:[#allocation16_spill] sm:$0xff] }
 0x200   : > { %v2239_v49 = vpop.f32.mrf.mxu0 }
 0x202   : > { %v1375_v43 = vpop.f32.mrf.mxu2  ;;  %v1291_v61 = vpop.f32.mrf.mxu1 }
 0x203   : > { %v1376_v6 = vadd.f32 %v1375_v43, %v1287_v10  ;;  %v1292_v16 = vadd.f32 %v1291_v61, %v5718_v21  ;;  %v2488_v61 = vld [vmem:[#allocation2 + $0x6c] sm:$0xe] }
 0x204   : > { %v2150_v42 = vpop.f32.mrf.mxu3 }
 0x205   : > { %v2240_v17 = vadd.f32 %v2239_v49, %v2150_v42 }
 0x207   : > { %2910 = vmatmul.bf16.gmra.mxu2 %v5408_v14  ;;  %v5442_v36 = vadd.f32 %v2240_v17, %v1376_v6  ;;  %v2614_v14 = vrot.slane %v2612_v52, 4  ;;  %v4324_v6 = vld [vmem:[#allocation2 + $0x70] sm:$0xf] }
 0x208   : > { %v2242_v44 = vpop.f32.mrf.mxu0  ;;  %v2619_v1 = vrot.slane %v4324_v6, 5 }
 0x209   : > { %2999 = vmatmul.bf16.gmra.mxu3 %v5424_v8  ;;  %v2616_v59 = vsel %vm5314_vm13, %v2614_v14, %v2615_v41 }
 0x20a   : > { %v1378_v13 = vpop.f32.mrf.mxu2  ;;  %v1294_v18 = vpop.f32.mrf.mxu1  ;;  %v2697_v33 = vunpack.c.l.b16 %v2616_v59 }
 0x20b   : > { %3189 = vmatmul.bf16.gmra.mxu0 %v5440_v57  ;;  %v1379_v28 = vadd.f32 %v1378_v13, %v1290_v51  ;;  %v1295_v42 = vadd.f32 %v1294_v18, %v5719_v34  ;;  %v3898_v51 = vrot.slane %v2488_v61, 9  ;;  %v2622_v13 = vrot.slane %v4325_v0, 5  ;;  %v4327_v61 = vld [vmem:[#allocation2 + $0x80] sm:$0x1]  ;;  %v5722_v0 = vld [vmem:[#allocation21_spill] sm:$0xff] }
 0x20c   : > { %v2153_v29 = vpop.f32.mrf.mxu3  ;;  %v5456_v19 = vpack.c.b16 %v2697_v33, %v2696_v50  ;;  %v4326_v50 = vld [vmem:[#allocation2 + $0x7c] sm:$0xf] }
 0x20d   : > { %v2243_v22 = vadd.f32 %v2242_v44, %v2153_v29  ;;  %2396 = vmatmul.bf16.gmra.mxu1 %v5717_v63  ;;  %v2620_v18 = vsel %vm5314_vm13, %v3898_v51, %v2619_v1  ;;  %v2626_v33 = vrot.slane %v4326_v50, 5 }
 0x20e   : > { %v2698_v25 = vunpack.c.l.b16 %v2620_v18 }
 0x20f   : > { %v5448_v60 = vadd.f32 %v2243_v22, %v1379_v28 }
 0x210   : > { %v2244_v40 = vpop.f32.mrf.mxu0 }
 0x212   : > { %v1380_v35 = vpop.f32.mrf.mxu2  ;;  %v1296_v27 = vpop.f32.mrf.mxu1 }
 0x213   : > { %v1381_v4 = vadd.f32 %v1380_v35, %v1292_v16  ;;  %v1297_v41 = vadd.f32 %v1296_v27, %v5720_v11  ;;  %v2489_v27 = vld [vmem:[#allocation2 + $0x78] sm:$0xe] }
 0x214   : > { %v2155_v49 = vpop.f32.mrf.mxu3 }
 0x215   : > { %v2245_v38 = vadd.f32 %v2244_v40, %v2155_v49  ;;  %v5721_v49 = vld [vmem:[#allocation20_spill] sm:$0xff] }
 0x217   : > { %2915 = vmatmul.bf16.gmra.mxu2 %v5424_v8  ;;  %v5458_v10 = vadd.f32 %v2245_v38, %v1381_v4  ;;  %v2621_v8 = vrot.slane %v2619_v1, 4 }
 0x218   : > { %v2247_v43 = vpop.f32.mrf.mxu0 }
 0x219   : > { %3004 = vmatmul.bf16.gmra.mxu3 %v5440_v57  ;;  %v2623_v14 = vsel %vm5314_vm13, %v2621_v8, %v2622_v13 }
 0x21a   : > { %v1383_v17 = vpop.f32.mrf.mxu2  ;;  %v1299_v44 = vpop.f32.mrf.mxu1  ;;  %v2699_v59 = vunpack.c.l.b16 %v2623_v14 }
 0x21b   : > { %3194 = vmatmul.bf16.gmra.mxu0 %v5456_v19  ;;  %v1384_v55 = vadd.f32 %v1383_v17, %v1295_v42  ;;  %v1300_v38 = vadd.f32 %v1299_v44, %v5721_v49  ;;  %v3899_v42 = vrot.slane %v2489_v27, 9  ;;  %v2629_v17 = vrot.slane %v4327_v61, 5 }
 0x21c   : > { %v2158_v52 = vpop.f32.mrf.mxu3 }
 0x21d   : > { %v2248_v28 = vadd.f32 %v2247_v43, %v2158_v52  ;;  %2401 = vmatmul.bf16.gmra.mxu1 %v5212_v46  ;;  %v5472_v46 = vpack.c.b16 %v2699_v59, %v2698_v25  ;;  %v2627_v44 = vsel %vm5314_vm13, %v3899_v42, %v2626_v33  ;;  %v4328_v59 = vld [vmem:[#allocation2 + $0x88] sm:$0xf]  ;;  %v5723_v42 = vld [vmem:[#allocation22_spill] sm:$0xff] }
 0x21e   : > { %v2700_v14 = vunpack.c.l.b16 %v2627_v44 }
 0x21f   : > { %v5464_v29 = vadd.f32 %v2248_v28, %v1384_v55 }
 0x220   : > { %v2249_v20 = vpop.f32.mrf.mxu0 }
 0x222   : > { %v1385_v22 = vpop.f32.mrf.mxu2  ;;  %v1301_v63 = vpop.f32.mrf.mxu1 }
 0x223   : > { %v1386_v40 = vadd.f32 %v1385_v22, %v1297_v41  ;;  %v1302_v13 = vadd.f32 %v1301_v63, %v5722_v0 }
 0x224   : > { %v2160_v21 = vpop.f32.mrf.mxu3 }
 0x225   : > { %v2250_v16 = vadd.f32 %v2249_v20, %v2160_v21  ;;  %v2633_v21 = vrot.slane %v4328_v59, 5 }
 0x227   : > { %2920 = vmatmul.bf16.gmra.mxu2 %v5440_v57  ;;  %v5474_v35 = vadd.f32 %v2250_v16, %v1386_v40  ;;  %v2628_v57 = vrot.slane %v2626_v33, 4  ;;  %v2490_v16 = vld [vmem:[#allocation2 + $0x84] sm:$0xe]  ;;  %v2635_v49 = vrot.slane %v2633_v21, 4 }
 0x228   : > { %v2252_v4 = vpop.f32.mrf.mxu0  ;;  %v3900_v33 = vrot.slane %v2490_v16, 9 }
 0x229   : > { %3009 = vmatmul.bf16.gmra.mxu3 %v5456_v19  ;;  %v2630_v8 = vsel %vm5314_vm13, %v2628_v57, %v2629_v17 }
 0x22a   : > { %v1388_v43 = vpop.f32.mrf.mxu2  ;;  %v2367_v6 = vpop.f32.mrf.mxu1  ;;  %v2701_v11 = vunpack.c.l.b16 %v2630_v8 }
 0x22b   : > { %3199 = vmatmul.bf16.gmra.mxu0 %v5472_v46  ;;  %v1389_v1 = vadd.f32 %v1388_v43, %v1300_v38  ;;  %v4329_v38 = vld [vmem:[#allocation2 + $0x8c] sm:$0x1]  ;;  %v2447_v57 = vadd.f32 %v2367_v6, %v5723_v42 }
 0x22c   : > { %v2163_v34 = vpop.f32.mrf.mxu3  ;;  %v2636_v27 = vrot.slane %v4329_v38, 5 }
 0x22d   : > { %v2253_v55 = vadd.f32 %v2252_v4, %v2163_v34  ;;  %2406 = vmatmul.bf16.gmra.mxu1 %v5228_v54  ;;  %v5488_v54 = vpack.c.b16 %v2701_v11, %v2700_v14  ;;  %v4330_v11 = vld [vmem:[#allocation2 + $0x94] sm:$0xf] }
 0x22e   : > { %v2637_v34 = vsel %vm5314_vm13, %v2635_v49, %v2636_v27 }
 0x22f   : > { %v5480_v52 = vadd.f32 %v2253_v55, %v1389_v1  ;;  %v2634_v1 = vsel %vm5314_vm13, %v3900_v33, %v2633_v21  ;;  %v2703_v44 = vunpack.c.l.b16 %v2637_v34  ;;  %v4331_v33 = vld [vmem:[#allocation2 + $0x98] sm:$0x1] }
 0x230   : > { %v2254_v51 = vpop.f32.mrf.mxu0  ;;  %v2643_v49 = vrot.slane %v4331_v33, 5 }
 0x232   : > { %v1390_v28 = vpop.f32.mrf.mxu2  ;;  %v2369_v20 = vpop.f32.mrf.mxu1 }
 0x233   : > { %v1391_v18 = vadd.f32 %v1390_v28, %v1302_v13  ;;  %v2448_v0 = vadd.f32 %v2369_v20, %v5230_v56 }
 0x234   : > { %v2165_v41 = vpop.f32.mrf.mxu3 }
 0x235   : > { %v2255_v22 = vadd.f32 %v2254_v51, %v2165_v41  ;;  %v2702_v51 = vunpack.c.l.b16 %v2634_v1  ;;  %v2640_v41 = vrot.slane %v4330_v11, 5 }
 0x237   : > { %2925 = vmatmul.bf16.gmra.mxu2 %v5456_v19  ;;  %v5490_v40 = vadd.f32 %v2255_v22, %v1391_v18  ;;  %v5502_v18 = vpack.c.b16 %v2703_v44, %v2702_v51  ;;  %v2491_v22 = vld [vmem:[#allocation2 + $0x90] sm:$0xe] }
 0x238   : > { %v3165_v25 = vpop.f32.mrf.mxu0 }
 0x239   : > { %3014 = vmatmul.bf16.gmra.mxu3 %v5472_v46 }
 0x23a   : > { %v2886_v63 = vpop.f32.mrf.mxu2  ;;  %v2372_v4 = vpop.f32.mrf.mxu1 }
 0x23b   : > { %3204 = vmatmul.bf16.gmra.mxu0 %v5488_v54  ;;  %v2449_v27 = vadd.f32 %v2372_v4, %v5241_v30  ;;  %v5725_v4 = vld [vmem:[#allocation23_spill] sm:$0xff] }
 0x23c   : > { %v2975_v50 = vpop.f32.mrf.mxu3 }
 0x23d   : > { %2411 = vmatmul.bf16.gmra.mxu1 %v5245_v2  ;;  %v2976_v19 = vadd.f32 %v2975_v50, %v2886_v63  ;;  %v2642_v50 = vrot.slane %v2640_v41, 4 }
 0x23f   : > { %v3055_v55 = vadd.f32 %v2976_v19, %v2447_v57  ;;  %v2644_v57 = vsel %vm5314_vm13, %v2642_v50, %v2643_v49  ;;  %v4333_v49 = vld [vmem:[#allocation2 + $0xa4] sm:$0x1] }
 0x240   : > { %v3167_v43 = vpop.f32.mrf.mxu0 }
 0x241   : > { %v3245_v2 = vadd.f32 %v3165_v25, %v3055_v55 }
 0x242   : > { %v2888_v61 = vpop.f32.mrf.mxu2  ;;  %v2374_v17 = vpop.f32.mrf.mxu1 }
 0x243   : > { %v3378_v16 = vmul.f32 %v3245_v2, %v3245_v2 }
 0x244   : > { %v2977_v8 = vpop.f32.mrf.mxu3 }
 0x245   : > { %v2978_v13 = vadd.f32 %v2977_v8, %v2888_v61 }
 0x247   : > { %v3056_v28 = vadd.f32 %v2978_v13, %v2448_v0  ;;  %2930 = vmatmul.bf16.gmra.mxu2 %v5472_v46  ;;  %v3901_v46 = vrot.slane %v2491_v22, 9  ;;  %v2705_v13 = vunpack.c.l.b16 %v2644_v57 }
 0x248   : > { %v3170_v14 = vpop.f32.mrf.mxu0 }
 0x249   : > { %v3246_v6 = vadd.f32 %v3167_v43, %v3056_v28  ;;  %3019 = vmatmul.bf16.gmra.mxu3 %v5488_v54  ;;  %v5724_v43 = vld [vmem:[#allocation25_spill] sm:$0xff]  ;;  %v2641_v42 = vsel %vm5314_vm13, %v3901_v46, %v2640_v41  ;;  %v2450_v28 = vadd.f32 %v2374_v17, %v5725_v4 }
 0x24a   : > { %v2891_v59 = vpop.f32.mrf.mxu2  ;;  %v2377_v21 = vpop.f32.mrf.mxu1  ;;  %v2704_v0 = vunpack.c.l.b16 %v2641_v42 }
 0x24b   : > { %v4105_v63 = vpack.c.bf16 %v3246_v6, %v3245_v2  ;;  %v3341_v56 = vadd.f32 %v3246_v6, %v3245_v2  ;;  %v3379_v20 = vmul.f32 %v3246_v6, %v3246_v6  ;;  %3209 = vmatmul.bf16.gmra.mxu0 %v5502_v18 }
 0x24c   : > { %v2980_v25 = vpop.f32.mrf.mxu3  ;;  %v5519_v22 = vpack.c.b16 %v2705_v13, %v2704_v0 }
 0x24d   : > { %4106 = vst [vmem:[%s5508_s21] sm:$0xff] %v4105_v63   ;;  %v3410_v38 = vadd.f32 %v3379_v20, %v3378_v16  ;;  %v2981_v19 = vadd.f32 %v2980_v25, %v2891_v59  ;;  %2416 = vmatmul.bf16.gmra.mxu1 %v5724_v43  ;;  %v4332_v59 = vld [vmem:[#allocation2 + $0xa0] sm:$0xf]  ;;  %v2492_v63 = vld [vmem:[#allocation2 + $0x9c] sm:$0xe] }
 0x24e   : > { %v3902_v33 = vrot.slane %v2492_v63, 9 }
 0x24f   : > { %v3057_v1 = vadd.f32 %v2981_v19, %v2449_v27  ;;  %v5726_v19 = vld [vmem:[#allocation24_spill] sm:$0xff] }
 0x250   : > { %v3172_v34 = vpop.f32.mrf.mxu0  ;;  %v2451_v43 = vadd.f32 %v2377_v21, %v5726_v19 }
 0x251   : > { %v3247_v61 = vadd.f32 %v3170_v14, %v3057_v1  ;;  %v2647_v14 = vrot.slane %v4332_v59, 5 }
 0x252   : > { %v2893_v55 = vpop.f32.mrf.mxu2  ;;  %v2379_v51 = vpop.f32.mrf.mxu1 }
 0x253   : > { %v3342_v44 = vadd.f32 %v3341_v56, %v3247_v61  ;;  %v3380_v8 = vmul.f32 %v3247_v61, %v3247_v61 }
 0x254   : > { %v2982_v2 = vpop.f32.mrf.mxu3 }
 0x255   : > { %v3411_v30 = vadd.f32 %v3410_v38, %v3380_v8  ;;  %v2983_v11 = vadd.f32 %v2982_v2, %v2893_v55  ;;  %v2650_v38 = vrot.slane %v4333_v49, 5 }
 0x257   : > { %v3058_v6 = vadd.f32 %v2983_v11, %v2450_v28  ;;  %2935 = vmatmul.bf16.gmra.mxu2 %v5488_v54  ;;  %v2649_v54 = vrot.slane %v2647_v14, 4  ;;  %v5728_v11 = vld [vmem:[#allocation26_spill] sm:$0xff] }
 0x258   : > { %v3175_v41 = vpop.f32.mrf.mxu0 }
 0x259   : > { %v3248_v16 = vadd.f32 %v3172_v34, %v3058_v6  ;;  %3024 = vmatmul.bf16.gmra.mxu3 %v5502_v18  ;;  %v5727_v34 = vld [vmem:[#allocation28_spill] sm:$0xff]  ;;  %v2651_v55 = vsel %vm5314_vm13, %v2649_v54, %v2650_v38  ;;  %v2452_v6 = vadd.f32 %v2379_v51, %v5728_v11 }
 0x25a   : > { %v2896_v56 = vpop.f32.mrf.mxu2  ;;  %v2382_v20 = vpop.f32.mrf.mxu1 }
 0x25b   : > { %v4110_v25 = vpack.c.bf16 %v3248_v16, %v3247_v61  ;;  %v3343_v46 = vadd.f32 %v3342_v44, %v3248_v16  ;;  %v3381_v50 = vmul.f32 %v3248_v16, %v3248_v16  ;;  %3214 = vmatmul.bf16.gmra.mxu0 %v5519_v22  ;;  %v2648_v61 = vsel %vm5314_vm13, %v3902_v33, %v2647_v14 }
 0x25c   : > { %v2985_v17 = vpop.f32.mrf.mxu3  ;;  %v2706_v4 = vunpack.c.l.b16 %v2648_v61 }
 0x25d   : > { %4182 = vst [vmem:[%s5508_s21 + $0x8] sm:$0xff] %v4110_v25   ;;  %v3412_v27 = vadd.f32 %v3411_v30, %v3381_v50  ;;  %v2986_v1 = vadd.f32 %v2985_v17, %v2896_v56  ;;  %2421 = vmatmul.bf16.gmra.mxu1 %v5727_v34  ;;  %v2707_v30 = vunpack.c.l.b16 %v2651_v55  ;;  %v4334_v56 = vld [vmem:[#allocation2 + $0xac] sm:$0xf] }
 0x25f   : > { %v3059_v42 = vadd.f32 %v2986_v1, %v2451_v43  ;;  %v5532_v63 = vpack.c.b16 %v2707_v30, %v2706_v4  ;;  %v5729_v1 = vld [vmem:[#allocation27_spill] sm:$0xff] }
 0x260   : > { %v3177_v57 = vpop.f32.mrf.mxu0  ;;  %v2453_v34 = vadd.f32 %v2382_v20, %v5729_v1  ;;  %v5731_v1 = vld [vmem:[#allocation30_spill] sm:$0xff] }
 0x261   : > { %v3249_v44 = vadd.f32 %v3175_v41, %v3059_v42  ;;  %v2654_v41 = vrot.slane %v4334_v56, 5 }
 0x262   : > { %v2898_v8 = vpop.f32.mrf.mxu2  ;;  %v2384_v0 = vpop.f32.mrf.mxu1 }
 0x263   : > { %v3344_v13 = vadd.f32 %v3343_v46, %v3249_v44  ;;  %v3382_v2 = vmul.f32 %v3249_v44, %v3249_v44  ;;  %v2493_v46 = vld [vmem:[#allocation2 + $0xa8] sm:$0xe] }
 0x264   : > { %v2987_v28 = vpop.f32.mrf.mxu3  ;;  %v3903_v38 = vrot.slane %v2493_v46, 9 }
 0x265   : > { %v3413_v21 = vadd.f32 %v3412_v27, %v3382_v2  ;;  %v2988_v59 = vadd.f32 %v2987_v28, %v2898_v8  ;;  %v4335_v27 = vld [vmem:[#allocation2 + $0xb0] sm:$0x1] }
 0x266   : > { %v2657_v19 = vrot.slane %v4335_v27, 5  ;;  %v2655_v55 = vsel %vm5314_vm13, %v3903_v38, %v2654_v41  ;;  %v4337_v27 = vld [vmem:[#allocation2 + $0xbc] sm:$0x1] }
 0x267   : > { %v3060_v16 = vadd.f32 %v2988_v59, %v2452_v6  ;;  %2940 = vmatmul.bf16.gmra.mxu2 %v5502_v18  ;;  %v2656_v18 = vrot.slane %v2654_v41, 4  ;;  %v2708_v28 = vunpack.c.l.b16 %v2655_v55  ;;  %v5730_v6 = vld [vmem:[#allocation29_spill] sm:$0xff]  ;;  %v5554_v55 = vld [vmem:[#allocation2 + $0xd0] sm:$0xf] }
 0x268   : > { %v3180_v14 = vpop.f32.mrf.mxu0  ;;  %v2454_v59 = vadd.f32 %v2384_v0, %v5730_v6  ;;  %v2675_v12 = vrot.slane %v5554_v55, 5 }
 0x269   : > { %v3250_v25 = vadd.f32 %v3177_v57, %v3060_v16  ;;  %3029 = vmatmul.bf16.gmra.mxu3 %v5519_v22 }
 0x26a   : > { %v2901_v50 = vpop.f32.mrf.mxu2  ;;  %v2387_v17 = vpop.f32.mrf.mxu1 }
 0x26b   : > { %v4115_v33 = vpack.c.bf16 %v3250_v25, %v3249_v44  ;;  %v3345_v54 = vadd.f32 %v3344_v13, %v3250_v25  ;;  %v3383_v49 = vmul.f32 %v3250_v25, %v3250_v25  ;;  %3219 = vmatmul.bf16.gmra.mxu0 %v5532_v63  ;;  %v2658_v44 = vsel %vm5314_vm13, %v2656_v18, %v2657_v19  ;;  %v4336_v25 = vld [vmem:[#allocation2 + $0xb8] sm:$0xf] }
 0x26c   : > { %v2990_v51 = vpop.f32.mrf.mxu3  ;;  %v2664_v19 = vrot.slane %v4337_v27, 5  ;;  %v4338_v27 = vld [vmem:[#allocation2 + $0xc4] sm:$0xf] }
 0x26d   : > { %4183 = vst [vmem:[%s5508_s21 + $0x10] sm:$0xff] %v4115_v33   ;;  %v3414_v43 = vadd.f32 %v3413_v21, %v3383_v49  ;;  %v2991_v42 = vadd.f32 %v2990_v51, %v2901_v50  ;;  %2426 = vmatmul.bf16.gmra.mxu1 %v5293_v5  ;;  %v2709_v21 = vunpack.c.l.b16 %v2658_v44  ;;  %v2494_v50 = vld [vmem:[#allocation2 + $0xb4] sm:$0xe] }
 0x26f   : > { %v3061_v57 = vadd.f32 %v2991_v42, %v2453_v34  ;;  %v5545_v56 = vpack.c.b16 %v2709_v21, %v2708_v28  ;;  %v2455_v34 = vadd.f32 %v2387_v17, %v5731_v1  ;;  %v1868_v17 = vshll.u32 %v5554_v55, 16 }
 0x270   : > { %v3182_v61 = vpop.f32.mrf.mxu0 }
 0x271   : > { %v3251_v8 = vadd.f32 %v3180_v14, %v3061_v57  ;;  %v2661_v14 = vrot.slane %v4336_v25, 5 }
 0x272   : > { %v2903_v13 = vpop.f32.mrf.mxu2  ;;  %v2389_v2 = vpop.f32.mrf.mxu1 }
 0x273   : > { %v3346_v4 = vadd.f32 %v3345_v54, %v3251_v8  ;;  %v3384_v30 = vmul.f32 %v3251_v8, %v3251_v8  ;;  %v2663_v18 = vrot.slane %v2661_v14, 4 }
 0x274   : > { %v2992_v11 = vpop.f32.mrf.mxu3 }
 0x275   : > { %v3415_v20 = vadd.f32 %v3414_v43, %v3384_v30  ;;  %v2993_v5 = vadd.f32 %v2992_v11, %v2903_v13  ;;  %v2665_v13 = vsel %vm5314_vm13, %v2663_v18, %v2664_v19  ;;  %v5566_v18 = vld [vmem:[#allocation2 + $0xd4] sm:$0x1]  ;;  %v2668_v19 = vrot.slane %v4338_v27, 5 }
 0x277   : > { %v3062_v16 = vadd.f32 %v2993_v5, %v2454_v59  ;;  %2945 = vmatmul.bf16.gmra.mxu2 %v5519_v22  ;;  %v3904_v22 = vrot.slane %v2494_v50, 9  ;;  %v2711_v5 = vunpack.c.l.b16 %v2665_v13 }
 0x278   : > { %v3185_v41 = vpop.f32.mrf.mxu0 }
 0x279   : > { %v3252_v46 = vadd.f32 %v3182_v61, %v3062_v16  ;;  %3034 = vmatmul.bf16.gmra.mxu3 %v5532_v63  ;;  %v1444_v61 = vld [vmem:[#allocation2 + $0xcc] sm:$0xf] }
 0x27a   : > { %v2906_v33 = vpop.f32.mrf.mxu2  ;;  %v5548_v54 = vpop.f32.mrf.mxu1  ;;  %v1859_v21 = vshrl.u32 %v1444_v61, 16  ;;  %v1862_v11 = vshll.u32 %v1444_v61, 16  ;;  %v1878_v61 = vshll.u32 %v5566_v18, 16 }
 0x27b   : > { %v4120_v49 = vpack.c.bf16 %v3252_v46, %v3251_v8  ;;  %v3347_v51 = vadd.f32 %v3346_v4, %v3252_v46  ;;  %v3385_v0 = vmul.f32 %v3252_v46, %v3252_v46  ;;  %3224 = vmatmul.bf16.gmra.mxu0 %v5545_v56  ;;  %v2662_v8 = vsel %vm5314_vm13, %v3904_v22, %v2661_v14  ;;  %v5732_v46 = vld [vmem:[#allocation31_spill] sm:$0xff] }
 0x27c   : > { %v2995_v38 = vpop.f32.mrf.mxu3  ;;  %v2710_v59 = vunpack.c.l.b16 %v2662_v8  ;;  %v2456_v14 = vadd.f32 %v2389_v2, %v5732_v46  ;;  %v2495_v2 = vld [vmem:[#allocation2 + $0xc0] sm:$0xe] }
 0x27d   : > { %4184 = vst [vmem:[%s5508_s21 + $0x18] sm:$0xff] %v4120_v49   ;;  %v3416_v43 = vadd.f32 %v3415_v20, %v3385_v0  ;;  %v2996_v42 = vadd.f32 %v2995_v38, %v2906_v33  ;;  %2431 = vmatmul.bf16.gmra.mxu1 %v5326_v58  ;;  %v1872_v58 = vshrl.u32 %v5554_v55, 16  ;;  %v1861_v33 = vrot.slane %v1859_v21, 4 }
 0x27e   : > { %v1864_v49 = vrot.slane %v1862_v11, 5  ;;  %v5564_v22 = vpack.c.b16 %v2711_v5, %v2710_v59  ;;  %v3905_v21 = vrot.slane %v2495_v2, 9  ;;  %v2670_v11 = vrot.slane %v2668_v19, 4 }
 0x27f   : > { %v3063_v57 = vadd.f32 %v2996_v42, %v2455_v34  ;;  %v1874_v0 = vrot.slane %v1872_v58, 4 }
 0x280   : > { %v3187_v44 = vpop.f32.mrf.mxu0  ;;  %v1865_v42 = vor.u32 %v1864_v49, %v1861_v33 }
 0x281   : > { %v3253_v4 = vadd.f32 %v3185_v41, %v3063_v57  ;;  %v1870_v41 = vrot.slane %v1868_v17, 5  ;;  %v4339_v17 = vld [vmem:[#allocation2 + $0xc8] sm:$0x1] }
 0x282   : > { %v2908_v30 = vpop.f32.mrf.mxu2  ;;  %v2394_v28 = vpop.f32.mrf.mxu1 }
 0x283   : > { %v3348_v20 = vadd.f32 %v3347_v51, %v3253_v4  ;;  %v3386_v6 = vmul.f32 %v3253_v4, %v3253_v4  ;;  %v1875_v57 = vor.u32 %v1874_v0, %v1870_v41 }
 0x284   : > { %v2997_v16 = vpop.f32.mrf.mxu3 }
 0x285   : > { %v3417_v25 = vadd.f32 %v3416_v43, %v3386_v6  ;;  %v2998_v50 = vadd.f32 %v2997_v16, %v2908_v30  ;;  %v5733_v6 = vld [vmem:[#allocation32_spill] sm:$0xff]  ;;  %v1866_v16 = vrot.slane %v1865_v42, 4  ;;  %v1876_v46 = vrot.slane %v1875_v57, 4 }
 0x286   : > { %v2457_v59 = vadd.f32 %v5548_v54, %v5733_v6 }
 0x287   : > { %v3064_v38 = vadd.f32 %v2998_v50, %v2456_v14  ;;  %2950 = vmatmul.bf16.gmra.mxu2 %v5532_v63  ;;  %v2669_v50 = vsel %vm5314_vm13, %v3905_v21, %v2668_v19  ;;  %v1871_v54 = vsel %vm5037_vm10, %v1866_v16, %v1870_v41  ;;  %v2496_v21 = vld [vmem:[#allocation2 + $0xcc] sm:$0xe] }
 0x288   : > { %v3190_v51 = vpop.f32.mrf.mxu0  ;;  %v3906_v6 = vrot.slane %v2496_v21, 9 }
 0x289   : > { %v3254_v1 = vadd.f32 %v3187_v44, %v3064_v38  ;;  %3039 = vmatmul.bf16.gmra.mxu3 %v5545_v56  ;;  %v2671_v44 = vrot.slane %v4339_v17, 5 }
 0x28a   : > { %v2911_v43 = vpop.f32.mrf.mxu2  ;;  %v2397_v34 = vpop.f32.mrf.mxu1 }
 0x28b   : > { %v4125_v8 = vpack.c.bf16 %v3254_v1, %v3253_v4  ;;  %v3349_v63 = vadd.f32 %v3348_v20, %v3254_v1  ;;  %v3387_v13 = vmul.f32 %v3254_v1, %v3254_v1  ;;  %3229 = vmatmul.bf16.gmra.mxu0 %v5564_v22  ;;  %v1880_v4 = vrot.slane %v1878_v61, 5 }
 0x28c   : > { %v3000_v30 = vpop.f32.mrf.mxu3  ;;  %v2672_v33 = vsel %vm5314_vm13, %v2670_v11, %v2671_v44  ;;  %v2744_v1 = vunpack.c.l.b16 %v2669_v50  ;;  %v2306_v61 = vunpack.c.l.b16 %v1871_v54  ;;  %v2459_v55 = vadd.f32 %v2397_v34, %v5344_v3 }
 0x28d   : > { %4185 = vst [vmem:[%s5508_s21 + $0x20] sm:$0xff] %v4125_v8   ;;  %v3418_v58 = vadd.f32 %v3417_v25, %v3387_v13  ;;  %v3001_v5 = vadd.f32 %v3000_v30, %v2911_v43  ;;  %2436 = vmatmul.bf16.gmra.mxu1 %v5351_v9  ;;  %v1881_v9 = vsel %vm5037_vm10, %v1876_v46, %v1880_v4  ;;  %v2745_v2 = vunpack.c.l.b16 %v2672_v33 }
 0x28e   : > { %v2458_v43 = vadd.f32 %v2394_v28, %v5330_v15  ;;  %v2307_v8 = vunpack.c.l.b16 %v1881_v9 }
 0x28f   : > { %v3065_v20 = vadd.f32 %v3001_v5, %v2457_v59  ;;  %v2746_v13 = vpack.c.b16 %v2745_v2, %v2744_v1  ;;  %v2677_v59 = vrot.slane %v2675_v12, 4 }
 0x290   : > { %v3192_v14 = vpop.f32.mrf.mxu0 }
 0x291   : > { %v3255_v49 = vadd.f32 %v3190_v51, %v3065_v20  ;;  %v2676_v20 = vsel %vm5314_vm13, %v3906_v6, %v2675_v12 }
 0x292   : > { %v2913_v0 = vpop.f32.mrf.mxu2  ;;  %v2399_v25 = vpop.f32.mrf.mxu1 }
 0x293   : > { %v3350_v38 = vadd.f32 %v3349_v63, %v3255_v49  ;;  %v3388_v27 = vmul.f32 %v3255_v49, %v3255_v49  ;;  %v2308_v63 = vpack.c.b16 %v2307_v8, %v2306_v61  ;;  %v2460_v3 = vadd.f32 %v2399_v25, %v5353_v32 }
 0x294   : > { %v3002_v42 = vpop.f32.mrf.mxu3 }
 0x295   : > { %v3419_v19 = vadd.f32 %v3418_v58, %v3388_v27  ;;  %v3003_v57 = vadd.f32 %v3002_v42, %v2913_v0 }
 0x297   : > { %v3066_v51 = vadd.f32 %v3003_v57, %v2458_v43  ;;  %2955 = vmatmul.bf16.gmra.mxu2 %v5545_v56  ;;  %v2678_v56 = vrot.slane %v5566_v18, 5  ;;  %v3104_v18 = vunpack.c.l.b16 %v2676_v20 }
 0x298   : > { %v3195_v30 = vpop.f32.mrf.mxu0 }
 0x299   : > { %v3256_v41 = vadd.f32 %v3192_v14, %v3066_v51  ;;  %3044 = vmatmul.bf16.gmra.mxu3 %v5564_v22  ;;  %v2679_v14 = vsel %vm5314_vm13, %v2677_v59, %v2678_v56 }
 0x29a   : > { %v2916_v11 = vpop.f32.mrf.mxu2  ;;  %v2402_v15 = vpop.f32.mrf.mxu1  ;;  %v3105_v9 = vunpack.c.l.b16 %v2679_v14 }
 0x29b   : > { %v4130_v28 = vpack.c.bf16 %v3256_v41, %v3255_v49  ;;  %v3351_v17 = vadd.f32 %v3350_v38, %v3256_v41  ;;  %v3389_v44 = vmul.f32 %v3256_v41, %v3256_v41  ;;  %3234 = vmatmul.bf16.gmra.mxu0 %v2746_v13  ;;  %v2461_v12 = vadd.f32 %v2402_v15, %v5359_v45 }
 0x29c   : > { %v3005_v58 = vpop.f32.mrf.mxu3  ;;  %v3106_v2 = vpack.c.b16 %v3105_v9, %v3104_v18 }
 0x29d   : > { %4186 = vst [vmem:[%s5508_s21 + $0x28] sm:$0xff] %v4130_v28   ;;  %v3420_v5 = vadd.f32 %v3419_v19, %v3389_v44  ;;  %v3006_v16 = vadd.f32 %v3005_v58, %v2916_v11  ;;  %2441 = vmatmul.bf16.gmra.mxu1 %v2308_v63 }
 0x29f   : > { %v3067_v46 = vadd.f32 %v3006_v16, %v2459_v55 }
 0x2a0   : > { %v3197_v4 = vpop.f32.mrf.mxu0 }
 0x2a1   : > { %v3257_v50 = vadd.f32 %v3195_v30, %v3067_v46 }
 0x2a2   : > { %v2918_v33 = vpop.f32.mrf.mxu2  ;;  %v2404_v49 = vpop.f32.mrf.mxu1 }
 0x2a3   : > { %v3352_v0 = vadd.f32 %v3351_v17, %v3257_v50  ;;  %v3390_v54 = vmul.f32 %v3257_v50, %v3257_v50  ;;  %v2462_v44 = vadd.f32 %v2404_v49, %v5362_v48 }
 0x2a4   : > { %v3007_v38 = vpop.f32.mrf.mxu3 }
 0x2a5   : > { %v3421_v27 = vadd.f32 %v3420_v5, %v3390_v54  ;;  %v3008_v34 = vadd.f32 %v3007_v38, %v2918_v33 }
 0x2a7   : > { %v3068_v1 = vadd.f32 %v3008_v34, %v2460_v3  ;;  %2960 = vmatmul.bf16.gmra.mxu2 %v5564_v22 }
 0x2a8   : > { %v3200_v43 = vpop.f32.mrf.mxu0 }
 0x2a9   : > { %v3258_v37 = vadd.f32 %v3197_v4, %v3068_v1  ;;  %3049 = vmatmul.bf16.gmra.mxu3 %v2746_v13 }
 0x2aa   : > { %v2921_v42 = vpop.f32.mrf.mxu2  ;;  %v2407_v19 = vpop.f32.mrf.mxu1 }
 0x2ab   : > { %v4135_v57 = vpack.c.bf16 %v3258_v37, %v3257_v50  ;;  %v3353_v61 = vadd.f32 %v3352_v0, %v3258_v37  ;;  %v3391_v8 = vmul.f32 %v3258_v37, %v3258_v37  ;;  %3239 = vmatmul.bf16.gmra.mxu0 %v3106_v2  ;;  %v2463_v20 = vadd.f32 %v2407_v19, %v5368_v39 }
 0x2ac   : > { %v3010_v51 = vpop.f32.mrf.mxu3 }
 0x2ad   : > { %4187 = vst [vmem:[%s5508_s21 + $0x30] sm:$0xff] %v4135_v57   ;;  %v3422_v30 = vadd.f32 %v3421_v27, %v3391_v8  ;;  %v3011_v32 = vadd.f32 %v3010_v51, %v2921_v42 }
 0x2af   : > { %v3069_v25 = vadd.f32 %v3011_v32, %v2461_v12 }
 0x2b0   : > { %v3202_v41 = vpop.f32.mrf.mxu0 }
 0x2b1   : > { %v3259_v63 = vadd.f32 %v3200_v43, %v3069_v25 }
 0x2b2   : > { %v2923_v22 = vpop.f32.mrf.mxu2  ;;  %v2409_v21 = vpop.f32.mrf.mxu1 }
 0x2b3   : > { %v3354_v11 = vadd.f32 %v3353_v61, %v3259_v63  ;;  %v3392_v13 = vmul.f32 %v3259_v63, %v3259_v63  ;;  %v2464_v27 = vadd.f32 %v2409_v21, %v5378_v26 }
 0x2b4   : > { %v3012_v28 = vpop.f32.mrf.mxu3 }
 0x2b5   : > { %v3423_v17 = vadd.f32 %v3422_v30, %v3392_v13  ;;  %v3013_v58 = vadd.f32 %v3012_v28, %v2923_v22 }
 0x2b7   : > { %v3070_v6 = vadd.f32 %v3013_v58, %v2462_v44 }
 0x2b8   : > { %v3205_v59 = vpop.f32.mrf.mxu0 }
 0x2b9   : > { %v3260_v56 = vadd.f32 %v3202_v41, %v3070_v6 }
 0x2ba   : > { %v2926_v5 = vpop.f32.mrf.mxu2  ;;  %v2412_v55 = vpop.f32.mrf.mxu1 }
 0x2bb   : > { %v4140_v45 = vpack.c.bf16 %v3260_v56, %v3259_v63  ;;  %v3355_v15 = vadd.f32 %v3354_v11, %v3260_v56  ;;  %v3393_v16 = vmul.f32 %v3260_v56, %v3260_v56  ;;  %v2465_v8 = vadd.f32 %v2412_v55, %v5384_v7 }
 0x2bc   : > { %v3015_v46 = vpop.f32.mrf.mxu3 }
 0x2bd   : > { %4188 = vst [vmem:[%s5508_s21 + $0x38] sm:$0xff] %v4140_v45   ;;  %v3424_v4 = vadd.f32 %v3423_v17, %v3393_v16  ;;  %v3016_v14 = vadd.f32 %v3015_v46, %v2926_v5 }
 0x2bf   : > { %v3071_v50 = vadd.f32 %v3016_v14, %v2463_v20 }
 0x2c0   : > { %v3207_v33 = vpop.f32.mrf.mxu0 }
 0x2c1   : > { %v3261_v0 = vadd.f32 %v3205_v59, %v3071_v50 }
 0x2c2   : > { %v2928_v54 = vpop.f32.mrf.mxu2  ;;  %v2414_v48 = vpop.f32.mrf.mxu1 }
 0x2c3   : > { %v3356_v49 = vadd.f32 %v3355_v15, %v3261_v0  ;;  %v3394_v18 = vmul.f32 %v3261_v0, %v3261_v0  ;;  %v2466_v11 = vadd.f32 %v2414_v48, %v5394_v23 }
 0x2c4   : > { %v3017_v9 = vpop.f32.mrf.mxu3 }
 0x2c5   : > { %v3425_v38 = vadd.f32 %v3424_v4, %v3394_v18  ;;  %v3018_v3 = vadd.f32 %v3017_v9, %v2928_v54 }
 0x2c7   : > { %v3072_v34 = vadd.f32 %v3018_v3, %v2464_v27 }
 0x2c8   : > { %v3210_v1 = vpop.f32.mrf.mxu0 }
 0x2c9   : > { %v3262_v2 = vadd.f32 %v3207_v33, %v3072_v34 }
 0x2ca   : > { %v2931_v43 = vpop.f32.mrf.mxu2  ;;  %v2417_v37 = vpop.f32.mrf.mxu1 }
 0x2cb   : > { %v4145_v39 = vpack.c.bf16 %v3262_v2, %v3261_v0  ;;  %v3357_v42 = vadd.f32 %v3356_v49, %v3262_v2  ;;  %v3395_v19 = vmul.f32 %v3262_v2, %v3262_v2  ;;  %v2467_v45 = vadd.f32 %v2417_v37, %v5400_v47 }
 0x2cc   : > { %v3020_v57 = vpop.f32.mrf.mxu3 }
 0x2cd   : > { %4189 = vst [vmem:[%s5508_s21 + $0x40] sm:$0xff] %v4145_v39   ;;  %v3426_v61 = vadd.f32 %v3425_v38, %v3395_v19  ;;  %v3021_v51 = vadd.f32 %v3020_v57, %v2931_v43 }
 0x2cf   : > { %v3073_v30 = vadd.f32 %v3021_v51, %v2465_v8 }
 0x2d0   : > { %v3212_v12 = vpop.f32.mrf.mxu0 }
 0x2d1   : > { %v3263_v32 = vadd.f32 %v3210_v1, %v3073_v30 }
 0x2d2   : > { %v2933_v25 = vpop.f32.mrf.mxu2  ;;  %v2419_v26 = vpop.f32.mrf.mxu1 }
 0x2d3   : > { %v3358_v41 = vadd.f32 %v3357_v42, %v3263_v32  ;;  %v3396_v63 = vmul.f32 %v3263_v32, %v3263_v32  ;;  %v2468_v54 = vadd.f32 %v2419_v26, %v5410_v62 }
 0x2d4   : > { %v3022_v22 = vpop.f32.mrf.mxu3 }
 0x2d5   : > { %v3427_v21 = vadd.f32 %v3426_v61, %v3396_v63  ;;  %v3023_v13 = vadd.f32 %v3022_v22, %v2933_v25 }
 0x2d7   : > { %v3074_v28 = vadd.f32 %v3023_v13, %v2466_v11 }
 0x2d8   : > { %v3215_v17 = vpop.f32.mrf.mxu0 }
 0x2d9   : > { %v3264_v44 = vadd.f32 %v3212_v12, %v3074_v28 }
 0x2da   : > { %v2936_v58 = vpop.f32.mrf.mxu2  ;;  %v2422_v6 = vpop.f32.mrf.mxu1 }
 0x2db   : > { %v4150_v7 = vpack.c.bf16 %v3264_v44, %v3263_v32  ;;  %v3359_v59 = vadd.f32 %v3358_v41, %v3264_v44  ;;  %v3397_v56 = vmul.f32 %v3264_v44, %v3264_v44  ;;  %v2469_v43 = vadd.f32 %v2422_v6, %v5416_v24 }
 0x2dc   : > { %v3025_v5 = vpop.f32.mrf.mxu3 }
 0x2dd   : > { %4190 = vst [vmem:[%s5508_s21 + $0x48] sm:$0xff] %v4150_v7   ;;  %v3428_v55 = vadd.f32 %v3427_v21, %v3397_v56  ;;  %v3026_v15 = vadd.f32 %v3025_v5, %v2936_v58 }
 0x2df   : > { %v3075_v16 = vadd.f32 %v3026_v15, %v2467_v45 }
 0x2e0   : > { %v3217_v46 = vpop.f32.mrf.mxu0 }
 0x2e1   : > { %v3265_v4 = vadd.f32 %v3215_v17, %v3075_v16 }
 0x2e2   : > { %v2938_v20 = vpop.f32.mrf.mxu2  ;;  %v2424_v23 = vpop.f32.mrf.mxu1 }
 0x2e3   : > { %v3360_v14 = vadd.f32 %v3359_v59, %v3265_v4  ;;  %v3398_v50 = vmul.f32 %v3265_v4, %v3265_v4  ;;  %v2470_v30 = vadd.f32 %v2424_v23, %v5426_v31 }
 0x2e4   : > { %v3027_v33 = vpop.f32.mrf.mxu3 }
 0x2e5   : > { %v3429_v0 = vadd.f32 %v3428_v55, %v3398_v50  ;;  %v3028_v48 = vadd.f32 %v3027_v33, %v2938_v20 }
 0x2e7   : > { %v3076_v49 = vadd.f32 %v3028_v48, %v2468_v54 }
 0x2e8   : > { %v3220_v18 = vpop.f32.mrf.mxu0 }
 0x2e9   : > { %v3266_v9 = vadd.f32 %v3217_v46, %v3076_v49 }
 0x2ea   : > { %v2941_v38 = vpop.f32.mrf.mxu2  ;;  %v2427_v1 = vpop.f32.mrf.mxu1 }
 0x2eb   : > { %v4155_v27 = vpack.c.bf16 %v3266_v9, %v3265_v4  ;;  %v3361_v47 = vadd.f32 %v3360_v14, %v3266_v9  ;;  %v3399_v3 = vmul.f32 %v3266_v9, %v3266_v9  ;;  %v2471_v28 = vadd.f32 %v2427_v1, %v5432_v53 }
 0x2ec   : > { %v3030_v34 = vpop.f32.mrf.mxu3 }
 0x2ed   : > { %4191 = vst [vmem:[%s5508_s21 + $0x50] sm:$0xff] %v4155_v27   ;;  %v3430_v2 = vadd.f32 %v3429_v0, %v3399_v3  ;;  %v3031_v37 = vadd.f32 %v3030_v34, %v2941_v38 }
 0x2ef   : > { %v3077_v39 = vadd.f32 %v3031_v37, %v2469_v43 }
 0x2f0   : > { %v3222_v42 = vpop.f32.mrf.mxu0 }
 0x2f1   : > { %v3267_v19 = vadd.f32 %v3220_v18, %v3077_v39 }
 0x2f2   : > { %v2943_v57 = vpop.f32.mrf.mxu2  ;;  %v2429_v32 = vpop.f32.mrf.mxu1 }
 0x2f3   : > { %v3362_v62 = vadd.f32 %v3361_v47, %v3267_v19  ;;  %v3400_v61 = vmul.f32 %v3267_v19, %v3267_v19  ;;  %v2472_v45 = vadd.f32 %v2429_v32, %v5442_v36 }
 0x2f4   : > { %v3032_v8 = vpop.f32.mrf.mxu3 }
 0x2f5   : > { %v3431_v51 = vadd.f32 %v3430_v2, %v3400_v61  ;;  %v3033_v12 = vadd.f32 %v3032_v8, %v2943_v57 }
 0x2f7   : > { %v3078_v25 = vadd.f32 %v3033_v12, %v2470_v30 }
 0x2f8   : > { %v3225_v26 = vpop.f32.mrf.mxu0 }
 0x2f9   : > { %v3268_v41 = vadd.f32 %v3222_v42, %v3078_v25 }
 0x2fa   : > { %v2946_v63 = vpop.f32.mrf.mxu2  ;;  %v2432_v6 = vpop.f32.mrf.mxu1 }
 0x2fb   : > { %v4160_v22 = vpack.c.bf16 %v3268_v41, %v3267_v19  ;;  %v3363_v24 = vadd.f32 %v3362_v62, %v3268_v41  ;;  %v3401_v21 = vmul.f32 %v3268_v41, %v3268_v41  ;;  %v2473_v54 = vadd.f32 %v2432_v6, %v5448_v60 }
 0x2fc   : > { %v3035_v11 = vpop.f32.mrf.mxu3 }
 0x2fd   : > { %4192 = vst [vmem:[%s5508_s21 + $0x58] sm:$0xff] %v4160_v22   ;;  %v3432_v13 = vadd.f32 %v3431_v51, %v3401_v21  ;;  %v3036_v17 = vadd.f32 %v3035_v11, %v2946_v63 }
 0x2ff   : > { %v3079_v44 = vadd.f32 %v3036_v17, %v2471_v28 }
 0x300   : > { %v3227_v58 = vpop.f32.mrf.mxu0 }
 0x301   : > { %v3269_v7 = vadd.f32 %v3225_v26, %v3079_v44 }
 0x302   : > { %v2948_v31 = vpop.f32.mrf.mxu2  ;;  %v2434_v23 = vpop.f32.mrf.mxu1 }
 0x303   : > { %v3364_v59 = vadd.f32 %v3363_v24, %v3269_v7  ;;  %v3402_v56 = vmul.f32 %v3269_v7, %v3269_v7  ;;  %v2474_v1 = vadd.f32 %v2434_v23, %v5458_v10 }
 0x304   : > { %v3037_v5 = vpop.f32.mrf.mxu3 }
 0x305   : > { %v3433_v55 = vadd.f32 %v3432_v13, %v3402_v56  ;;  %v3038_v15 = vadd.f32 %v3037_v5, %v2948_v31 }
 0x307   : > { %v3080_v16 = vadd.f32 %v3038_v15, %v2472_v45 }
 0x308   : > { %v3230_v46 = vpop.f32.mrf.mxu0 }
 0x309   : > { %v3270_v4 = vadd.f32 %v3227_v58, %v3080_v16 }
 0x30a   : > { %v2951_v20 = vpop.f32.mrf.mxu2  ;;  %v2437_v3 = vpop.f32.mrf.mxu1 }
 0x30b   : > { %v4165_v53 = vpack.c.bf16 %v3270_v4, %v3269_v7  ;;  %v3365_v14 = vadd.f32 %v3364_v59, %v3270_v4  ;;  %v3403_v50 = vmul.f32 %v3270_v4, %v3270_v4  ;;  %v2475_v8 = vadd.f32 %v2437_v3, %v5464_v29 }
 0x30c   : > { %v3040_v33 = vpop.f32.mrf.mxu3 }
 0x30d   : > { %4193 = vst [vmem:[%s5508_s21 + $0x60] sm:$0xff] %v4165_v53   ;;  %v3434_v0 = vadd.f32 %v3433_v55, %v3403_v50  ;;  %v3041_v48 = vadd.f32 %v3040_v33, %v2951_v20 }
 0x30f   : > { %v3081_v49 = vadd.f32 %v3041_v48, %v2473_v54 }
 0x310   : > { %v3232_v18 = vpop.f32.mrf.mxu0 }
 0x311   : > { %v3271_v9 = vadd.f32 %v3230_v46, %v3081_v49 }
 0x312   : > { %v2953_v38 = vpop.f32.mrf.mxu2  ;;  %v2439_v30 = vpop.f32.mrf.mxu1 }
 0x313   : > { %v3366_v36 = vadd.f32 %v3365_v14, %v3271_v9  ;;  %v3404_v27 = vmul.f32 %v3271_v9, %v3271_v9  ;;  %v2476_v24 = vadd.f32 %v2439_v30, %v5474_v35 }
 0x314   : > { %v3042_v47 = vpop.f32.mrf.mxu3 }
 0x315   : > { %v3435_v34 = vadd.f32 %v3434_v0, %v3404_v27  ;;  %v3043_v2 = vadd.f32 %v3042_v47, %v2953_v38 }
 0x317   : > { %v3082_v43 = vadd.f32 %v3043_v2, %v2474_v1 }
 0x318   : > { %v3235_v39 = vpop.f32.mrf.mxu0 }
 0x319   : > { %v3272_v37 = vadd.f32 %v3232_v18, %v3082_v43 }
 0x31a   : > { %v2956_v42 = vpop.f32.mrf.mxu2  ;;  %v2442_v13 = vpop.f32.mrf.mxu1 }
 0x31b   : > { %v4170_v19 = vpack.c.bf16 %v3272_v37, %v3271_v9  ;;  %v3367_v60 = vadd.f32 %v3366_v36, %v3272_v37  ;;  %v3405_v57 = vmul.f32 %v3272_v37, %v3272_v37  ;;  %v2477_v31 = vadd.f32 %v2442_v13, %v5480_v52 }
 0x31c   : > { %v3045_v62 = vpop.f32.mrf.mxu3 }
 0x31d   : > { %4194 = vst [vmem:[%s5508_s21 + $0x68] sm:$0xff] %v4170_v19   ;;  %v3436_v61 = vadd.f32 %v3435_v34, %v3405_v57  ;;  %v3046_v51 = vadd.f32 %v3045_v62, %v2956_v42 }
 0x31f   : > { %v3083_v12 = vadd.f32 %v3046_v51, %v2475_v8 }
 0x320   : > { %v3237_v41 = vpop.f32.mrf.mxu0 }
 0x321   : > { %v3273_v32 = vadd.f32 %v3235_v39, %v3083_v12 }
 0x322   : > { %v2958_v25 = vpop.f32.mrf.mxu2  ;;  %v2444_v35 = vpop.f32.mrf.mxu1 }
 0x323   : > { %v3368_v10 = vadd.f32 %v3367_v60, %v3273_v32  ;;  %v3406_v26 = vmul.f32 %v3273_v32, %v3273_v32  ;;  %v2478_v52 = vadd.f32 %v2444_v35, %v5490_v40 }
 0x324   : > { %v3047_v63 = vpop.f32.mrf.mxu3 }
 0x325   : > { %v3437_v22 = vadd.f32 %v3436_v61, %v3406_v26  ;;  %v3048_v21 = vadd.f32 %v3047_v63, %v2958_v25 }
 0x327   : > { %v3084_v11 = vadd.f32 %v3048_v21, %v2476_v24 }
 0x328   : > { %v3240_v56 = vpop.f32.mrf.mxu0 }
 0x329   : > { %v3274_v28 = vadd.f32 %v3237_v41, %v3084_v11 }
 0x32a   : > { %v2961_v17 = vpop.f32.mrf.mxu2 }
 0x32b   : > { %v4175_v29 = vpack.c.bf16 %v3274_v28, %v3273_v32  ;;  %v3369_v44 = vadd.f32 %v3368_v10, %v3274_v28  ;;  %v3407_v58 = vmul.f32 %v3274_v28, %v3274_v28 }
 0x32c   : > { %v3050_v6 = vpop.f32.mrf.mxu3 }
 0x32d   : > { %4195 = vst [vmem:[%s5508_s21 + $0x70] sm:$0xff] %v4175_v29   ;;  %v3438_v7 = vadd.f32 %v3437_v22, %v3407_v58  ;;  %v3051_v59 = vadd.f32 %v3050_v6, %v2961_v17 }
 0x32f   : > { %v3085_v5 = vadd.f32 %v3051_v59, %v2477_v31 }
 0x330   : > { %v3242_v53 = vpop.f32.mrf.mxu0 }
 0x331   : > { %v3275_v55 = vadd.f32 %v3240_v56, %v3085_v5 }
 0x332   : > { %v2963_v45 = vpop.f32.mrf.mxu2 }
 0x333   : > { %v3370_v15 = vadd.f32 %v3369_v44, %v3275_v55  ;;  %v3408_v16 = vmul.f32 %v3275_v55, %v3275_v55 }
 0x334   : > { %v3052_v46 = vpop.f32.mrf.mxu3 }
 0x335   : > { %v3439_v4 = vadd.f32 %v3438_v7, %v3408_v16  ;;  %v3053_v20 = vadd.f32 %v3052_v46, %v2963_v45 }
 0x337   : > { %v3086_v23 = vadd.f32 %v3053_v20, %v2478_v52 }
 0x339   : > { %v3276_v14 = vadd.f32 %v3242_v53, %v3086_v23 }
 0x33b   : > { %v4180_v50 = vpack.c.bf16 %v3276_v14, %v3275_v55  ;;  %v3371_v33 = vadd.f32 %v3370_v15, %v3276_v14  ;;  %v3409_v0 = vmul.f32 %v3276_v14, %v3276_v14 }
 0x33d   : > { %4196 = vst [vmem:[%s5508_s21 + $0x78] sm:$0xff] %v4180_v50   ;;  %v3372_v54 = vrot.slane %v3371_v33, 4  ;;  %v3440_v48 = vadd.f32 %v3439_v4, %v3409_v0 }
 0x33e   : > { %4457 = shalt.err (!%p4454_p10)
}
 0x33f   : > { %s4539_s12 = smov 64   ;;  %s4540_s21 = smov 4   ;;  %v3373_v40 = vadd.f32 %v3372_v54, %v3371_v33  ;;  %v3441_v49 = vrot.slane %v3440_v48, 4 }
 0x340   : > { %4231 = dma.vmem_to_hbm [thread:$0]  (%p4638_p3), %s3470_s5, 2048, %s3472_s8, %s3452_s9, %s4539_s12, %s4539_s12, %s4540_s21  }
 0x341   : > { %v3374_v18 = vrot.slane %v3373_v40, 2  ;;  %v3442_v9 = vadd.f32 %v3441_v49, %v3440_v48  ;;  %s3624_s26 = sshll.u32 %s4671_s20, 1  ;;  %s4007_s6 = sshll.u32 %s4587_s19, 1 }
 0x342   : > { %s3484_s24 = scalar_lea.hbm %s5679_s4, %s4007_s6  ;;  %s261_s23 = scalar_lea.vmem [#allocation10], %s3624_s26 }
 0x343   : > { %v3375_v38 = vadd.f32 %v3374_v18, %v3373_v40  ;;  %v3443_v36 = vrot.slane %v3442_v9, 2  ;;  %s3486_s25 = sshll.u32 %s261_s23, 4  ;;  %s3488_s5 = sshll.u32 %s3484_s24, 4  ;;  %s3487_s25 = int_to_ptr.vmem [resolvable:$true] %s3486_s25  ;;  %s3489_s5 = int_to_ptr.hbm [resolvable:$true] %s3488_s5 }
 0x344   : > { %s3457_s19 = scalar_lea.sflag [#allocation11], %s4671_s20  ;;  %s4472_s8 = sshra.s32 %s3489_s5, 4  ;;  %s4473_s8 = int_to_ptr.hbm [resolvable:$true] %s4472_s8 }
 0x345   : > { %v3376_v27 = vrot.slane %v3375_v38, 1  ;;  %v3444_v47 = vadd.f32 %v3443_v36, %v3442_v9  ;;  %s4474_s9 = scalar_lea.hbm %s4473_s8, 2  ;;  %s4478_s29 = scalar_lea.hbm %s5679_s4, 4 }
 0x346   : > { %p4475_p12 = scmp.ne.s32.totalorder %s4473_s8, %s4474_s9  ;;  %p4479_p5 = scmp.lt.s32.totalorder %s4473_s8, %s5679_s4 }
 0x347   : > { %v3445_v3 = vrot.slane %v3444_v47, 1  ;;  %v3377_v34 = vadd.f32 %v3376_v27, %v3375_v38  ;;  %p4480_p7 = scmp.lt.s32.totalorder %s4478_s29, %s4474_s9 }
 0x348   : > { %p4476_p13 = pnand %p4475_p12, %p4638_p3 }
 0x349   : > { %v3446_v1 = vadd.f32 %v3445_v3, %v3444_v47  ;;  %p4481_p1 = por %p4480_p7, %p4479_p5 }
 0x34a   : > { %p4477_p0 = pneg %p4476_p13 }
 0x34b   : > { %v3448_v2 = vsel %vm680_vm6, %v3377_v34, %v3446_v1 }
 0x34c   : > { %3450 = vst [vmem:[%s261_s23] sm:$0x3] %v3448_v2  ;;  %p4482_p4 = pnand %p4481_p1, %p4477_p0 }
 0x34e   : > { %4485 = shalt.err (!%p4482_p4)
}
 0x34f   : > { %4232 = dma.vmem_to_hbm [thread:$0]  (%p4638_p3), %s3487_s25, 32, %s3489_s5, %s3457_s19  }
 0x350 PF: > { %s3500_s20 = sand.u32 1, %s4520_s15   ;;  %p5734_p8 = scmp.ge.s32.totalorder %s4532_s18, 2 }
 0x351   : > { %s3501_s21 = scalar_lea.sflag [#allocation5], %s3500_s20 }
 0x352   : > { %p4247_p11 = pnand %p5734_p8, %p4601_p6 }
 0x354   : > { %p4248_p2 = pneg %p4247_p11 }
 0x356   : > { %4511 = dma.done.wait (%p4248_p2), %s3501_s21, 2048  }
 0x357   : > { %4513 = vsyncadd (%p4248_p2), %s3501_s21, 4294965248  ;;  %s3511_s26 = scalar_lea.sflag [#allocation11], %s3500_s20 }
 0x358   : > { %4515 = dma.done.wait (%p4248_p2), %s3511_s26, 32  }
 0x359   : > { %4517 = vsyncadd (%p4248_p2), %s3511_s26, 4294967264  ;;  %p22_p3 = scmp.ge.s32.totalorder %s4628_s10, 4   ;;  %s5735_s15 = smov %s4524_s16 }
 0x35a   : > { %s5736_s16 = smov %s4528_s17  ;;  %s5737_s17 = smov %s4644_s14 }
 0x35b   : > { %s5738_s18 = smov %s4628_s10  ;;  %24 = sbr.rel (!%p22_p3) target bundleno = 8 (0x8), region = 107 }
 0x360   :  { %3517 = vsyncpa [#allocation4], 1 }
 0x361   :  { %3519 = vsyncpa [#allocation4 + $0x1], 1 }
 0x362   :  { %3520 = vsyncpa [#allocation7], 1 }
 0x363   :  { %3521 = vsyncpa [#allocation5], 1 }
 0x364   :  { %3523 = vsyncpa [#allocation5 + $0x1], 1 }
 0x365   :  { %3524 = vsyncpa [#allocation11], 1 }
 0x366   :  { %3526 = vsyncpa [#allocation11 + $0x1], 1 }

</bundles_post_ra>
